<compile_context>
chip_gen: v7x
topology: tpu7x:2x2x1
jax: 0.10.0
libtpu: 0.0.40
codegen_flags: <defaults>
</compile_context>

<pallas_src>
import numpy as np
import jax
import jax.numpy as jnp
from jax.experimental import pallas as pl
from jax.experimental.pallas import tpu as pltpu

_EPS = 1e-5  # torch BatchNorm default eps


# ----------------------------------------------------------------------------
# threshold derivation (same math as the PyTorch get_thresholds)
# ----------------------------------------------------------------------------
def _get_thresholds(bias, bn_w, bn_b, running_mean, running_var, eps=_EPS):
    beta_hat = (bias - running_mean) / np.sqrt(running_var + eps)
    gamma_hat = 1.0 / np.sqrt(running_var + eps)
    beta_hat = beta_hat * bn_w + bn_b
    gamma_hat = gamma_hat * bn_w
    hi = (0.5 - beta_hat) / gamma_hat
    lo = (-0.5 - beta_hat) / gamma_hat
    flip = gamma_hat < 0
    hi = np.where(flip, -hi, hi)
    lo = np.where(flip, -lo, lo)
    hi = np.ceil(hi) + 0.0  # +0.0 maps -0.0 -> 0.0 (matches the torch `where`)
    lo = np.ceil(lo) + 0.0
    return lo.astype(np.float32), hi.astype(np.float32)


# ----------------------------------------------------------------------------
# One-time (init) lowering of the convolutions to equivalent dense matrices.
# ----------------------------------------------------------------------------
def _conv2d_as_matrix(w, H, W, stride, pad):
    """Matrix M such that  flat(conv2d(x, w, stride, pad)) == flat(x) @ M.

    Input flattened in (Cin, H, W) order, output in (Cout, Ho, Wo) order
    (both are the row-major flatten of the torch NCHW tensors, batch 1)."""
    Cout, Cin, kh, kw = w.shape
    sh, sw = stride
    Ho = (H + 2 * pad - kh) // sh + 1
    Wo = (W + 2 * pad - kw) // sw + 1
    M = np.zeros((Cin * H * W, Cout * Ho * Wo), np.float32)
    ho = np.arange(Ho)
    wo = np.arange(Wo)
    for co in range(Cout):
        for ci in range(Cin):
            for dy in range(kh):
                iy = ho * sh + dy - pad
                vy = (iy >= 0) & (iy < H)
                for dx in range(kw):
                    val = float(w[co, ci, dy, dx])
                    if val == 0.0:
                        continue
                    ix = wo * sw + dx - pad
                    vx = (ix >= 0) & (ix < W)
                    IY, IX = np.meshgrid(iy[vy], ix[vx], indexing="ij")
                    HO, WO = np.meshgrid(ho[vy], wo[vx], indexing="ij")
                    rows = ci * H * W + IY * W + IX
                    cols = co * Ho * Wo + HO * Wo + WO
                    M[rows.ravel(), cols.ravel()] += val
    return M, Ho, Wo


def _conv1d_causal_as_matrix(w, T, dilation, in_time_major):
    """Matrix M such that  flat(causal_dilated_conv1d(seq, w)) == flat(seq) @ M.

    Output flattened in (Cout, T) order (== torch flatten of (1, C, T)).
    Input flattened (T, Cin) time-major if `in_time_major` (the running
    sequence buffer layout), else (Cin, T) channel-major."""
    Cout, Cin, k = w.shape
    M = np.zeros((Cin * T, Cout * T), np.float32)
    t = np.arange(T)
    for co in range(Cout):
        for j in range(k):
            off = (k - 1 - j) * dilation
            tv = t[t - off >= 0]
            ti = tv - off
            for ci in range(Cin):
                val = float(w[co, ci, j])
                if val == 0.0:
                    continue
                rows = ti * Cin + ci if in_time_major else ci * T + ti
                M[rows, co * T + tv] += val
    return M


# ---- plain numpy references used only for an init-time self check ----------
def _ref_conv2d(x, w, stride, pad):
    Cout, Cin, kh, kw = w.shape
    _, H, W = x.shape
    sh, sw = stride
    Ho = (H + 2 * pad - kh) // sh + 1
    Wo = (W + 2 * pad - kw) // sw + 1
    xp = np.zeros((Cin, H + 2 * pad, W + 2 * pad), x.dtype)
    xp[:, pad:pad + H, pad:pad + W] = x
    out = np.zeros((Cout, Ho, Wo), x.dtype)
    for ho in range(Ho):
        for wo in range(Wo):
            patch = xp[:, ho * sh:ho * sh + kh, wo * sw:wo * sw + kw]
            out[:, ho, wo] = np.tensordot(w, patch, axes=([1, 2, 3], [0, 1, 2]))
    return out


def _ref_conv1d_causal(x_ct, w, dilation):
    Cout, Cin, k = w.shape
    T = x_ct.shape[1]
    pad = (k - 1) * dilation
    xp = np.zeros((Cin, T + pad), x_ct.dtype)
    xp[:, pad:] = x_ct
    out = np.zeros((Cout, T), x_ct.dtype)
    for t in range(T):
        for j in range(k):
            out[:, t] += w[:, :, j] @ xp[:, t + j * dilation]
    return out


# ----------------------------------------------------------------------------
# Fused Pallas kernel: whole forward pass, everything VMEM resident.
# ----------------------------------------------------------------------------
def _double_threshold(x, lo, hi):
    # torch double_threshold: (x > hi) -> +1, (x < lo) -> -1, else 0
    # (if both fire, +1 + (-1) = 0, matching max_t + min_t)
    return (x > hi).astype(jnp.float32) - (x < lo).astype(jnp.float32)


def _build_fused_kernel(num_cnn, num_tcn, chan_per_step):
    n_layers = num_cnn + num_tcn

    def kernel(*refs):
        it = iter(refs)
        x_ref = next(it)                 # (1, Cin*H*W) f32
        state_ref = next(it)             # (1, tcn_width * C) f32, time-major
        layer_refs = [(next(it), next(it), next(it)) for _ in range(n_layers)]
        wd_ref = next(it)                # (n_dense_in, n_classes) bf16
        out_ref = next(it)               # (1, n_classes) f32
        state_out_ref = next(it)         # aliased with state_ref's HBM buffer

        # ---- CNN stack: each conv is one MXU matmul + fused threshold -------
        act = x_ref[...]
        for m_ref, lo_ref, hi_ref in layer_refs[:num_cnn]:
            acc = jnp.dot(act.astype(m_ref.dtype), m_ref[...],
                          preferred_element_type=jnp.float32)
            act = _double_threshold(acc, lo_ref[...], hi_ref[...])  # ternary f32

        # ---- TCN running sequence: drop oldest frame, append newest ---------
        # (aligned lane-dim concat; chan_per_step is a multiple of 128 here)
        seq = jnp.concatenate([state_ref[:, chan_per_step:], act], axis=1)
        state_out_ref[...] = seq
        act = seq

        # ---- TCN stack: causal dilated conv1d as one matmul each ------------
        for m_ref, lo_ref, hi_ref in layer_refs[num_cnn:]:
            acc = jnp.dot(act.astype(m_ref.dtype), m_ref[...],
                          preferred_element_type=jnp.float32)
            act = _double_threshold(acc, lo_ref[...], hi_ref[...])

        # ---- dense head (ternary weights, zero bias) -------------------------
        out_ref[...] = jnp.dot(act.astype(wd_ref.dtype), wd_ref[...],
                               preferred_element_type=jnp.float32)

    return kernel


# ----------------------------------------------------------------------------
# Net
# ----------------------------------------------------------------------------
class NetPallas:
    def __init__(self, key, *, layer_ni, layer_no, layer_k, strides, padding,
                 tcn_k, tcn_dilation, tcn_width, n_classes,
                 imageheight, imagewidth, num_cnn_layers, num_tcn_layers):
        assert num_cnn_layers >= 1 and num_tcn_layers >= 1
        # TODO(synk): configurations without a TCN stage and batch sizes > 1 are
        # not supported; the torch forward itself hard-codes batch 1 through the
        # tcn_sequence update (flatten + squeeze + write into (1, C, T) state).

        self.n_classes = n_classes
        self.tcn_width = tcn_width
        chk = np.random.default_rng(0)

        mats = []                                   # (matrix, lo_row, hi_row) per layer
        h, w_sp = imageheight, imagewidth
        self.shapes = [(1, layer_ni[0], h, w_sp)]

        # -------------------- CNN layers --------------------
        for i in range(num_cnn_layers):
            key, *ks = jax.random.split(key, 7)
            cin, cout = layer_ni[i], layer_no[i]
            cw = np.asarray(jax.random.randint(ks[0], (cout, cin, layer_k, layer_k),
                                               -1, 2)).astype(np.float32)
            bias = np.asarray(jax.random.normal(ks[1], (cout,), jnp.float32))
            bn_w = np.asarray(jax.random.normal(ks[2], (cout,), jnp.float32))
            bn_b = np.asarray(jax.random.normal(ks[3], (cout,), jnp.float32))
            mean = np.asarray(jax.random.normal(ks[4], (cout,), jnp.float32))
            var = np.asarray(jax.random.uniform(ks[5], (cout,), jnp.float32))
            cw = np.where((bn_w < 0)[:, None, None, None], -cw, cw)  # conv.weight[bn.weight<0] *= -1
            lo, hi = _get_thresholds(bias, bn_w, bn_b, mean, var)    # forward uses zero conv bias

            M, ho, wo = _conv2d_as_matrix(cw, h, w_sp, strides[i], padding)
            # init-time self check of the conv -> matmul lowering (float64, exact)
            x_chk = chk.standard_normal((cin, h, w_sp))
            ref = _ref_conv2d(x_chk, cw.astype(np.float64), strides[i], padding)
            assert np.allclose(x_chk.reshape(-1) @ M.astype(np.float64),
                               ref.reshape(-1), rtol=1e-8, atol=1e-8), \
                f"CNN layer {i}: conv->matrix lowering mismatch"

            mdtype = jnp.float32 if i == 0 else jnp.bfloat16  # layer 0 multiplies the raw f32 input
            mats.append((jnp.asarray(M, dtype=mdtype),
                         jnp.asarray(np.repeat(lo, ho * wo)[None, :]),
                         jnp.asarray(np.repeat(hi, ho * wo)[None, :])))
            h, w_sp = ho, wo
            self.shapes.append((1, cout, ho, wo))

        # flattened CNN output == channel count of the TCN running sequence
        c_step = layer_no[num_cnn_layers - 1] * h * w_sp
        assert c_step == layer_ni[num_cnn_layers], (c_step, layer_ni[num_cnn_layers])
        self._chan_per_step = c_step
        self.shapes[-1] = (1, c_step, tcn_width)   # torch replaces it with tcn_sequence's shape

        # -------------------- TCN layers --------------------
        for j in range(num_tcn_layers):
            key, *ks = jax.random.split(key, 7)
            cin = layer_ni[num_cnn_layers + j]
            cout = layer_no[num_cnn_layers + j]
            tw = np.asarray(jax.random.randint(ks[0], (cout, cin, tcn_k[j]),
                                               -1, 2)).astype(np.float32)
            bias = np.asarray(jax.random.normal(ks[1], (cout,), jnp.float32))
            bn_w = np.asarray(jax.random.normal(ks[2], (cout,), jnp.float32))
            bn_b = np.asarray(jax.random.normal(ks[3], (cout,), jnp.float32))
            mean = np.asarray(jax.random.normal(ks[4], (cout,), jnp.float32))
            var = np.asarray(jax.random.uniform(ks[5], (cout,), jnp.float32))
            tw = np.where((bn_w < 0)[:, None, None], -tw, tw)
            lo, hi = _get_thresholds(bias, bn_w, bn_b, mean, var)

            in_time_major = (j == 0)   # first TCN layer reads the (T, C) sequence buffer
            M = _conv1d_causal_as_matrix(tw, tcn_width, tcn_dilation[j], in_time_major)
            # init-time self check (float64, exact)
            seq_chk = (chk.standard_normal((tcn_width, cin)) if in_time_major
                       else chk.standard_normal((cin, tcn_width)))
            x_ct = seq_chk.T if in_time_major else seq_chk
            ref = _ref_conv1d_causal(x_ct, tw.astype(np.float64), tcn_dilation[j])
            assert np.allclose(seq_chk.reshape(-1) @ M.astype(np.float64),
                               ref.reshape(-1), rtol=1e-8, atol=1e-8), \
                f"TCN layer {j}: conv1d->matrix lowering mismatch"

            mats.append((jnp.asarray(M, dtype=jnp.bfloat16),
                         jnp.asarray(np.repeat(lo, tcn_width)[None, :]),
                         jnp.asarray(np.repeat(hi, tcn_width)[None, :])))
            self.shapes.append((1, cout, tcn_width))

        # -------------------- dense head (DensetoConv.dense) --------------------
        n_inputs = layer_no[num_cnn_layers + num_tcn_layers - 1] * tcn_width
        key, kw = jax.random.split(key)
        dense_w = np.asarray(jax.random.randint(kw, (n_classes, n_inputs),
                                                -1, 2)).astype(np.float32)
        wd_t = jnp.asarray(dense_w.T, dtype=jnp.bfloat16)   # ternary -> bf16 is exact, bias = 0
        self.shapes[-1] = (1, n_inputs)
        self.shapes.append((1, n_classes))
        # TODO(synk): DensetoConv's conv-equivalence self-check (acts_to_conv /
        # weights_to_conv + assert) depends on undefined globals (k, ni,
        # weight_stagger) and does not affect the returned value; omitted.

        # TCN running sequence, stored as a flat time-major row (1, T * C);
        # element [0, t*C + c] == torch tcn_sequence[0, c, t].
        self.tcn_sequence = jnp.zeros((1, c_step * tcn_width), jnp.float32)

        # -------------------- single fused pallas_call --------------------
        weight_args = []
        for m, lo_row, hi_row in mats:
            weight_args.extend([m, lo_row, hi_row])
        weight_args.append(wd_t)
        self._weight_args = tuple(weight_args)

        n_in = 2 + len(weight_args)
        kernel = _build_fused_kernel(num_cnn_layers, num_tcn_layers, c_step)
        fused = pl.pallas_call(
            kernel,
            out_shape=(jax.ShapeDtypeStruct((1, n_classes), jnp.float32),
                       jax.ShapeDtypeStruct((1, c_step * tcn_width), jnp.float32)),
            in_specs=[pl.BlockSpec(memory_space=pltpu.MemorySpace.VMEM)] * n_in,
            out_specs=(pl.BlockSpec(memory_space=pltpu.MemorySpace.VMEM),
                       pl.BlockSpec(memory_space=pltpu.MemorySpace.VMEM)),
            # the running TCN sequence (input 1) is written back in place
            input_output_aliases={1: 1},
        )

        def _forward(x, state, *weights):
            x_flat = x.reshape(1, -1).astype(jnp.float32)   # NCHW row-major == (C,H,W) flatten
            logits, new_state = fused(x_flat, state, *weights)
            return logits[:, :, None], new_state            # unsqueeze(-1)

        self._forward = jax.jit(_forward)

    # ------------------------------------------------------------------
    def __call__(self, x):
        assert x.shape[0] == 1, "TCN state update assumes batch 1 (as in the torch module)"
        out, self.tcn_sequence = self._forward(x, self.tcn_sequence, *self._weight_args)
        return out, list(self.shapes)


# ----------------------------------------------------------------------------
if __name__ == "__main__":
    key = jax.random.PRNGKey(0)
    key_params, key_input = jax.random.split(key)

    # 2 CNN layers (k=3, stride 2, pad 1): 16x16 -> 8x8 -> 4x4, channels 4->8->16
    # flattened CNN output = 16*4*4 = 256 == TCN input channels
    # 1 TCN layer: 256 -> 32 channels, k=2, dilation=1, width=8
    # dense: 32*8 = 256 -> 10 classes
    net = NetPallas(
        key_params,
        layer_ni=[4, 8, 256],
        layer_no=[8, 16, 32],
        layer_k=3,
        strides=[(2, 2), (2, 2)],
        padding=1,
        tcn_k=[2],
        tcn_dilation=[1],
        tcn_width=8,
        n_classes=10,
        imageheight=16,
        imagewidth=16,
        num_cnn_layers=2,
        num_tcn_layers=1,
    )

    x = jax.random.normal(key_input, (1, 4, 16, 16), jnp.float32)
    out, shapes = net(x)
    out = jax.block_until_ready(out)
    assert out.shape == (1, 10, 1), out.shape
    assert shapes == [(1, 4, 16, 16), (1, 8, 8, 8), (1, 256, 8), (1, 256), (1, 10)], shapes

    # second step exercises the in-place recurrent-state (aliased) path
    out2, _ = net(x)
    out2 = jax.block_until_ready(out2)
    assert out2.shape == (1, 10, 1), out2.shape

    print("KERNEL_OK")
</pallas_src>

<mosaic_0001>
module attributes {stable_mosaic.version = 11 : i64} {
  func.func @kernel(%arg0: memref<1x1024xf32, #tpu.memory_space<vmem>>, %arg1: memref<1x2048xf32, #tpu.memory_space<vmem>>, %arg2: memref<1024x512xf32, #tpu.memory_space<vmem>>, %arg3: memref<1x512xf32, #tpu.memory_space<vmem>>, %arg4: memref<1x512xf32, #tpu.memory_space<vmem>>, %arg5: memref<512x256xbf16, #tpu.memory_space<vmem>>, %arg6: memref<1x256xf32, #tpu.memory_space<vmem>>, %arg7: memref<1x256xf32, #tpu.memory_space<vmem>>, %arg8: memref<2048x256xbf16, #tpu.memory_space<vmem>>, %arg9: memref<1x256xf32, #tpu.memory_space<vmem>>, %arg10: memref<1x256xf32, #tpu.memory_space<vmem>>, %arg11: memref<256x10xbf16, #tpu.memory_space<vmem>>, %arg12: memref<1x10xf32, #tpu.memory_space<vmem>>, %arg13: memref<1x2048xf32, #tpu.memory_space<vmem>>) attributes {dimension_semantics = [], scalar_prefetch = 0 : i64, scratch_operands = 0 : i64, tpu.core_type = #tpu.core_type<tc>} {
    %c0 = arith.constant 0 : index
    %c0_0 = arith.constant 0 : index
    %0 = vector.load %arg0[%c0, %c0_0] : memref<1x1024xf32, #tpu.memory_space<vmem>>, vector<1x1024xf32>
    %c0_1 = arith.constant 0 : index
    %c0_2 = arith.constant 0 : index
    %1 = vector.load %arg2[%c0_1, %c0_2] : memref<1024x512xf32, #tpu.memory_space<vmem>>, vector<1024x512xf32>
    %cst = arith.constant dense<0.000000e+00> : vector<1x512xf32>
    %2 = tpu.matmul %0, %1, %cst {dimension_numbers = #tpu.dot_dimension_numbers<[1], [0], [0], [1], [0, 0, 1, 1], [], []>} : vector<1x1024xf32>, vector<1024x512xf32>, vector<1x512xf32> -> vector<1x512xf32>
    %c0_3 = arith.constant 0 : index
    %c0_4 = arith.constant 0 : index
    %3 = vector.load %arg3[%c0_3, %c0_4] : memref<1x512xf32, #tpu.memory_space<vmem>>, vector<1x512xf32>
    %c0_5 = arith.constant 0 : index
    %c0_6 = arith.constant 0 : index
    %4 = vector.load %arg4[%c0_5, %c0_6] : memref<1x512xf32, #tpu.memory_space<vmem>>, vector<1x512xf32>
    %5 = arith.cmpf ogt, %2, %4 : vector<1x512xf32>
    %6 = arith.extui %5 : vector<1x512xi1> to vector<1x512xi32>
    %7 = arith.sitofp %6 : vector<1x512xi32> to vector<1x512xf32>
    %8 = arith.cmpf olt, %2, %3 : vector<1x512xf32>
    %9 = arith.extui %8 : vector<1x512xi1> to vector<1x512xi32>
    %10 = arith.sitofp %9 : vector<1x512xi32> to vector<1x512xf32>
    %11 = arith.subf %7, %10 : vector<1x512xf32>
    %12 = arith.truncf %11 : vector<1x512xf32> to vector<1x512xbf16>
    %c0_7 = arith.constant 0 : index
    %c0_8 = arith.constant 0 : index
    %13 = vector.load %arg5[%c0_7, %c0_8] : memref<512x256xbf16, #tpu.memory_space<vmem>>, vector<512x256xbf16>
    %cst_9 = arith.constant dense<0.000000e+00> : vector<1x256xf32>
    %14 = tpu.matmul %12, %13, %cst_9 {dimension_numbers = #tpu.dot_dimension_numbers<[1], [0], [0], [1], [0, 0, 1, 1], [], []>} : vector<1x512xbf16>, vector<512x256xbf16>, vector<1x256xf32> -> vector<1x256xf32>
    %c0_10 = arith.constant 0 : index
    %c0_11 = arith.constant 0 : index
    %15 = vector.load %arg6[%c0_10, %c0_11] : memref<1x256xf32, #tpu.memory_space<vmem>>, vector<1x256xf32>
    %c0_12 = arith.constant 0 : index
    %c0_13 = arith.constant 0 : index
    %16 = vector.load %arg7[%c0_12, %c0_13] : memref<1x256xf32, #tpu.memory_space<vmem>>, vector<1x256xf32>
    %17 = arith.cmpf ogt, %14, %16 : vector<1x256xf32>
    %18 = arith.extui %17 : vector<1x256xi1> to vector<1x256xi32>
    %19 = arith.sitofp %18 : vector<1x256xi32> to vector<1x256xf32>
    %20 = arith.cmpf olt, %14, %15 : vector<1x256xf32>
    %21 = arith.extui %20 : vector<1x256xi1> to vector<1x256xi32>
    %22 = arith.sitofp %21 : vector<1x256xi32> to vector<1x256xf32>
    %23 = arith.subf %19, %22 : vector<1x256xf32>
    %c0_14 = arith.constant 0 : index
    %c256 = arith.constant 256 : index
    %24 = vector.load %arg1[%c0_14, %c256] : memref<1x2048xf32, #tpu.memory_space<vmem>>, vector<1x1792xf32>
    %25 = tpu.concatenate %24, %23 in 1 : vector<1x1792xf32>, vector<1x256xf32> -> vector<1x2048xf32>
    %c0_15 = arith.constant 0 : index
    %c0_16 = arith.constant 0 : index
    %26 = vector.load %arg13[%c0_15, %c0_16] : memref<1x2048xf32, #tpu.memory_space<vmem>>, vector<1x2048xf32>
    tpu.vector_store %arg13[%c0_15, %c0_16], %25 {strides = array<i32>} : memref<1x2048xf32, #tpu.memory_space<vmem>>, vector<1x2048xf32>,
    %27 = arith.truncf %25 : vector<1x2048xf32> to vector<1x2048xbf16>
    %c0_17 = arith.constant 0 : index
    %c0_18 = arith.constant 0 : index
    %28 = vector.load %arg8[%c0_17, %c0_18] : memref<2048x256xbf16, #tpu.memory_space<vmem>>, vector<2048x256xbf16>
    %cst_19 = arith.constant dense<0.000000e+00> : vector<1x256xf32>
    %29 = tpu.matmul %27, %28, %cst_19 {dimension_numbers = #tpu.dot_dimension_numbers<[1], [0], [0], [1], [0, 0, 1, 1], [], []>} : vector<1x2048xbf16>, vector<2048x256xbf16>, vector<1x256xf32> -> vector<1x256xf32>
    %c0_20 = arith.constant 0 : index
    %c0_21 = arith.constant 0 : index
    %30 = vector.load %arg9[%c0_20, %c0_21] : memref<1x256xf32, #tpu.memory_space<vmem>>, vector<1x256xf32>
    %c0_22 = arith.constant 0 : index
    %c0_23 = arith.constant 0 : index
    %31 = vector.load %arg10[%c0_22, %c0_23] : memref<1x256xf32, #tpu.memory_space<vmem>>, vector<1x256xf32>
    %32 = arith.cmpf ogt, %29, %31 : vector<1x256xf32>
    %33 = arith.extui %32 : vector<1x256xi1> to vector<1x256xi32>
    %34 = arith.sitofp %33 : vector<1x256xi32> to vector<1x256xf32>
    %35 = arith.cmpf olt, %29, %30 : vector<1x256xf32>
    %36 = arith.extui %35 : vector<1x256xi1> to vector<1x256xi32>
    %37 = arith.sitofp %36 : vector<1x256xi32> to vector<1x256xf32>
    %38 = arith.subf %34, %37 : vector<1x256xf32>
    %39 = arith.truncf %38 : vector<1x256xf32> to vector<1x256xbf16>
    %c0_24 = arith.constant 0 : index
    %c0_25 = arith.constant 0 : index
    %40 = vector.load %arg11[%c0_24, %c0_25] : memref<256x10xbf16, #tpu.memory_space<vmem>>, vector<256x10xbf16>
    %cst_26 = arith.constant dense<0.000000e+00> : vector<1x10xf32>
    %41 = tpu.matmul %39, %40, %cst_26 {dimension_numbers = #tpu.dot_dimension_numbers<[1], [0], [0], [1], [0, 0, 1, 1], [], []>} : vector<1x256xbf16>, vector<256x10xbf16>, vector<1x10xf32> -> vector<1x10xf32>
    %c0_27 = arith.constant 0 : index
    %c0_28 = arith.constant 0 : index
    %42 = vector.load %arg12[%c0_27, %c0_28] : memref<1x10xf32, #tpu.memory_space<vmem>>, vector<1x10xf32>
    tpu.vector_store %arg12[%c0_27, %c0_28], %41 {strides = array<i32>} : memref<1x10xf32, #tpu.memory_space<vmem>>, vector<1x10xf32>,
    return
  }
}

</mosaic_0001>

<bundles_post_ra>
// kernel: _forward.1
= control target key start
LH: loop header
LB: loop body
LE: loop exit
PB: predicated region body
PF: predicated region fallthrough
CT: control target
= control target key end

     0   :  { %19 = vsyncpa [#allocation3], 0  ;;  %s6355_s0 = inlined_call_operand.vmem [shape: f32[1,1024], index: 0, kind: input, shape index: {}]   ;;  %s6356_s1 = inlined_call_operand.vmem [shape: f32[1,2048], index: 1, kind: input, shape index: {}, may-alias: {1,13}]   ;;  %s6357_s2 = inlined_call_operand.hbm [shape: f32[1024,512], index: 2, kind: input, shape index: {}]   ;;  %s6358_s3 = inlined_call_operand.hbm [shape: f32[1,512], index: 3, kind: input, shape index: {}]   ;;  %s6359_s4 = inlined_call_operand.hbm [shape: f32[1,512], index: 4, kind: input, shape index: {}]   ;;  %s6360_s5 = inlined_call_operand.hbm [shape: bf16[512,256], index: 5, kind: input, shape index: {}]   ;;  %s6361_s6 = inlined_call_operand.hbm [shape: f32[1,256], index: 6, kind: input, shape index: {}]   ;;  %s6362_s7 = inlined_call_operand.hbm [shape: f32[1,256], index: 7, kind: input, shape index: {}]   ;;  %s6363_s8 = inlined_call_operand.hbm [shape: bf16[2048,256], index: 8, kind: input, shape index: {}]   ;;  %s6364_s9 = inlined_call_operand.hbm [shape: f32[1,256], index: 9, kind: input, shape index: {}]   ;;  %s6365_s10 = inlined_call_operand.hbm [shape: f32[1,256], index: 10, kind: input, shape index: {}]   ;;  %s6366_s11 = inlined_call_operand.vmem [shape: bf16[256,10], index: 11, kind: input, shape index: {}]   ;;  %s6367_s12 = inlined_call_operand.hbm [shape: f32[1,10], index: 12, kind: output, shape index: {0}]   ;;  %s6368_s13 = inlined_call_operand.vmem [shape: f32[1,2048], index: 13, kind: output, shape index: {1}, may-alias: {1,13}]  }
   0x1   :  { %20 = vsyncpa [#allocation6], 0 }
   0x2   :  { %21 = vsyncpa [#allocation9], 0 }
   0x3   :  { %22 = vsyncpa [#allocation12], 0 }
   0x4   :  { %23 = vsyncpa [#allocation15], 0 }
   0x5   :  { %24 = vsyncpa [#allocation4], 0  ;;  %s5823_s25 = smov [#allocation5]   ;;  %s5824_s27 = smov [#allocation8]  }
   0x6   :  { %s47_s26 = sshll.u32 %s5823_s25, 4  ;;  %s66_s28 = sshll.u32 %s5824_s27, 4  ;;  %s48_s26 = int_to_ptr.vmem [resolvable:$true] %s47_s26  ;;  %s5909_s28 = int_to_ptr.vmem [resolvable:$true] %s66_s28 }
   0x7   :  { %s5591_s14 = scalar_lea.hbm %s6358_s3, 64 }
   0x8   :  { %p5592_p0 = scmp.ne.s32.totalorder %s6358_s3, %s5591_s14  ;;  %p5595_p1 = scmp.lt.u32.totalorder %s5591_s14, %s6358_s3 }
   0xa   :  { %p5597_p2 = pnand %p5595_p1, %p5592_p0 }
   0xc   :  { %5600 = shalt.err (!%p5597_p2)
}
   0xd   :  { %s5601_s19 = scalar_lea.vmem %s48_s26, 64  ;;  %p5606_p4 = scmp.lt.s32.totalorder %s48_s26, %s48_s26 }
   0xe   :  { %p5602_p3 = scmp.ne.s32.totalorder %s48_s26, %s5601_s19  ;;  %p5607_p5 = scmp.lt.s32.totalorder %s5601_s19, %s5601_s19 }
  0x10   :  { %p5608_p6 = por %p5607_p5, %p5606_p4 }
  0x12   :  { %p5609_p7 = pnand %p5608_p6, %p5602_p3 }
  0x14   :  { %5612 = shalt.err (!%p5609_p7)
}
  0x15   :  { %50 = dma.hbm_to_vmem [thread:$0]  %s6358_s3, 64, %s48_s26, [#allocation6]  }
  0x16   :  { %s5613_s24 = scalar_lea.hbm %s6360_s5, 8192 }
  0x17   :  { %p5614_p8 = scmp.ne.s32.totalorder %s6360_s5, %s5613_s24  ;;  %p5617_p9 = scmp.lt.u32.totalorder %s5613_s24, %s6360_s5 }
  0x19   :  { %p5619_p10 = pnand %p5617_p9, %p5614_p8 }
  0x1b   :  { %5622 = shalt.err (!%p5619_p10)
}
  0x1c   :  { %s5623_s14 = scalar_lea.vmem %s5909_s28, 8192  ;;  %p5628_p12 = scmp.lt.s32.totalorder %s5909_s28, %s5909_s28 }
  0x1d   :  { %p5624_p11 = scmp.ne.s32.totalorder %s5909_s28, %s5623_s14  ;;  %p5629_p13 = scmp.lt.s32.totalorder %s5623_s14, %s5623_s14 }
  0x1f   :  { %p5630_p0 = por %p5629_p13, %p5628_p12 }
  0x21   :  { %p5631_p1 = pnand %p5630_p0, %p5624_p11 }
  0x23   :  { %5634 = shalt.err (!%p5631_p1)
}
  0x24   :  { %s5825_s3 = smov 128   ;;  %s5826_s26 = smov 8  }
  0x25   :  { %72 = dma.hbm_to_vmem [thread:$0]  %s6360_s5, 8192, %s5909_s28, [#allocation9], %s5825_s3, %s5825_s3, %s5826_s26  }
  0x26   :  { %s5827_s17 = smov [#allocation11]   ;;  %s5828_s19 = smov [#allocation14]  }
  0x27   :  { %s89_s18 = sshll.u32 %s5827_s17, 4  ;;  %s111_s20 = sshll.u32 %s5828_s19, 4  ;;  %s90_s18 = int_to_ptr.vmem [resolvable:$true] %s89_s18  ;;  %s112_s20 = int_to_ptr.vmem [resolvable:$true] %s111_s20 }
  0x28   :  { %s5635_s23 = scalar_lea.hbm %s6362_s7, 32 }
  0x29   :  { %p5636_p2 = scmp.ne.s32.totalorder %s6362_s7, %s5635_s23  ;;  %p5639_p3 = scmp.lt.u32.totalorder %s5635_s23, %s6362_s7 }
  0x2b   :  { %p5641_p4 = pnand %p5639_p3, %p5636_p2 }
  0x2d   :  { %5644 = shalt.err (!%p5641_p4)
}
  0x2e   :  { %s5645_s5 = scalar_lea.vmem %s90_s18, 32  ;;  %p5650_p6 = scmp.lt.s32.totalorder %s90_s18, %s90_s18 }
  0x2f   :  { %p5646_p5 = scmp.ne.s32.totalorder %s90_s18, %s5645_s5  ;;  %p5651_p7 = scmp.lt.s32.totalorder %s5645_s5, %s5645_s5 }
  0x31   :  { %p5652_p8 = por %p5651_p7, %p5650_p6 }
  0x33   :  { %p5653_p9 = pnand %p5652_p8, %p5646_p5 }
  0x35   :  { %5656 = shalt.err (!%p5653_p9)
}
  0x36   :  { %92 = dma.hbm_to_vmem [thread:$0]  %s6362_s7, 32, %s90_s18, [#allocation12]  }
  0x37   :  { %s5657_s16 = scalar_lea.hbm %s6364_s9, 32 }
  0x38   :  { %p5658_p10 = scmp.ne.s32.totalorder %s6364_s9, %s5657_s16  ;;  %p5661_p11 = scmp.lt.u32.totalorder %s5657_s16, %s6364_s9 }
  0x3a   :  { %p5663_p12 = pnand %p5661_p11, %p5658_p10 }
  0x3c   :  { %5666 = shalt.err (!%p5663_p12)
}
  0x3d   :  { %s5667_s23 = scalar_lea.vmem %s112_s20, 32  ;;  %p5672_p0 = scmp.lt.s32.totalorder %s112_s20, %s112_s20 }
  0x3e   :  { %p5668_p13 = scmp.ne.s32.totalorder %s112_s20, %s5667_s23  ;;  %p5673_p1 = scmp.lt.s32.totalorder %s5667_s23, %s5667_s23 }
  0x40   :  { %p5674_p2 = por %p5673_p1, %p5672_p0 }
  0x42   :  { %p5675_p3 = pnand %p5674_p2, %p5668_p13 }
  0x44   :  { %5678 = shalt.err (!%p5675_p3)
}
  0x45   :  { %114 = dma.hbm_to_vmem [thread:$0]  %s6364_s9, 32, %s112_s20, [#allocation15]  }
  0x46   :  { %s5829_s24 = smov [#allocation2]   ;;  %s5679_s5 = scalar_lea.hbm %s6357_s2, 65536 }
  0x47   :  { %s34_s25 = sshll.u32 %s5829_s24, 4  ;;  %p5680_p4 = scmp.ne.s32.totalorder %s6357_s2, %s5679_s5  ;;  %s35_s25 = int_to_ptr.vmem [resolvable:$true] %s34_s25 }
  0x48   :  { %p5683_p5 = scmp.lt.u32.totalorder %s5679_s5, %s6357_s2 }
  0x4a   :  { %p5685_p6 = pnand %p5683_p5, %p5680_p4 }
  0x4c   :  { %5688 = shalt.err (!%p5685_p6)
}
  0x4d   :  { %s5689_s16 = scalar_lea.vmem %s35_s25, 65536  ;;  %p5694_p8 = scmp.lt.s32.totalorder %s35_s25, %s35_s25 }
  0x4e   :  { %p5690_p7 = scmp.ne.s32.totalorder %s35_s25, %s5689_s16  ;;  %p5695_p9 = scmp.lt.s32.totalorder %s5689_s16, %s5689_s16 }
  0x50   :  { %p5696_p10 = por %p5695_p9, %p5694_p8 }
  0x52   :  { %p5697_p11 = pnand %p5696_p10, %p5690_p7 }
  0x54   :  { %5700 = shalt.err (!%p5697_p11)
}
  0x55   :  { %s5830_s9 = smov 512   ;;  %s5831_s20 = smov 32  }
  0x56   :  { %40 = dma.hbm_to_vmem [thread:$0]  %s6357_s2, 65536, %s35_s25, [#allocation3], %s5830_s9, %s5830_s9, %s5831_s20  }
  0x57   :  { %s5832_s21 = smov [#allocation7]   ;;  %s5833_s23 = smov [#allocation10]  }
  0x58   :  { %s57_s22 = sshll.u32 %s5832_s21, 4  ;;  %s79_s7 = sshll.u32 %s5833_s23, 4  ;;  %s58_s22 = int_to_ptr.vmem [resolvable:$true] %s57_s22  ;;  %s80_s7 = int_to_ptr.vmem [resolvable:$true] %s79_s7 }
  0x59   :  { %s5701_s27 = scalar_lea.hbm %s6359_s4, 64 }
  0x5a   :  { %p5702_p12 = scmp.ne.s32.totalorder %s6359_s4, %s5701_s27  ;;  %p5705_p13 = scmp.lt.u32.totalorder %s5701_s27, %s6359_s4 }
  0x5c   :  { %p5707_p0 = pnand %p5705_p13, %p5702_p12 }
  0x5e   :  { %5710 = shalt.err (!%p5707_p0)
}
  0x5f   :  { %s5711_s2 = scalar_lea.vmem %s58_s22, 64  ;;  %p5716_p2 = scmp.lt.s32.totalorder %s58_s22, %s58_s22 }
  0x60   :  { %p5712_p1 = scmp.ne.s32.totalorder %s58_s22, %s5711_s2  ;;  %p5717_p3 = scmp.lt.s32.totalorder %s5711_s2, %s5711_s2 }
  0x62   :  { %p5718_p4 = por %p5717_p3, %p5716_p2 }
  0x64   :  { %p5719_p5 = pnand %p5718_p4, %p5712_p1 }
  0x66   :  { %5722 = shalt.err (!%p5719_p5)
}
  0x67   :  { %60 = dma.hbm_to_vmem [thread:$0]  %s6359_s4, 64, %s58_s22, [#allocation6]  }
  0x68   :  { %s5723_s9 = scalar_lea.hbm %s6361_s6, 32 }
  0x69   :  { %p5724_p6 = scmp.ne.s32.totalorder %s6361_s6, %s5723_s9  ;;  %p5727_p7 = scmp.lt.u32.totalorder %s5723_s9, %s6361_s6 }
  0x6b   :  { %p5729_p8 = pnand %p5727_p7, %p5724_p6 }
  0x6d   :  { %5732 = shalt.err (!%p5729_p8)
}
  0x6e   :  { %s5733_s23 = scalar_lea.vmem %s80_s7, 32  ;;  %p5738_p10 = scmp.lt.s32.totalorder %s80_s7, %s80_s7 }
  0x6f   :  { %p5734_p9 = scmp.ne.s32.totalorder %s80_s7, %s5733_s23  ;;  %p5739_p11 = scmp.lt.s32.totalorder %s5733_s23, %s5733_s23 }
  0x71   :  { %p5740_p12 = por %p5739_p11, %p5738_p10 }
  0x73   :  { %p5741_p13 = pnand %p5740_p12, %p5734_p9 }
  0x75   :  { %5744 = shalt.err (!%p5741_p13)
}
  0x76   :  { %82 = dma.hbm_to_vmem [thread:$0]  %s6361_s6, 32, %s80_s7, [#allocation9]  }
  0x77   :  { %s5834_s18 = smov [#allocation13]   ;;  %s5835_s27 = smov [#allocation16]  }
  0x78   :  { %s98_s24 = sshll.u32 %s5834_s18, 4  ;;  %s121_s29 = sshll.u32 %s5835_s27, 4  ;;  %s99_s24 = int_to_ptr.vmem [resolvable:$true] %s98_s24  ;;  %s122_s29 = int_to_ptr.vmem [resolvable:$true] %s121_s29 }
  0x79   :  { %s5745_s30 = scalar_lea.hbm %s6363_s8, 32768 }
  0x7a   :  { %p5746_p0 = scmp.ne.s32.totalorder %s6363_s8, %s5745_s30  ;;  %p5749_p1 = scmp.lt.u32.totalorder %s5745_s30, %s6363_s8 }
  0x7c   :  { %p5751_p2 = pnand %p5749_p1, %p5746_p0 }
  0x7e   :  { %5754 = shalt.err (!%p5751_p2)
}
  0x7f   :  { %s5755_s6 = scalar_lea.vmem %s99_s24, 32768  ;;  %p5760_p4 = scmp.lt.s32.totalorder %s99_s24, %s99_s24 }
  0x80   :  { %p5756_p3 = scmp.ne.s32.totalorder %s99_s24, %s5755_s6  ;;  %p5761_p5 = scmp.lt.s32.totalorder %s5755_s6, %s5755_s6 }
  0x82   :  { %p5762_p6 = por %p5761_p5, %p5760_p4 }
  0x84   :  { %p5763_p7 = pnand %p5762_p6, %p5756_p3 }
  0x86   :  { %5766 = shalt.err (!%p5763_p7)
}
  0x87   :  { %104 = dma.hbm_to_vmem [thread:$0]  %s6363_s8, 32768, %s99_s24, [#allocation12], %s5825_s3, %s5825_s3, %s5826_s26  }
  0x88   :  { %s5767_s17 = scalar_lea.hbm %s6365_s10, 32 }
  0x89   :  { %p5768_p8 = scmp.ne.s32.totalorder %s6365_s10, %s5767_s17  ;;  %p5771_p9 = scmp.lt.u32.totalorder %s5767_s17, %s6365_s10 }
  0x8b   :  { %p5773_p10 = pnand %p5771_p9, %p5768_p8 }
  0x8d   :  { %5776 = shalt.err (!%p5773_p10)
}
  0x8e   :  { %s5777_s22 = scalar_lea.vmem %s122_s29, 32  ;;  %p5782_p12 = scmp.lt.s32.totalorder %s122_s29, %s122_s29 }
  0x8f   :  { %p5778_p11 = scmp.ne.s32.totalorder %s122_s29, %s5777_s22  ;;  %p5783_p13 = scmp.lt.s32.totalorder %s5777_s22, %s5777_s22 }
  0x91   :  { %p5784_p0 = por %p5783_p13, %p5782_p12 }
  0x93   :  { %p5785_p1 = pnand %p5784_p0, %p5778_p11 }
  0x95   :  { %5788 = shalt.err (!%p5785_p1)
}
  0x96   :  { %124 = dma.hbm_to_vmem [thread:$0]  %s6365_s10, 32, %s122_s29, [#allocation15]  }
  0x97   :  { %5811 = dma.done.wait [#allocation3], 65536  }
  0x98   :  { %5812 = vsyncadd [#allocation3], 4294901760 }
  0x99   :  { %5813 = dma.done.wait [#allocation6], 128  }
  0x9a   :  { %5814 = vsyncadd [#allocation6], 4294967168 }
  0x9b   :  { %5815 = dma.done.wait [#allocation9], 8224  }
  0x9c   :  { %5816 = vsyncadd [#allocation9], 4294959072 }
  0x9d   :  { %5817 = dma.done.wait [#allocation12], 32800  }
  0x9e   :  { %5818 = vsyncadd [#allocation12], 4294934496 }
  0x9f   :  { %5819 = dma.done.wait [#allocation15], 64  }
  0xa0   :  { %5820 = vsyncadd [#allocation15], 4294967232  ;;  %v157_v0 = vld [vmem:[#allocation2 + $0x8] sm:$0xff]  ;;  %v156_v2 = vld [vmem:[#allocation2] sm:$0xff]  ;;  %v669_v25 = vlaneseq }
  0xa1   :  { %v161_v1 = vld [vmem:[#allocation2 + $0x28] sm:$0xff]  ;;  %v160_v4 = vld [vmem:[#allocation2 + $0x20] sm:$0xff] }
  0xa2   :  { %v4522_v3 = vpack.c.bf16 %v161_v1, %v157_v0  ;;  %v165_v5 = vld [vmem:[#allocation2 + $0x48] sm:$0xff]  ;;  %v4524_v7 = vpack.c.bf16 %v160_v4, %v156_v2  ;;  %v164_v9 = vld [vmem:[#allocation2 + $0x40] sm:$0xff]  ;;  %v6030_v32 = vshrl.u32 %v669_v25, 7 }
  0xa3   :  { %v169_v6 = vld [vmem:[#allocation2 + $0x68] sm:$0xff]  ;;  %v168_v10 = vld [vmem:[#allocation2 + $0x60] sm:$0xff] }
  0xa4   :  { %v4526_v8 = vpack.c.bf16 %v169_v6, %v165_v5  ;;  %v173_v11 = vld [vmem:[#allocation2 + $0x88] sm:$0xff]  ;;  %4523 = vmatprep.subr.bf16.mxu0 %v4522_v3  ;;  %v4528_v13 = vpack.c.bf16 %v168_v10, %v164_v9  ;;  %v172_v15 = vld [vmem:[#allocation2 + $0x80] sm:$0xff]  ;;  %v6033_v39 = vsub.s32 1, %v6030_v32 }
  0xa5   :  { %v177_v12 = vld [vmem:[#allocation2 + $0xa8] sm:$0xff]  ;;  %4525 = vmatpush1.bf16.msra.mxu0 %v4524_v7  ;;  %v176_v16 = vld [vmem:[#allocation2 + $0xa0] sm:$0xff] }
  0xa6   :  { %4527 = vmatprep.subr.bf16.mxu0 %v4526_v8  ;;  %v4530_v14 = vpack.c.bf16 %v177_v12, %v173_v11  ;;  %v181_v17 = vld [vmem:[#allocation2 + $0xc8] sm:$0xff]  ;;  %v4532_v19 = vpack.c.bf16 %v176_v16, %v172_v15  ;;  %v180_v21 = vld [vmem:[#allocation2 + $0xc0] sm:$0xff] }
  0xa7   :  { %v185_v18 = vld [vmem:[#allocation2 + $0xe8] sm:$0xff]  ;;  %v184_v22 = vld [vmem:[#allocation2 + $0xe0] sm:$0xff] }
  0xa8   :  { %v4534_v20 = vpack.c.bf16 %v185_v18, %v181_v17  ;;  %v189_v23 = vld [vmem:[#allocation2 + $0x108] sm:$0xff]  ;;  %v4536_v26 = vpack.c.bf16 %v184_v22, %v180_v21  ;;  %v188_v28 = vld [vmem:[#allocation2 + $0x100] sm:$0xff] }
  0xa9   :  { %4529 = vmatpush1.bf16.msra.mxu0 %v4528_v13  ;;  %v193_v24 = vld [vmem:[#allocation2 + $0x128] sm:$0xff]  ;;  %v192_v29 = vld [vmem:[#allocation2 + $0x120] sm:$0xff] }
  0xaa   :  { %4531 = vmatprep.subr.bf16.mxu0 %v4530_v14  ;;  %v4538_v27 = vpack.c.bf16 %v193_v24, %v189_v23  ;;  %v197_v30 = vld [vmem:[#allocation2 + $0x148] sm:$0xff]  ;;  %v4540_v33 = vpack.c.bf16 %v192_v29, %v188_v28  ;;  %v196_v35 = vld [vmem:[#allocation2 + $0x140] sm:$0xff] }
  0xab   :  { %v201_v31 = vld [vmem:[#allocation2 + $0x168] sm:$0xff]  ;;  %v200_v36 = vld [vmem:[#allocation2 + $0x160] sm:$0xff] }
  0xac   :  { %v4542_v34 = vpack.c.bf16 %v201_v31, %v197_v30  ;;  %v205_v37 = vld [vmem:[#allocation2 + $0x188] sm:$0xff]  ;;  %v4544_v40 = vpack.c.bf16 %v200_v36, %v196_v35  ;;  %v204_v42 = vld [vmem:[#allocation2 + $0x180] sm:$0xff] }
  0xad   :  { %4533 = vmatpush1.bf16.msra.mxu0 %v4532_v19  ;;  %v209_v38 = vld [vmem:[#allocation2 + $0x1a8] sm:$0xff]  ;;  %v208_v43 = vld [vmem:[#allocation2 + $0x1a0] sm:$0xff] }
  0xae   :  { %4535 = vmatprep.subr.bf16.mxu0 %v4534_v20  ;;  %v4546_v41 = vpack.c.bf16 %v209_v38, %v205_v37  ;;  %v6038_v44 = vld [vmem:[%s6355_s0] sm:$0xff]  ;;  %v213_v45 = vld [vmem:[#allocation2 + $0x1c8] sm:$0xff]  ;;  %v4548_v48 = vpack.c.bf16 %v208_v43, %v204_v42  ;;  %v6049_v42 = vsub.s32 3, %v6030_v32 }
  0xaf   :  { %v217_v46 = vld [vmem:[#allocation2 + $0x1e8] sm:$0xff]  ;;  %v6042_v47 = vrot.slane %v6038_v44, %v6033_v39  ;;  %v212_v50 = vld [vmem:[#allocation2 + $0x1c0] sm:$0xff] }
  0xb0   :  { %v4550_v49 = vpack.c.bf16 %v217_v46, %v213_v45  ;;  %v216_v51 = vld [vmem:[#allocation2 + $0x1e0] sm:$0xff]  ;;  %v221_v52 = vld [vmem:[#allocation2 + $0x208] sm:$0xff] }
  0xb1   :  { %4537 = vmatpush1.bf16.msra.mxu0 %v4536_v26  ;;  %773 = vmatprep.mubr.f32.mxu0 %v6042_v47  ;;  %v225_v53 = vld [vmem:[#allocation2 + $0x228] sm:$0xff]  ;;  %v4552_v54 = vpack.c.bf16 %v216_v51, %v212_v50  ;;  %v220_v56 = vld [vmem:[#allocation2 + $0x200] sm:$0xff] }
  0xb2   :  { %4539 = vmatprep.subr.bf16.mxu0 %v4538_v27  ;;  %v4554_v55 = vpack.c.bf16 %v225_v53, %v221_v52  ;;  %v224_v57 = vld [vmem:[#allocation2 + $0x220] sm:$0xff]  ;;  %v229_v58 = vld [vmem:[#allocation2 + $0x248] sm:$0xff] }
  0xb3   :  { %v233_v59 = vld [vmem:[#allocation2 + $0x268] sm:$0xff]  ;;  %v4556_v60 = vpack.c.bf16 %v224_v57, %v220_v56  ;;  %v228_v62 = vld [vmem:[#allocation2 + $0x240] sm:$0xff] }
  0xb4   :  { %v4558_v61 = vpack.c.bf16 %v233_v59, %v229_v58  ;;  %v232_v63 = vld [vmem:[#allocation2 + $0x260] sm:$0xff]  ;;  %v237_v0 = vld [vmem:[#allocation2 + $0x288] sm:$0xff] }
  0xb5   :  { %4541 = vmatpush1.bf16.msra.mxu0 %v4540_v33  ;;  %v241_v1 = vld [vmem:[#allocation2 + $0x2a8] sm:$0xff]  ;;  %v4560_v2 = vpack.c.bf16 %v232_v63, %v228_v62  ;;  %v236_v4 = vld [vmem:[#allocation2 + $0x280] sm:$0xff] }
  0xb6   :  { %4543 = vmatprep.subr.bf16.mxu0 %v4542_v34  ;;  %v4562_v3 = vpack.c.bf16 %v241_v1, %v237_v0  ;;  %v240_v5 = vld [vmem:[#allocation2 + $0x2a0] sm:$0xff]  ;;  %v245_v6 = vld [vmem:[#allocation2 + $0x2c8] sm:$0xff] }
  0xb7   :  { %v249_v7 = vld [vmem:[#allocation2 + $0x2e8] sm:$0xff]  ;;  %v4564_v8 = vpack.c.bf16 %v240_v5, %v236_v4  ;;  %v244_v10 = vld [vmem:[#allocation2 + $0x2c0] sm:$0xff] }
  0xb8   :  { %v4566_v9 = vpack.c.bf16 %v249_v7, %v245_v6  ;;  %v248_v11 = vld [vmem:[#allocation2 + $0x2e0] sm:$0xff]  ;;  %v253_v12 = vld [vmem:[#allocation2 + $0x308] sm:$0xff] }
  0xb9   :  { %4545 = vmatpush1.bf16.msra.mxu0 %v4544_v40  ;;  %v257_v13 = vld [vmem:[#allocation2 + $0x328] sm:$0xff]  ;;  %v4568_v14 = vpack.c.bf16 %v248_v11, %v244_v10  ;;  %v252_v16 = vld [vmem:[#allocation2 + $0x300] sm:$0xff]  ;;  %v6046_v40 = vsub.s32 0, %v6030_v32 }
  0xba   :  { %4547 = vmatprep.subr.bf16.mxu0 %v4546_v41  ;;  %v4570_v15 = vpack.c.bf16 %v257_v13, %v253_v12  ;;  %v256_v17 = vld [vmem:[#allocation2 + $0x320] sm:$0xff]  ;;  %v261_v18 = vld [vmem:[#allocation2 + $0x348] sm:$0xff] }
  0xbb   :  { %v265_v19 = vld [vmem:[#allocation2 + $0x368] sm:$0xff]  ;;  %v4572_v20 = vpack.c.bf16 %v256_v17, %v252_v16  ;;  %v260_v22 = vld [vmem:[#allocation2 + $0x340] sm:$0xff]  ;;  %v6053_v50 = vrot.slane %v6038_v44, %v6046_v40 }
  0xbc   :  { %v4574_v21 = vpack.c.bf16 %v265_v19, %v261_v18  ;;  %v264_v23 = vld [vmem:[#allocation2 + $0x360] sm:$0xff]  ;;  %v269_v24 = vld [vmem:[#allocation2 + $0x388] sm:$0xff] }
  0xbd   :  { %4549 = vmatpush1.bf16.msra.mxu0 %v4548_v48  ;;  %v273_v25 = vld [vmem:[#allocation2 + $0x3a8] sm:$0xff]  ;;  %v4576_v26 = vpack.c.bf16 %v264_v23, %v260_v22  ;;  %v268_v28 = vld [vmem:[#allocation2 + $0x380] sm:$0xff] }
  0xbe   :  { %4551 = vmatprep.subr.bf16.mxu0 %v4550_v49  ;;  %v4578_v27 = vpack.c.bf16 %v273_v25, %v269_v24  ;;  %v272_v29 = vld [vmem:[#allocation2 + $0x3a0] sm:$0xff]  ;;  %v277_v30 = vld [vmem:[#allocation2 + $0x3c8] sm:$0xff] }
  0xbf   :  { %v281_v31 = vld [vmem:[#allocation2 + $0x3e8] sm:$0xff]  ;;  %v4580_v33 = vpack.c.bf16 %v272_v29, %v268_v28  ;;  %v276_v35 = vld [vmem:[#allocation2 + $0x3c0] sm:$0xff] }
  0xc0   :  { %v4582_v34 = vpack.c.bf16 %v281_v31, %v277_v30  ;;  %v280_v36 = vld [vmem:[#allocation2 + $0x3e0] sm:$0xff]  ;;  %v285_v37 = vld [vmem:[#allocation2 + $0x408] sm:$0xff] }
  0xc1   :  { %4553 = vmatpush1.bf16.msra.mxu0 %v4552_v54  ;;  %v289_v38 = vld [vmem:[#allocation2 + $0x428] sm:$0xff]  ;;  %v4584_v41 = vpack.c.bf16 %v280_v36, %v276_v35  ;;  %v284_v45 = vld [vmem:[#allocation2 + $0x400] sm:$0xff]  ;;  %v6057_v54 = vrot.slane %v6038_v44, %v6049_v42 }
  0xc2   :  { %4555 = vmatprep.subr.bf16.mxu0 %v4554_v55  ;;  %v4586_v43 = vpack.c.bf16 %v289_v38, %v285_v37  ;;  %v288_v46 = vld [vmem:[#allocation2 + $0x420] sm:$0xff]  ;;  %v293_v48 = vld [vmem:[#allocation2 + $0x448] sm:$0xff] }
  0xc3   :  { %v297_v49 = vld [vmem:[#allocation2 + $0x468] sm:$0xff]  ;;  %v4588_v51 = vpack.c.bf16 %v288_v46, %v284_v45  ;;  %v292_v52 = vld [vmem:[#allocation2 + $0x440] sm:$0xff] }
  0xc4   :  { %v296_v53 = vld [vmem:[#allocation2 + $0x460] sm:$0xff]  ;;  %v4590_v55 = vpack.c.bf16 %v297_v49, %v293_v48  ;;  %v301_v56 = vld [vmem:[#allocation2 + $0x488] sm:$0xff] }
  0xc5   :  { %4557 = vmatpush1.bf16.msra.mxu0 %v4556_v60  ;;  %v305_v57 = vld [vmem:[#allocation2 + $0x4a8] sm:$0xff]  ;;  %v4592_v58 = vpack.c.bf16 %v296_v53, %v292_v52  ;;  %v300_v59 = vld [vmem:[#allocation2 + $0x480] sm:$0xff] }
  0xc6   :  { %4559 = vmatprep.subr.bf16.mxu0 %v4558_v61  ;;  %v304_v60 = vld [vmem:[#allocation2 + $0x4a0] sm:$0xff]  ;;  %v4594_v61 = vpack.c.bf16 %v305_v57, %v301_v56  ;;  %v309_v62 = vld [vmem:[#allocation2 + $0x4c8] sm:$0xff] }
  0xc7   :  { %v313_v63 = vld [vmem:[#allocation2 + $0x4e8] sm:$0xff]  ;;  %v4596_v0 = vpack.c.bf16 %v304_v60, %v300_v59  ;;  %v308_v1 = vld [vmem:[#allocation2 + $0x4c0] sm:$0xff] }
  0xc8   :  { %v317_v4 = vld [vmem:[#allocation2 + $0x508] sm:$0xff]  ;;  %v316_v7 = vld [vmem:[#allocation2 + $0x500] sm:$0xff] }
  0xc9   :  { %4561 = vmatpush1.bf16.msra.mxu0 %v4560_v2  ;;  %v312_v2 = vld [vmem:[#allocation2 + $0x4e0] sm:$0xff]  ;;  %v321_v5 = vld [vmem:[#allocation2 + $0x528] sm:$0xff] }
  0xca   :  { %4563 = vmatprep.subr.bf16.mxu0 %v4562_v3  ;;  %v4598_v3 = vpack.c.bf16 %v313_v63, %v309_v62  ;;  %v4600_v6 = vpack.c.bf16 %v312_v2, %v308_v1  ;;  %v325_v10 = vld [vmem:[#allocation2 + $0x548] sm:$0xff]  ;;  %v324_v13 = vld [vmem:[#allocation2 + $0x540] sm:$0xff] }
  0xcb   :  { %v329_v11 = vld [vmem:[#allocation2 + $0x568] sm:$0xff]  ;;  %v332_v19 = vld [vmem:[#allocation2 + $0x580] sm:$0xff] }
  0xcc   :  { %v333_v16 = vld [vmem:[#allocation2 + $0x588] sm:$0xff]  ;;  %v340_v25 = vld [vmem:[#allocation2 + $0x5c0] sm:$0xff] }
  0xcd   :  { %4565 = vmatpush1.bf16.msra.mxu0 %v4564_v8  ;;  %v320_v8 = vld [vmem:[#allocation2 + $0x520] sm:$0xff]  ;;  %v337_v17 = vld [vmem:[#allocation2 + $0x5a8] sm:$0xff] }
  0xce   :  { %4567 = vmatprep.subr.bf16.mxu0 %v4566_v9  ;;  %v4602_v9 = vpack.c.bf16 %v321_v5, %v317_v4  ;;  %v4604_v12 = vpack.c.bf16 %v320_v8, %v316_v7  ;;  %v341_v22 = vld [vmem:[#allocation2 + $0x5c8] sm:$0xff]  ;;  %v348_v31 = vld [vmem:[#allocation2 + $0x600] sm:$0xff] }
  0xcf   :  { %v345_v23 = vld [vmem:[#allocation2 + $0x5e8] sm:$0xff]  ;;  %v356_v38 = vld [vmem:[#allocation2 + $0x640] sm:$0xff] }
  0xd0   :  { %v349_v28 = vld [vmem:[#allocation2 + $0x608] sm:$0xff]  ;;  %v364_v49 = vld [vmem:[#allocation2 + $0x680] sm:$0xff] }
  0xd1   :  { %4569 = vmatpush1.bf16.msra.mxu0 %v4568_v14  ;;  %v328_v14 = vld [vmem:[#allocation2 + $0x560] sm:$0xff]  ;;  %v353_v29 = vld [vmem:[#allocation2 + $0x628] sm:$0xff] }
  0xd2   :  { %4571 = vmatprep.subr.bf16.mxu0 %v4570_v15  ;;  %v4606_v15 = vpack.c.bf16 %v329_v11, %v325_v10  ;;  %v4608_v18 = vpack.c.bf16 %v328_v14, %v324_v13  ;;  %v357_v35 = vld [vmem:[#allocation2 + $0x648] sm:$0xff]  ;;  %v372_v57 = vld [vmem:[#allocation2 + $0x6c0] sm:$0xff] }
  0xd3   :  { %v361_v36 = vld [vmem:[#allocation2 + $0x668] sm:$0xff]  ;;  %v380_v63 = vld [vmem:[#allocation2 + $0x700] sm:$0xff] }
  0xd4   :  { %v365_v45 = vld [vmem:[#allocation2 + $0x688] sm:$0xff]  ;;  %v388_v5 = vld [vmem:[#allocation2 + $0x740] sm:$0xff] }
  0xd5   :  { %4573 = vmatpush1.bf16.msra.mxu0 %v4572_v20  ;;  %v336_v20 = vld [vmem:[#allocation2 + $0x5a0] sm:$0xff]  ;;  %v369_v46 = vld [vmem:[#allocation2 + $0x6a8] sm:$0xff] }
  0xd6   :  { %4575 = vmatprep.subr.bf16.mxu0 %v4574_v21  ;;  %v4610_v21 = vpack.c.bf16 %v337_v17, %v333_v16  ;;  %v4612_v24 = vpack.c.bf16 %v336_v20, %v332_v19  ;;  %v4626_v52 = vpack.c.bf16 %v369_v46, %v365_v45  ;;  %v373_v53 = vld [vmem:[#allocation2 + $0x6c8] sm:$0xff]  ;;  %v396_v11 = vld [vmem:[#allocation2 + $0x780] sm:$0xff] }
  0xd7   :  { %v381_v60 = vld [vmem:[#allocation2 + $0x708] sm:$0xff]  ;;  %v404_v17 = vld [vmem:[#allocation2 + $0x7c0] sm:$0xff] }
  0xd8   :  { %v389_v2 = vld [vmem:[#allocation2 + $0x748] sm:$0xff]  ;;  %v428_v46 = vld [vmem:[#allocation2 + $0x880] sm:$0xff] }
  0xd9   :  { %4577 = vmatpush1.bf16.msra.mxu0 %v4576_v26  ;;  %v344_v26 = vld [vmem:[#allocation2 + $0x5e0] sm:$0xff]  ;;  %v397_v8 = vld [vmem:[#allocation2 + $0x788] sm:$0xff] }
  0xda   :  { %4579 = vmatprep.subr.bf16.mxu0 %v4578_v27  ;;  %v4614_v27 = vpack.c.bf16 %v345_v23, %v341_v22  ;;  %v4616_v30 = vpack.c.bf16 %v344_v26, %v340_v25  ;;  %v405_v14 = vld [vmem:[#allocation2 + $0x7c8] sm:$0xff]  ;;  %v6062_v22 = vsub.s32 2, %v6030_v32  ;;  %v416_v25 = vld [vmem:[#allocation2 + $0x820] sm:$0xff]  ;;  %v6065_v26 = vsub.s32 5, %v6030_v32 }
  0xdb   :  { %v413_v20 = vld [vmem:[#allocation2 + $0x808] sm:$0xff] }
  0xdd   :  { %4581 = vmatpush1.bf16.msra.mxu0 %v4580_v33  ;;  %v352_v33 = vld [vmem:[#allocation2 + $0x620] sm:$0xff] }
  0xde   :  { %4583 = vmatprep.subr.bf16.mxu0 %v4582_v34  ;;  %v4618_v34 = vpack.c.bf16 %v353_v29, %v349_v28  ;;  %v4620_v37 = vpack.c.bf16 %v352_v33, %v348_v31  ;;  %v421_v28 = vld [vmem:[#allocation2 + $0x848] sm:$0xff]  ;;  %v6070_v31 = vrot.slane %v6038_v44, %v6062_v22 }
  0xdf   :  { %v425_v29 = vld [vmem:[#allocation2 + $0x868] sm:$0xff] }
  0xe1   :  { %4585 = vmatpush1.bf16.msra.mxu0 %v4584_v41  ;;  %v360_v41 = vld [vmem:[#allocation2 + $0x660] sm:$0xff] }
  0xe2   :  { %4587 = vmatprep.subr.bf16.mxu0 %v4586_v43  ;;  %v4622_v43 = vpack.c.bf16 %v361_v36, %v357_v35  ;;  %v4624_v48 = vpack.c.bf16 %v360_v41, %v356_v38  ;;  %v424_v35 = vld [vmem:[#allocation2 + $0x860] sm:$0xff]  ;;  %v6074_v36 = vrot.slane %v6038_v44, %v6065_v26  ;;  %v4654_v38 = vpack.c.bf16 %v425_v29, %v421_v28  ;;  %v429_v41 = vld [vmem:[#allocation2 + $0x888] sm:$0xff] }
  0xe3   :  { %v484_v28 = vld [vmem:[#allocation2 + $0xa40] sm:$0xff] }
  0xe4   :  { %774 = vmatmul.mubr.f32.vlgmr.msra.gmra.mrb[0].mxu0 %v6053_v50  ;;  %v488_v29 = vld [vmem:[#allocation2 + $0xa60] sm:$0xff] }
  0xe5   :  { %4589 = vmatpush1.bf16.msra.mxu0 %v4588_v51  ;;  %844 = vmatprep.mubr.f32.mxu0 %v6057_v54  ;;  %v368_v51 = vld [vmem:[#allocation2 + $0x6a0] sm:$0xff] }
  0xe6   :  { %4591 = vmatprep.subr.bf16.mxu0 %v4590_v55  ;;  %v377_v55 = vld [vmem:[#allocation2 + $0x6e8] sm:$0xff]  ;;  %v4628_v56 = vpack.c.bf16 %v368_v51, %v364_v49 }
  0xe7   :  { %v4630_v59 = vpack.c.bf16 %v377_v55, %v373_v53  ;;  %v437_v51 = vld [vmem:[#allocation2 + $0x8c8] sm:$0xff]  ;;  %v436_v53 = vld [vmem:[#allocation2 + $0x8c0] sm:$0xff] }
  0xe8   :  { %v440_v55 = vld [vmem:[#allocation2 + $0x8e0] sm:$0xff] }
  0xe9   :  { %4593 = vmatpush1.bf16.msra.mxu0 %v4592_v58  ;;  %v376_v58 = vld [vmem:[#allocation2 + $0x6e0] sm:$0xff] }
  0xea   :  { %4595 = vmatprep.subr.bf16.mxu0 %v4594_v61  ;;  %v385_v61 = vld [vmem:[#allocation2 + $0x728] sm:$0xff]  ;;  %v4632_v62 = vpack.c.bf16 %v376_v58, %v372_v57 }
  0xeb   :  { %v4634_v1 = vpack.c.bf16 %v385_v61, %v381_v60  ;;  %v445_v57 = vld [vmem:[#allocation2 + $0x908] sm:$0xff]  ;;  %v444_v60 = vld [vmem:[#allocation2 + $0x900] sm:$0xff] }
  0xec   :  { %v449_v58 = vld [vmem:[#allocation2 + $0x928] sm:$0xff]  ;;  %v448_v61 = vld [vmem:[#allocation2 + $0x920] sm:$0xff] }
  0xed   :  { %4597 = vmatpush1.bf16.msra.mxu0 %v4596_v0  ;;  %v384_v0 = vld [vmem:[#allocation2 + $0x720] sm:$0xff] }
  0xee   :  { %4599 = vmatprep.subr.bf16.mxu0 %v4598_v3  ;;  %v393_v3 = vld [vmem:[#allocation2 + $0x768] sm:$0xff]  ;;  %v4636_v4 = vpack.c.bf16 %v384_v0, %v380_v63 }
  0xef   :  { %v4638_v7 = vpack.c.bf16 %v393_v3, %v389_v2  ;;  %v453_v63 = vld [vmem:[#allocation2 + $0x948] sm:$0xff]  ;;  %v452_v2 = vld [vmem:[#allocation2 + $0x940] sm:$0xff] }
  0xf0   :  { %v457_v0 = vld [vmem:[#allocation2 + $0x968] sm:$0xff]  ;;  %v456_v3 = vld [vmem:[#allocation2 + $0x960] sm:$0xff] }
  0xf1   :  { %4601 = vmatpush1.bf16.msra.mxu0 %v4600_v6  ;;  %v392_v6 = vld [vmem:[#allocation2 + $0x760] sm:$0xff] }
  0xf2   :  { %4603 = vmatprep.subr.bf16.mxu0 %v4602_v9  ;;  %v401_v9 = vld [vmem:[#allocation2 + $0x7a8] sm:$0xff]  ;;  %v4640_v10 = vpack.c.bf16 %v392_v6, %v388_v5 }
  0xf3   :  { %v4642_v13 = vpack.c.bf16 %v401_v9, %v397_v8  ;;  %v461_v5 = vld [vmem:[#allocation2 + $0x988] sm:$0xff]  ;;  %v460_v8 = vld [vmem:[#allocation2 + $0x980] sm:$0xff] }
  0xf4   :  { %v465_v6 = vld [vmem:[#allocation2 + $0x9a8] sm:$0xff]  ;;  %v464_v9 = vld [vmem:[#allocation2 + $0x9a0] sm:$0xff] }
  0xf5   :  { %4605 = vmatpush1.bf16.msra.mxu0 %v4604_v12  ;;  %v400_v12 = vld [vmem:[#allocation2 + $0x7a0] sm:$0xff] }
  0xf6   :  { %4607 = vmatprep.subr.bf16.mxu0 %v4606_v15  ;;  %v409_v15 = vld [vmem:[#allocation2 + $0x7e8] sm:$0xff]  ;;  %v4644_v16 = vpack.c.bf16 %v400_v12, %v396_v11 }
  0xf7   :  { %v4646_v19 = vpack.c.bf16 %v409_v15, %v405_v14  ;;  %v469_v11 = vld [vmem:[#allocation2 + $0x9c8] sm:$0xff]  ;;  %v468_v14 = vld [vmem:[#allocation2 + $0x9c0] sm:$0xff] }
  0xf8   :  { %v473_v12 = vld [vmem:[#allocation2 + $0x9e8] sm:$0xff]  ;;  %v472_v15 = vld [vmem:[#allocation2 + $0x9e0] sm:$0xff] }
  0xf9   :  { %4609 = vmatpush1.bf16.msra.mxu0 %v4608_v18  ;;  %v408_v18 = vld [vmem:[#allocation2 + $0x7e0] sm:$0xff] }
  0xfa   :  { %4611 = vmatprep.subr.bf16.mxu0 %v4610_v21  ;;  %v417_v21 = vld [vmem:[#allocation2 + $0x828] sm:$0xff]  ;;  %v4648_v23 = vpack.c.bf16 %v408_v18, %v404_v17 }
  0xfb   :  { %v477_v17 = vld [vmem:[#allocation2 + $0xa08] sm:$0xff] }
  0xfc   :  { %v481_v18 = vld [vmem:[#allocation2 + $0xa28] sm:$0xff] }
  0xfd   :  { %4613 = vmatpush1.bf16.msra.mxu0 %v4612_v24  ;;  %v412_v24 = vld [vmem:[#allocation2 + $0x800] sm:$0xff] }
  0xfe   :  { %4615 = vmatprep.subr.bf16.mxu0 %v4614_v27  ;;  %v4650_v27 = vpack.c.bf16 %v417_v21, %v413_v20  ;;  %v4652_v33 = vpack.c.bf16 %v416_v25, %v412_v24  ;;  %v476_v20 = vld [vmem:[#allocation2 + $0xa00] sm:$0xff]  ;;  %v485_v24 = vld [vmem:[#allocation2 + $0xa48] sm:$0xff] }
  0xff   :  { %v480_v21 = vld [vmem:[#allocation2 + $0xa20] sm:$0xff]  ;;  %v489_v25 = vld [vmem:[#allocation2 + $0xa68] sm:$0xff] }
 0x101   :  { %4617 = vmatpush1.bf16.msra.mxu0 %v4616_v30  ;;  %v699_v30 = vsub.s32 7, %v6030_v32 }
 0x102   :  { %4619 = vmatprep.subr.bf16.mxu0 %v4618_v34  ;;  %v420_v34 = vld [vmem:[#allocation2 + $0x840] sm:$0xff] }
 0x103   :  { %v4656_v45 = vpack.c.bf16 %v424_v35, %v420_v34  ;;  %v493_v34 = vld [vmem:[#allocation2 + $0xa88] sm:$0xff] }
 0x104   :  { %v497_v35 = vld [vmem:[#allocation2 + $0xaa8] sm:$0xff] }
 0x105   :  { %4621 = vmatpush1.bf16.msra.mxu0 %v4620_v37  ;;  %v6079_v37 = vrot.slane %v6038_v44, %v699_v30 }
 0x106   :  { %4623 = vmatprep.subr.bf16.mxu0 %v4622_v43  ;;  %v433_v43 = vld [vmem:[#allocation2 + $0x8a8] sm:$0xff] }
 0x107   :  { %1270 = vmatprep.mubr.f32.mxu1 %v6079_v37  ;;  %v4658_v49 = vpack.c.bf16 %v433_v43, %v429_v41  ;;  %v492_v41 = vld [vmem:[#allocation2 + $0xa80] sm:$0xff] }
 0x108   :  { %v496_v43 = vld [vmem:[#allocation2 + $0xaa0] sm:$0xff] }
 0x109   :  { %4625 = vmatpush1.bf16.msra.mxu0 %v4624_v48  ;;  %v432_v48 = vld [vmem:[#allocation2 + $0x8a0] sm:$0xff] }
 0x10a   :  { %4627 = vmatprep.subr.bf16.mxu0 %v4626_v52  ;;  %v441_v52 = vld [vmem:[#allocation2 + $0x8e8] sm:$0xff]  ;;  %v4660_v44 = vpack.c.bf16 %v432_v48, %v428_v46 }
 0x10b   :  { %v501_v46 = vld [vmem:[#allocation2 + $0xac8] sm:$0xff] }
 0x10c   :  { %v505_v48 = vld [vmem:[#allocation2 + $0xae8] sm:$0xff] }
 0x10d   :  { %4629 = vmatpush1.bf16.msra.mxu0 %v4628_v56  ;;  %v4662_v56 = vpack.c.bf16 %v441_v52, %v437_v51  ;;  %v500_v51 = vld [vmem:[#allocation2 + $0xac0] sm:$0xff] }
 0x10e   :  { %4631 = vmatprep.subr.bf16.mxu0 %v4630_v59  ;;  %v4664_v59 = vpack.c.bf16 %v440_v55, %v436_v53  ;;  %v504_v52 = vld [vmem:[#allocation2 + $0xae0] sm:$0xff]  ;;  %v509_v53 = vld [vmem:[#allocation2 + $0xb08] sm:$0xff] }
 0x10f   :  { %v513_v55 = vld [vmem:[#allocation2 + $0xb28] sm:$0xff] }
 0x111   :  { %4633 = vmatpush1.bf16.msra.mxu0 %v4632_v62  ;;  %v4666_v62 = vpack.c.bf16 %v449_v58, %v445_v57  ;;  %v508_v57 = vld [vmem:[#allocation2 + $0xb00] sm:$0xff] }
 0x112   :  { %4635 = vmatprep.subr.bf16.mxu0 %v4634_v1  ;;  %v4668_v1 = vpack.c.bf16 %v448_v61, %v444_v60  ;;  %v512_v58 = vld [vmem:[#allocation2 + $0xb20] sm:$0xff]  ;;  %v517_v60 = vld [vmem:[#allocation2 + $0xb48] sm:$0xff] }
 0x113   :  { %v521_v61 = vld [vmem:[#allocation2 + $0xb68] sm:$0xff] }
 0x115   :  { %4637 = vmatpush1.bf16.msra.mxu0 %v4636_v4  ;;  %v4670_v4 = vpack.c.bf16 %v457_v0, %v453_v63  ;;  %v516_v63 = vld [vmem:[#allocation2 + $0xb40] sm:$0xff] }
 0x116   :  { %4639 = vmatprep.subr.bf16.mxu0 %v4638_v7  ;;  %v4672_v7 = vpack.c.bf16 %v456_v3, %v452_v2  ;;  %v520_v0 = vld [vmem:[#allocation2 + $0xb60] sm:$0xff]  ;;  %v525_v2 = vld [vmem:[#allocation2 + $0xb88] sm:$0xff] }
 0x117   :  { %v529_v3 = vld [vmem:[#allocation2 + $0xba8] sm:$0xff] }
 0x119   :  { %4641 = vmatpush1.bf16.msra.mxu0 %v4640_v10  ;;  %v4674_v10 = vpack.c.bf16 %v465_v6, %v461_v5  ;;  %v524_v5 = vld [vmem:[#allocation2 + $0xb80] sm:$0xff] }
 0x11a   :  { %4643 = vmatprep.subr.bf16.mxu0 %v4642_v13  ;;  %v4676_v13 = vpack.c.bf16 %v464_v9, %v460_v8  ;;  %v528_v6 = vld [vmem:[#allocation2 + $0xba0] sm:$0xff]  ;;  %v533_v8 = vld [vmem:[#allocation2 + $0xbc8] sm:$0xff] }
 0x11b   :  { %v537_v9 = vld [vmem:[#allocation2 + $0xbe8] sm:$0xff] }
 0x11d   :  { %4645 = vmatpush1.bf16.msra.mxu0 %v4644_v16  ;;  %v4678_v16 = vpack.c.bf16 %v473_v12, %v469_v11  ;;  %v532_v11 = vld [vmem:[#allocation2 + $0xbc0] sm:$0xff] }
 0x11e   :  { %4647 = vmatprep.subr.bf16.mxu0 %v4646_v19  ;;  %v4680_v19 = vpack.c.bf16 %v472_v15, %v468_v14  ;;  %v536_v12 = vld [vmem:[#allocation2 + $0xbe0] sm:$0xff]  ;;  %v541_v14 = vld [vmem:[#allocation2 + $0xc08] sm:$0xff] }
 0x11f   :  { %v545_v15 = vld [vmem:[#allocation2 + $0xc28] sm:$0xff] }
 0x121   :  { %4649 = vmatpush1.bf16.msra.mxu0 %v4648_v23  ;;  %v4682_v23 = vpack.c.bf16 %v481_v18, %v477_v17  ;;  %v547_v17 = vld [vmem:[#allocation2 + $0xc38] sm:$0xff]  ;;  %v6085_v18 = vsub.s32 4, %v6030_v32 }
 0x122   :  { %4651 = vmatprep.subr.bf16.mxu0 %v4650_v27  ;;  %v4684_v27 = vpack.c.bf16 %v480_v21, %v476_v20  ;;  %v542_v20 = vld [vmem:[#allocation2 + $0xc10] sm:$0xff] }
 0x123   :  { %v546_v21 = vld [vmem:[#allocation2 + $0xc30] sm:$0xff] }
 0x124   :  { %845 = vmatmul.mubr.f32.vlgmr.msra.gmra.mrb[0].mxu0 %v6070_v31 }
 0x125   :  { %4653 = vmatpush1.bf16.msra.mxu0 %v4652_v33  ;;  %915 = vmatprep.mubr.f32.mxu0 %v6074_v36  ;;  %v4686_v33 = vpack.c.bf16 %v489_v25, %v485_v24  ;;  %v540_v24 = vld [vmem:[#allocation2 + $0xc00] sm:$0xff] }
 0x126   :  { %4655 = vmatprep.subr.bf16.mxu0 %v4654_v38  ;;  %v4688_v38 = vpack.c.bf16 %v488_v29, %v484_v28  ;;  %v544_v25 = vld [vmem:[#allocation2 + $0xc20] sm:$0xff]  ;;  %v4714_v28 = vpack.c.bf16 %v545_v15, %v541_v14  ;;  %v549_v29 = vld [vmem:[#allocation2 + $0xc48] sm:$0xff]  ;;  %v575_v15 = vld [vmem:[#allocation2 + $0xd18] sm:$0xff] }
 0x127   :  { %v577_v14 = vld [vmem:[#allocation2 + $0xd28] sm:$0xff] }
 0x129   :  { %4657 = vmatpush1.bf16.msra.mxu0 %v4656_v45  ;;  %v4690_v45 = vpack.c.bf16 %v497_v35, %v493_v34  ;;  %v551_v34 = vld [vmem:[#allocation2 + $0xc58] sm:$0xff] }
 0x12a   :  { %4659 = vmatprep.subr.bf16.mxu0 %v4658_v49  ;;  %v4692_v49 = vpack.c.bf16 %v496_v43, %v492_v41  ;;  %v555_v35 = vld [vmem:[#allocation2 + $0xc78] sm:$0xff] }
 0x12b   :  { %v4974_v43 = vpack.c.bf16 %v555_v35, %v551_v34  ;;  %v587_v34 = vld [vmem:[#allocation2 + $0xd78] sm:$0xff] }
 0x12d   :  { %4661 = vmatpush1.bf16.msra.mxu0 %v4660_v44  ;;  %v4694_v44 = vpack.c.bf16 %v505_v48, %v501_v46  ;;  %v554_v46 = vld [vmem:[#allocation2 + $0xc70] sm:$0xff]  ;;  %v4716_v48 = vpack.c.bf16 %v544_v25, %v540_v24  ;;  %v576_v24 = vld [vmem:[#allocation2 + $0xd20] sm:$0xff] }
 0x12e   :  { %4663 = vmatprep.subr.bf16.mxu0 %v4662_v56  ;;  %v4696_v56 = vpack.c.bf16 %v504_v52, %v500_v51  ;;  %v552_v51 = vld [vmem:[#allocation2 + $0xc60] sm:$0xff] }
 0x131   :  { %4665 = vmatpush1.bf16.msra.mxu0 %v4664_v59  ;;  %v4698_v59 = vpack.c.bf16 %v513_v55, %v509_v53  ;;  %v557_v53 = vld [vmem:[#allocation2 + $0xc88] sm:$0xff] }
 0x132   :  { %4667 = vmatprep.subr.bf16.mxu0 %v4666_v62  ;;  %v4700_v62 = vpack.c.bf16 %v512_v58, %v508_v57  ;;  %v561_v55 = vld [vmem:[#allocation2 + $0xca8] sm:$0xff]  ;;  %v563_v57 = vld [vmem:[#allocation2 + $0xcb8] sm:$0xff] }
 0x135   :  { %4669 = vmatpush1.bf16.msra.mxu0 %v4668_v1  ;;  %v4702_v1 = vpack.c.bf16 %v521_v61, %v517_v60  ;;  %v562_v60 = vld [vmem:[#allocation2 + $0xcb0] sm:$0xff] }
 0x136   :  { %4671 = vmatprep.subr.bf16.mxu0 %v4670_v4  ;;  %v4704_v4 = vpack.c.bf16 %v520_v0, %v516_v63  ;;  %v560_v63 = vld [vmem:[#allocation2 + $0xca0] sm:$0xff] }
 0x139   :  { %4673 = vmatpush1.bf16.msra.mxu0 %v4672_v7  ;;  %v4706_v7 = vpack.c.bf16 %v529_v3, %v525_v2  ;;  %v565_v2 = vld [vmem:[#allocation2 + $0xcc8] sm:$0xff] }
 0x13a   :  { %4675 = vmatprep.subr.bf16.mxu0 %v4674_v10  ;;  %v4708_v10 = vpack.c.bf16 %v528_v6, %v524_v5  ;;  %v569_v3 = vld [vmem:[#allocation2 + $0xce8] sm:$0xff]  ;;  %v571_v5 = vld [vmem:[#allocation2 + $0xcf8] sm:$0xff] }
 0x13d   :  { %4677 = vmatpush1.bf16.msra.mxu0 %v4676_v13  ;;  %v4710_v13 = vpack.c.bf16 %v537_v9, %v533_v8  ;;  %v570_v8 = vld [vmem:[#allocation2 + $0xcf0] sm:$0xff] }
 0x13e   :  { %4679 = vmatprep.subr.bf16.mxu0 %v4678_v16  ;;  %v543_v16 = vld [vmem:[#allocation2 + $0xc18] sm:$0xff] }
 0x141   :  { %4681 = vmatpush1.bf16.msra.mxu0 %v4680_v19  ;;  %v4970_v19 = vpack.c.bf16 %v547_v17, %v543_v16  ;;  %v579_v16 = vld [vmem:[#allocation2 + $0xd38] sm:$0xff] }
 0x142   :  { %4683 = vmatprep.subr.bf16.mxu0 %v4682_v23  ;;  %v4712_v23 = vpack.c.bf16 %v536_v12, %v532_v11  ;;  %v568_v11 = vld [vmem:[#allocation2 + $0xce0] sm:$0xff]  ;;  %v4986_v17 = vpack.c.bf16 %v579_v16, %v575_v15  ;;  %v611_v15 = vld [vmem:[#allocation2 + $0xe38] sm:$0xff] }
 0x143   :  { %4971 = vmatprep.subr.bf16.mxu1 %v4970_v19  ;;  %v574_v19 = vld [vmem:[#allocation2 + $0xd10] sm:$0xff] }
 0x145   :  { %4685 = vmatpush1.bf16.msra.mxu0 %v4684_v27  ;;  %v4972_v27 = vpack.c.bf16 %v546_v21, %v542_v20  ;;  %v578_v20 = vld [vmem:[#allocation2 + $0xd30] sm:$0xff] }
 0x146   :  { %4687 = vmatprep.subr.bf16.mxu0 %v4686_v33  ;;  %v553_v33 = vld [vmem:[#allocation2 + $0xc68] sm:$0xff]  ;;  %v4988_v25 = vpack.c.bf16 %v578_v20, %v574_v19  ;;  %v610_v19 = vld [vmem:[#allocation2 + $0xe30] sm:$0xff] }
 0x147   :  { %4973 = vmatpush1.bf16.msra.mxu1 %v4972_v27 }
 0x148   :  { %4975 = vmatprep.subr.bf16.mxu1 %v4974_v43  ;;  %v582_v43 = vld [vmem:[#allocation2 + $0xd50] sm:$0xff] }
 0x149   :  { %4689 = vmatpush1.bf16.msra.mxu0 %v4688_v38  ;;  %v6090_v38 = vld [vmem:[%s6355_s0] sm:$0xff] }
 0x14a   :  { %4691 = vmatprep.subr.bf16.mxu0 %v4690_v45  ;;  %v6094_v41 = vrot.slane %v6090_v38, %v6085_v18  ;;  %v550_v45 = vld [vmem:[#allocation2 + $0xc50] sm:$0xff] }
 0x14b   :  { %v4976_v52 = vpack.c.bf16 %v554_v46, %v550_v45  ;;  %v586_v45 = vld [vmem:[#allocation2 + $0xd70] sm:$0xff] }
 0x14d   :  { %4693 = vmatpush1.bf16.msra.mxu0 %v4692_v49  ;;  %v548_v49 = vld [vmem:[#allocation2 + $0xc40] sm:$0xff]  ;;  %4977 = vmatpush1.bf16.msra.mxu1 %v4976_v52 }
 0x14e   :  { %4695 = vmatprep.subr.bf16.mxu0 %v4694_v44  ;;  %v4718_v44 = vpack.c.bf16 %v553_v33, %v549_v29  ;;  %v4720_v61 = vpack.c.bf16 %v552_v51, %v548_v49  ;;  %v585_v29 = vld [vmem:[#allocation2 + $0xd68] sm:$0xff]  ;;  %v583_v33 = vld [vmem:[#allocation2 + $0xd58] sm:$0xff]  ;;  %v584_v49 = vld [vmem:[#allocation2 + $0xd60] sm:$0xff]  ;;  %v4992_v51 = vpack.c.bf16 %v586_v45, %v582_v43 }
 0x14f   :  { %v4990_v35 = vpack.c.bf16 %v587_v34, %v583_v33  ;;  %v619_v33 = vld [vmem:[#allocation2 + $0xe78] sm:$0xff]  ;;  %v618_v43 = vld [vmem:[#allocation2 + $0xe70] sm:$0xff] }
 0x151   :  { %4697 = vmatpush1.bf16.msra.mxu0 %v4696_v56  ;;  %v559_v56 = vld [vmem:[#allocation2 + $0xc98] sm:$0xff] }
 0x152   :  { %4699 = vmatprep.subr.bf16.mxu0 %v4698_v59  ;;  %v4978_v58 = vpack.c.bf16 %v563_v57, %v559_v56  ;;  %v558_v59 = vld [vmem:[#allocation2 + $0xc90] sm:$0xff]  ;;  %v595_v56 = vld [vmem:[#allocation2 + $0xdb8] sm:$0xff] }
 0x153   :  { %v4980_v0 = vpack.c.bf16 %v562_v60, %v558_v59  ;;  %v594_v59 = vld [vmem:[#allocation2 + $0xdb0] sm:$0xff] }
 0x154   :  { %4979 = vmatprep.subr.bf16.mxu1 %v4978_v58  ;;  %v590_v58 = vld [vmem:[#allocation2 + $0xd90] sm:$0xff] }
 0x155   :  { %4701 = vmatpush1.bf16.msra.mxu0 %v4700_v62  ;;  %v556_v62 = vld [vmem:[#allocation2 + $0xc80] sm:$0xff]  ;;  %4981 = vmatpush1.bf16.msra.mxu1 %v4980_v0 }
 0x156   :  { %4703 = vmatprep.subr.bf16.mxu0 %v4702_v1  ;;  %v4722_v1 = vpack.c.bf16 %v561_v55, %v557_v53  ;;  %v4724_v9 = vpack.c.bf16 %v560_v63, %v556_v62  ;;  %v593_v53 = vld [vmem:[#allocation2 + $0xda8] sm:$0xff]  ;;  %v591_v55 = vld [vmem:[#allocation2 + $0xd98] sm:$0xff]  ;;  %v592_v62 = vld [vmem:[#allocation2 + $0xda0] sm:$0xff]  ;;  %v4996_v63 = vpack.c.bf16 %v594_v59, %v590_v58 }
 0x157   :  { %v4994_v57 = vpack.c.bf16 %v595_v56, %v591_v55  ;;  %v627_v55 = vld [vmem:[#allocation2 + $0xeb8] sm:$0xff]  ;;  %v626_v58 = vld [vmem:[#allocation2 + $0xeb0] sm:$0xff] }
 0x159   :  { %4705 = vmatpush1.bf16.msra.mxu0 %v4704_v4  ;;  %v567_v4 = vld [vmem:[#allocation2 + $0xcd8] sm:$0xff] }
 0x15a   :  { %4707 = vmatprep.subr.bf16.mxu0 %v4706_v7  ;;  %v4982_v6 = vpack.c.bf16 %v571_v5, %v567_v4  ;;  %v566_v7 = vld [vmem:[#allocation2 + $0xcd0] sm:$0xff]  ;;  %v603_v4 = vld [vmem:[#allocation2 + $0xdf8] sm:$0xff] }
 0x15b   :  { %v4984_v12 = vpack.c.bf16 %v570_v8, %v566_v7  ;;  %v602_v7 = vld [vmem:[#allocation2 + $0xdf0] sm:$0xff] }
 0x15c   :  { %4983 = vmatprep.subr.bf16.mxu1 %v4982_v6  ;;  %v598_v6 = vld [vmem:[#allocation2 + $0xdd0] sm:$0xff] }
 0x15d   :  { %4709 = vmatpush1.bf16.msra.mxu0 %v4708_v10  ;;  %v564_v10 = vld [vmem:[#allocation2 + $0xcc0] sm:$0xff]  ;;  %4985 = vmatpush1.bf16.msra.mxu1 %v4984_v12 }
 0x15e   :  { %4711 = vmatprep.subr.bf16.mxu0 %v4710_v13  ;;  %v4726_v13 = vpack.c.bf16 %v569_v3, %v565_v2  ;;  %v4728_v21 = vpack.c.bf16 %v568_v11, %v564_v10  ;;  %4987 = vmatprep.subr.bf16.mxu1 %v4986_v17  ;;  %v601_v2 = vld [vmem:[#allocation2 + $0xde8] sm:$0xff]  ;;  %v599_v3 = vld [vmem:[#allocation2 + $0xdd8] sm:$0xff]  ;;  %v600_v10 = vld [vmem:[#allocation2 + $0xde0] sm:$0xff]  ;;  %v5000_v11 = vpack.c.bf16 %v602_v7, %v598_v6 }
 0x15f   :  { %v4998_v5 = vpack.c.bf16 %v603_v4, %v599_v3  ;;  %v606_v17 = vld [vmem:[#allocation2 + $0xe10] sm:$0xff]  ;;  %v635_v3 = vld [vmem:[#allocation2 + $0xef8] sm:$0xff] }
 0x160   :  { %v634_v6 = vld [vmem:[#allocation2 + $0xef0] sm:$0xff] }
 0x161   :  { %4713 = vmatpush1.bf16.msra.mxu0 %v4712_v23  ;;  %v572_v23 = vld [vmem:[#allocation2 + $0xd00] sm:$0xff]  ;;  %4989 = vmatpush1.bf16.msra.mxu1 %v4988_v25 }
 0x162   :  { %4715 = vmatprep.subr.bf16.mxu0 %v4714_v28  ;;  %v581_v28 = vld [vmem:[#allocation2 + $0xd48] sm:$0xff]  ;;  %v4732_v46 = vpack.c.bf16 %v576_v24, %v572_v23  ;;  %4991 = vmatprep.subr.bf16.mxu1 %v4990_v35  ;;  %v608_v23 = vld [vmem:[#allocation2 + $0xe20] sm:$0xff]  ;;  %v5004_v24 = vpack.c.bf16 %v610_v19, %v606_v17  ;;  %v614_v35 = vld [vmem:[#allocation2 + $0xe50] sm:$0xff] }
 0x163   :  { %v4734_v52 = vpack.c.bf16 %v585_v29, %v581_v28  ;;  %v617_v28 = vld [vmem:[#allocation2 + $0xe68] sm:$0xff]  ;;  %v615_v29 = vld [vmem:[#allocation2 + $0xe58] sm:$0xff]  ;;  %v642_v17 = vld [vmem:[#allocation2 + $0xf30] sm:$0xff] }
 0x164   :  { %916 = vmatmul.mubr.f32.vlgmr.msra.gmra.mrb[0].mxu0 %v6094_v41  ;;  %v5006_v34 = vpack.c.bf16 %v619_v33, %v615_v29  ;;  %v651_v29 = vld [vmem:[#allocation2 + $0xf78] sm:$0xff] }
 0x165   :  { %4717 = vmatpush1.bf16.msra.mxu0 %v4716_v48  ;;  %986 = vmatprep.mubr.f32.mxu0 %v6079_v37  ;;  %v573_v37 = vld [vmem:[#allocation2 + $0xd08] sm:$0xff]  ;;  %v580_v48 = vld [vmem:[#allocation2 + $0xd40] sm:$0xff] }
 0x166   :  { %4719 = vmatprep.subr.bf16.mxu0 %v4718_v44  ;;  %v4730_v27 = vpack.c.bf16 %v577_v14, %v573_v37  ;;  %v589_v44 = vld [vmem:[#allocation2 + $0xd88] sm:$0xff]  ;;  %4993 = vmatpush1.bf16.msra.mxu1 %v4992_v51  ;;  %v4736_v60 = vpack.c.bf16 %v584_v49, %v580_v48  ;;  %v607_v14 = vld [vmem:[#allocation2 + $0xe18] sm:$0xff]  ;;  %v616_v48 = vld [vmem:[#allocation2 + $0xe60] sm:$0xff]  ;;  %v5008_v49 = vpack.c.bf16 %v618_v43, %v614_v35 }
 0x167   :  { %v4738_v0 = vpack.c.bf16 %v593_v53, %v589_v44  ;;  %4995 = vmatprep.subr.bf16.mxu1 %v4994_v57  ;;  %v609_v37 = vld [vmem:[#allocation2 + $0xe28] sm:$0xff]  ;;  %v5002_v16 = vpack.c.bf16 %v611_v15, %v607_v14  ;;  %v623_v53 = vld [vmem:[#allocation2 + $0xe98] sm:$0xff]  ;;  %v622_v57 = vld [vmem:[#allocation2 + $0xe90] sm:$0xff] }
 0x168   :  { %v625_v44 = vld [vmem:[#allocation2 + $0xea8] sm:$0xff]  ;;  %v5010_v56 = vpack.c.bf16 %v627_v55, %v623_v53  ;;  %v643_v14 = vld [vmem:[#allocation2 + $0xf38] sm:$0xff]  ;;  %v650_v35 = vld [vmem:[#allocation2 + $0xf70] sm:$0xff] }
 0x169   :  { %4721 = vmatpush1.bf16.msra.mxu0 %v4720_v61  ;;  %v588_v61 = vld [vmem:[#allocation2 + $0xd80] sm:$0xff]  ;;  %v659_v53 = vld [vmem:[#allocation2 + $0xfb8] sm:$0xff] }
 0x16a   :  { %4723 = vmatprep.subr.bf16.mxu0 %v4722_v1  ;;  %v597_v1 = vld [vmem:[#allocation2 + $0xdc8] sm:$0xff]  ;;  %4997 = vmatpush1.bf16.msra.mxu1 %v4996_v63  ;;  %v4740_v8 = vpack.c.bf16 %v592_v62, %v588_v61  ;;  %v624_v61 = vld [vmem:[#allocation2 + $0xea0] sm:$0xff]  ;;  %v5012_v62 = vpack.c.bf16 %v626_v58, %v622_v57  ;;  %v658_v57 = vld [vmem:[#allocation2 + $0xfb0] sm:$0xff] }
 0x16b   :  { %v4742_v12 = vpack.c.bf16 %v601_v2, %v597_v1  ;;  %4999 = vmatprep.subr.bf16.mxu1 %v4998_v5  ;;  %v633_v1 = vld [vmem:[#allocation2 + $0xee8] sm:$0xff]  ;;  %v631_v2 = vld [vmem:[#allocation2 + $0xed8] sm:$0xff]  ;;  %v630_v5 = vld [vmem:[#allocation2 + $0xed0] sm:$0xff] }
 0x16c   :  { %v5014_v4 = vpack.c.bf16 %v635_v3, %v631_v2  ;;  %v667_v2 = vld [vmem:[#allocation2 + $0xff8] sm:$0xff]  ;;  %v695_v3 = vsub.s32 6, %v6030_v32 }
 0x16d   :  { %4725 = vmatpush1.bf16.msra.mxu0 %v4724_v9  ;;  %v596_v9 = vld [vmem:[#allocation2 + $0xdc0] sm:$0xff] }
 0x16e   :  { %4727 = vmatprep.subr.bf16.mxu0 %v4726_v13  ;;  %v605_v13 = vld [vmem:[#allocation2 + $0xe08] sm:$0xff]  ;;  %5001 = vmatpush1.bf16.msra.mxu1 %v5000_v11  ;;  %v4744_v20 = vpack.c.bf16 %v600_v10, %v596_v9  ;;  %v632_v9 = vld [vmem:[#allocation2 + $0xee0] sm:$0xff]  ;;  %v5016_v10 = vpack.c.bf16 %v634_v6, %v630_v5  ;;  %v662_v5 = vld [vmem:[#allocation2 + $0xfd0] sm:$0xff] }
 0x16f   :  { %v4746_v25 = vpack.c.bf16 %v609_v37, %v605_v13  ;;  %5003 = vmatprep.subr.bf16.mxu1 %v5002_v16  ;;  %v641_v13 = vld [vmem:[#allocation2 + $0xf28] sm:$0xff]  ;;  %v639_v37 = vld [vmem:[#allocation2 + $0xf18] sm:$0xff]  ;;  %v638_v16 = vld [vmem:[#allocation2 + $0xf10] sm:$0xff] }
 0x170   :  { %v5018_v15 = vpack.c.bf16 %v643_v14, %v639_v37  ;;  %v666_v6 = vld [vmem:[#allocation2 + $0xff0] sm:$0xff]  ;;  %v696_v37 = vrot.slane %v6090_v38, %v695_v3 }
 0x171   :  { %4729 = vmatpush1.bf16.msra.mxu0 %v4728_v21  ;;  %v604_v21 = vld [vmem:[#allocation2 + $0xe00] sm:$0xff]  ;;  %v5096_v14 = vld [vmem:[#allocation13 + $0x4] ss:$8 sps:$4 sm:$0xff]  }
 0x172   :  { %4731 = vmatprep.subr.bf16.mxu0 %v4730_v27  ;;  %v613_v27 = vld [vmem:[#allocation2 + $0xe48] sm:$0xff]  ;;  %5005 = vmatpush1.bf16.msra.mxu1 %v5004_v24  ;;  %v4748_v45 = vpack.c.bf16 %v608_v23, %v604_v21  ;;  %v640_v21 = vld [vmem:[#allocation2 + $0xf20] sm:$0xff]  ;;  %v5020_v23 = vpack.c.bf16 %v642_v17, %v638_v16  ;;  %v158_v16 = vld [vmem:[#allocation2 + $0x10] sm:$0xff] }
 0x173   :  { %v4750_v51 = vpack.c.bf16 %v617_v28, %v613_v27  ;;  %5007 = vmatprep.subr.bf16.mxu1 %v5006_v34  ;;  %v649_v27 = vld [vmem:[#allocation2 + $0xf68] sm:$0xff]  ;;  %v647_v28 = vld [vmem:[#allocation2 + $0xf58] sm:$0xff]  ;;  %v646_v34 = vld [vmem:[#allocation2 + $0xf50] sm:$0xff] }
 0x174   :  { %v5022_v33 = vpack.c.bf16 %v651_v29, %v647_v28  ;;  %v162_v17 = vld [vmem:[#allocation2 + $0x30] sm:$0xff]  ;;  %v5097_v29 = vld [vmem:[#allocation13 + $0x10] ss:$8 sps:$4 sm:$0xff]  }
 0x175   :  { %4733 = vmatpush1.bf16.msra.mxu0 %v4732_v46  ;;  %v612_v46 = vld [vmem:[#allocation2 + $0xe40] sm:$0xff]  ;;  %v170_v28 = vld [vmem:[#allocation2 + $0x70] sm:$0xff] }
 0x176   :  { %4735 = vmatprep.subr.bf16.mxu0 %v4734_v52  ;;  %v621_v52 = vld [vmem:[#allocation2 + $0xe88] sm:$0xff]  ;;  %5009 = vmatpush1.bf16.msra.mxu1 %v5008_v49  ;;  %v4752_v59 = vpack.c.bf16 %v616_v48, %v612_v46  ;;  %v648_v46 = vld [vmem:[#allocation2 + $0xf60] sm:$0xff]  ;;  %v5024_v48 = vpack.c.bf16 %v650_v35, %v646_v34  ;;  %v179_v34 = vld [vmem:[#allocation2 + $0xb8] sm:$0xff] }
 0x177   :  { %v4754_v63 = vpack.c.bf16 %v625_v44, %v621_v52  ;;  %5011 = vmatprep.subr.bf16.mxu1 %v5010_v56  ;;  %v657_v52 = vld [vmem:[#allocation2 + $0xfa8] sm:$0xff]  ;;  %v655_v44 = vld [vmem:[#allocation2 + $0xf98] sm:$0xff]  ;;  %v654_v56 = vld [vmem:[#allocation2 + $0xf90] sm:$0xff] }
 0x178   :  { %v5026_v55 = vpack.c.bf16 %v659_v53, %v655_v44  ;;  %v5102_v35 = vld [vmem:[#allocation13 + $0x24] ss:$8 sps:$4 sm:$0xff]   ;;  %v5105_v44 = vld [vmem:[#allocation13 + $0x34] ss:$8 sps:$4 sm:$0xff]  }
 0x179   :  { %4737 = vmatpush1.bf16.msra.mxu0 %v4736_v60  ;;  %v620_v60 = vld [vmem:[#allocation2 + $0xe80] sm:$0xff] }
 0x17a   :  { %4739 = vmatprep.subr.bf16.mxu0 %v4738_v0  ;;  %v629_v0 = vld [vmem:[#allocation2 + $0xec8] sm:$0xff]  ;;  %5013 = vmatpush1.bf16.msra.mxu1 %v5012_v62  ;;  %v4756_v7 = vpack.c.bf16 %v624_v61, %v620_v60  ;;  %v656_v60 = vld [vmem:[#allocation2 + $0xfa0] sm:$0xff]  ;;  %v5028_v61 = vpack.c.bf16 %v658_v57, %v654_v56  ;;  %v186_v56 = vld [vmem:[#allocation2 + $0xf0] sm:$0xff] }
 0x17b   :  { %v4758_v11 = vpack.c.bf16 %v633_v1, %v629_v0  ;;  %5015 = vmatprep.subr.bf16.mxu1 %v5014_v4  ;;  %v665_v0 = vld [vmem:[#allocation2 + $0xfe8] sm:$0xff]  ;;  %v663_v1 = vld [vmem:[#allocation2 + $0xfd8] sm:$0xff] }
 0x17c   :  { %v5030_v4 = vpack.c.bf16 %v667_v2, %v663_v1  ;;  %v5103_v57 = vld [vmem:[#allocation13 + $0x30] ss:$8 sps:$4 sm:$0xff]  }
 0x17d   :  { %4741 = vmatpush1.bf16.msra.mxu0 %v4740_v8  ;;  %v628_v8 = vld [vmem:[#allocation2 + $0xec0] sm:$0xff]  ;;  %v199_v2 = vld [vmem:[#allocation2 + $0x158] sm:$0xff] }
 0x17e   :  { %4743 = vmatprep.subr.bf16.mxu0 %v4742_v12  ;;  %v637_v12 = vld [vmem:[#allocation2 + $0xf08] sm:$0xff]  ;;  %5017 = vmatpush1.bf16.msra.mxu1 %v5016_v10  ;;  %v4760_v19 = vpack.c.bf16 %v632_v9, %v628_v8  ;;  %v660_v8 = vld [vmem:[#allocation2 + $0xfc0] sm:$0xff]  ;;  %v5032_v10 = vpack.c.bf16 %v666_v6, %v662_v5 }
 0x17f   :  { %v4762_v24 = vpack.c.bf16 %v641_v13, %v637_v12  ;;  %5019 = vmatprep.subr.bf16.mxu1 %v5018_v15  ;;  %v664_v9 = vld [vmem:[#allocation2 + $0xfe0] sm:$0xff]  ;;  %v159_v12 = vld [vmem:[#allocation2 + $0x18] sm:$0xff] }
 0x180   :  { %v163_v13 = vld [vmem:[#allocation2 + $0x38] sm:$0xff]  ;;  %v4776_v15 = vpack.c.bf16 %v664_v9, %v660_v8  ;;  %v5111_v5 = vld [vmem:[#allocation13 + $0x54] ss:$8 sps:$4 sm:$0xff]   ;;  %v202_v8 = vld [vmem:[#allocation2 + $0x170] sm:$0xff] }
 0x181   :  { %4745 = vmatpush1.bf16.msra.mxu0 %v4744_v20  ;;  %v636_v20 = vld [vmem:[#allocation2 + $0xf00] sm:$0xff] }
 0x182   :  { %4747 = vmatprep.subr.bf16.mxu0 %v4746_v25  ;;  %v645_v25 = vld [vmem:[#allocation2 + $0xf48] sm:$0xff]  ;;  %5021 = vmatpush1.bf16.msra.mxu1 %v5020_v23  ;;  %v4764_v43 = vpack.c.bf16 %v640_v21, %v636_v20  ;;  %v4778_v20 = vpack.c.bf16 %v163_v13, %v159_v12  ;;  %v167_v21 = vld [vmem:[#allocation2 + $0x58] sm:$0xff] }
 0x183   :  { %v4766_v49 = vpack.c.bf16 %v649_v27, %v645_v25  ;;  %5023 = vmatprep.subr.bf16.mxu1 %v5022_v33  ;;  %v171_v23 = vld [vmem:[#allocation2 + $0x78] sm:$0xff]  ;;  %v4780_v25 = vpack.c.bf16 %v162_v17, %v158_v16  ;;  %v166_v27 = vld [vmem:[#allocation2 + $0x50] sm:$0xff] }
 0x184   :  { %v4782_v38 = vpack.c.bf16 %v171_v23, %v167_v21  ;;  %v175_v33 = vld [vmem:[#allocation2 + $0x98] sm:$0xff]  ;;  %v5112_v16 = vld [vmem:[#allocation13 + $0x60] ss:$8 sps:$4 sm:$0xff]   ;;  %v5117_v21 = vld [vmem:[#allocation13 + $0x74] ss:$8 sps:$4 sm:$0xff]  }
 0x185   :  { %4749 = vmatpush1.bf16.msra.mxu0 %v4748_v45  ;;  %v644_v45 = vld [vmem:[#allocation2 + $0xf40] sm:$0xff]  ;;  %v211_v12 = vld [vmem:[#allocation2 + $0x1b8] sm:$0xff] }
 0x186   :  { %4751 = vmatprep.subr.bf16.mxu0 %v4750_v51  ;;  %v653_v51 = vld [vmem:[#allocation2 + $0xf88] sm:$0xff]  ;;  %5025 = vmatpush1.bf16.msra.mxu1 %v5024_v48  ;;  %v4768_v58 = vpack.c.bf16 %v648_v46, %v644_v45  ;;  %v174_v45 = vld [vmem:[#allocation2 + $0x90] sm:$0xff]  ;;  %v5109_v9 = vld [vmem:[#allocation13 + $0x50] ss:$8 sps:$4 sm:$0xff]  }
 0x187   :  { %v4770_v62 = vpack.c.bf16 %v657_v52, %v653_v51  ;;  %5027 = vmatprep.subr.bf16.mxu1 %v5026_v55  ;;  %v178_v46 = vld [vmem:[#allocation2 + $0xb0] sm:$0xff]  ;;  %v183_v51 = vld [vmem:[#allocation2 + $0xd8] sm:$0xff] }
 0x188   :  { %v5100_v48 = vld [vmem:[#allocation13 + $0x20] ss:$8 sps:$4 sm:$0xff]   ;;  %v187_v52 = vld [vmem:[#allocation2 + $0xf8] sm:$0xff]  ;;  %v4788_v53 = vpack.c.bf16 %v178_v46, %v174_v45 }
 0x189   :  { %4753 = vmatpush1.bf16.msra.mxu0 %v4752_v59  ;;  %v652_v59 = vld [vmem:[#allocation2 + $0xf80] sm:$0xff]  ;;  %v182_v55 = vld [vmem:[#allocation2 + $0xd0] sm:$0xff] }
 0x18a   :  { %4755 = vmatprep.subr.bf16.mxu0 %v4754_v63  ;;  %v661_v63 = vld [vmem:[#allocation2 + $0xfc8] sm:$0xff]  ;;  %5029 = vmatpush1.bf16.msra.mxu1 %v5028_v61  ;;  %v4792_v61 = vpack.c.bf16 %v186_v56, %v182_v55  ;;  %v5114_v13 = vld [vmem:[#allocation13 + $0x64] ss:$8 sps:$4 sm:$0xff]  }
 0x18b   :  { %5031 = vmatprep.subr.bf16.mxu1 %v5030_v4  ;;  %v203_v4 = vld [vmem:[#allocation2 + $0x178] sm:$0xff]  ;;  %v222_v45 = vld [vmem:[#allocation2 + $0x210] sm:$0xff] }
 0x18c   :  { %v226_v46 = vld [vmem:[#allocation2 + $0x230] sm:$0xff] }
 0x18d   :  { %4757 = vmatpush1.bf16.msra.mxu0 %v4756_v7  ;;  %v4772_v7 = vpack.c.bf16 %v656_v60, %v652_v59  ;;  %v191_v59 = vld [vmem:[#allocation2 + $0x118] sm:$0xff]  ;;  %v230_v55 = vld [vmem:[#allocation2 + $0x250] sm:$0xff] }
 0x18e   :  { %4759 = vmatprep.subr.bf16.mxu0 %v4758_v11  ;;  %v4774_v11 = vpack.c.bf16 %v665_v0, %v661_v63  ;;  %5033 = vmatpush1.bf16.msra.mxu1 %v5032_v10  ;;  %v195_v60 = vld [vmem:[#allocation2 + $0x138] sm:$0xff]  ;;  %v194_v63 = vld [vmem:[#allocation2 + $0x130] sm:$0xff]  ;;  %v4798_v10 = vpack.c.bf16 %v203_v4, %v199_v2  ;;  %v5129_v2 = vld [vmem:[#allocation13 + $0xb4] ss:$8 sps:$4 sm:$0xff]  }
 0x18f   :  { %3587 = vmatprep.subr.bf16.mxu1 %v5096_v14  ;;  %v5106_v0 = vld [vmem:[#allocation13 + $0x40] ss:$8 sps:$4 sm:$0xff]   ;;  %v4794_v1 = vpack.c.bf16 %v195_v60, %v191_v59  ;;  %v5126_v59 = vld [vmem:[#allocation13 + $0xa4] ss:$8 sps:$4 sm:$0xff]  }
 0x190   :  { %v206_v14 = vld [vmem:[#allocation2 + $0x190] sm:$0xff] }
 0x191   :  { %4761 = vmatpush1.bf16.msra.mxu0 %v4760_v19  ;;  %v5094_v19 = vld [vmem:[#allocation13] ss:$8 sps:$4 sm:$0xff]   ;;  %1271 = vmatmul.mubr.f32.vlgmr.msra.gmra.mrb[0].mxu1 %v696_v37 }
 0x192   :  { %4763 = vmatprep.subr.bf16.mxu0 %v4762_v24  ;;  %3588 = vmatpush1.bf16.msra.mxu1 %v5094_v19  ;;  %v5099_v24 = vld [vmem:[#allocation13 + $0x14] ss:$8 sps:$4 sm:$0xff]   ;;  %v215_v19 = vld [vmem:[#allocation2 + $0x1d8] sm:$0xff]  ;;  %v234_v56 = vld [vmem:[#allocation2 + $0x270] sm:$0xff] }
 0x193   :  { %3589 = vmatprep.subr.bf16.mxu1 %v5099_v24  ;;  %v5115_v24 = vld [vmem:[#allocation13 + $0x70] ss:$8 sps:$4 sm:$0xff]   ;;  %v4816_v60 = vpack.c.bf16 %v234_v56, %v230_v55 }
 0x194   :  { %v6106_v55 = vld [vmem:[%s6356_s1 + $0x2] sm:$0xff]  ;;  %v287_v56 = vld [vmem:[#allocation2 + $0x418] sm:$0xff] }
 0x195   :  { %4765 = vmatpush1.bf16.msra.mxu0 %v4764_v43  ;;  %v4784_v43 = vpack.c.bf16 %v170_v28, %v166_v27  ;;  %v214_v27 = vld [vmem:[#allocation2 + $0x1d0] sm:$0xff] }
 0x196   :  { %4767 = vmatprep.subr.bf16.mxu0 %v4766_v49  ;;  %3590 = vmatpush1.bf16.msra.mxu1 %v5097_v29  ;;  %v4786_v49 = vpack.c.bf16 %v179_v34, %v175_v33  ;;  %v218_v28 = vld [vmem:[#allocation2 + $0x1f0] sm:$0xff]  ;;  %v223_v29 = vld [vmem:[#allocation2 + $0x218] sm:$0xff] }
 0x197   :  { %3591 = vmatprep.subr.bf16.mxu1 %v5102_v35  ;;  %v5120_v33 = vld [vmem:[#allocation13 + $0x84] ss:$8 sps:$4 sm:$0xff]   ;;  %v4808_v34 = vpack.c.bf16 %v218_v28, %v214_v27  ;;  %v5118_v35 = vld [vmem:[#allocation13 + $0x80] ss:$8 sps:$4 sm:$0xff]  }
 0x198   :  { %v271_v27 = vld [vmem:[#allocation2 + $0x398] sm:$0xff] }
 0x199   :  { %4769 = vmatpush1.bf16.msra.mxu0 %v4768_v58  ;;  %v4790_v58 = vpack.c.bf16 %v187_v52, %v183_v51  ;;  %v5123_v51 = vld [vmem:[#allocation13 + $0x94] ss:$8 sps:$4 sm:$0xff]   ;;  %v4812_v52 = vpack.c.bf16 %v226_v46, %v222_v45  ;;  %v275_v28 = vld [vmem:[#allocation2 + $0x3b8] sm:$0xff] }
 0x19a   :  { %4771 = vmatprep.subr.bf16.mxu0 %v4770_v62  ;;  %3592 = vmatpush1.bf16.msra.mxu1 %v5100_v48  ;;  %v190_v62 = vld [vmem:[#allocation2 + $0x110] sm:$0xff]  ;;  %v231_v48 = vld [vmem:[#allocation2 + $0x258] sm:$0xff] }
 0x19b   :  { %3593 = vmatprep.subr.bf16.mxu1 %v5105_v44  ;;  %v4796_v6 = vpack.c.bf16 %v194_v63, %v190_v62  ;;  %v5121_v44 = vld [vmem:[#allocation13 + $0x90] ss:$8 sps:$4 sm:$0xff]   ;;  %v238_v62 = vld [vmem:[#allocation2 + $0x290] sm:$0xff] }
 0x19c   :  { %v242_v63 = vld [vmem:[#allocation2 + $0x2b0] sm:$0xff]  ;;  %v279_v45 = vld [vmem:[#allocation2 + $0x3d8] sm:$0xff] }
 0x19d   :  { %4773 = vmatpush1.bf16.msra.mxu0 %v4772_v7  ;;  %v198_v7 = vld [vmem:[#allocation2 + $0x150] sm:$0xff]  ;;  %v4820_v4 = vpack.c.bf16 %v242_v63, %v238_v62  ;;  %v283_v46 = vld [vmem:[#allocation2 + $0x3f8] sm:$0xff] }
 0x19e   :  { %4775 = vmatprep.subr.bf16.mxu0 %v4774_v11  ;;  %3594 = vmatpush1.bf16.msra.mxu1 %v5103_v57  ;;  %v207_v11 = vld [vmem:[#allocation2 + $0x198] sm:$0xff]  ;;  %v5142_v63 = vld [vmem:[#allocation13 + $0x100] ss:$8 sps:$4 sm:$0xff]  }
 0x19f   :  { %v4802_v17 = vpack.c.bf16 %v211_v12, %v207_v11  ;;  %v239_v57 = vld [vmem:[#allocation2 + $0x298] sm:$0xff] }
 0x1a0   :  { %v5132_v11 = vld [vmem:[#allocation13 + $0xc4] ss:$8 sps:$4 sm:$0xff]  }
 0x1a1   :  { %4777 = vmatpush1.bf16.msra.mxu0 %v4776_v15  ;;  %v210_v15 = vld [vmem:[#allocation2 + $0x1b0] sm:$0xff] }
 0x1a2   :  { %4779 = vmatprep.subr.bf16.mxu0 %v4778_v20  ;;  %v219_v20 = vld [vmem:[#allocation2 + $0x1f8] sm:$0xff]  ;;  %v4804_v23 = vpack.c.bf16 %v210_v15, %v206_v14  ;;  %v254_v14 = vld [vmem:[#allocation2 + $0x310] sm:$0xff] }
 0x1a3   :  { %v258_v15 = vld [vmem:[#allocation2 + $0x330] sm:$0xff] }
 0x1a4   :  { %987 = vmatmul.mubr.f32.vlgmr.msra.gmra.mrb[0].mxu0 %v696_v37  ;;  %v4800_v37 = vpack.c.bf16 %v202_v8, %v198_v7  ;;  %v246_v7 = vld [vmem:[#allocation2 + $0x2d0] sm:$0xff] }
 0x1a5   :  { %4781 = vmatpush1.bf16.msra.mxu0 %v4780_v25  ;;  %1057 = vmatprep.mubr.f32.mxu0 %v6042_v47  ;;  %v5108_v47 = vld [vmem:[#allocation13 + $0x44] ss:$8 sps:$4 sm:$0xff]   ;;  %v4806_v25 = vpack.c.bf16 %v219_v20, %v215_v19  ;;  %v5135_v19 = vld [vmem:[#allocation13 + $0xd4] ss:$8 sps:$4 sm:$0xff]   ;;  %v4828_v20 = vpack.c.bf16 %v258_v15, %v254_v14 }
 0x1a6   :  { %4783 = vmatprep.subr.bf16.mxu0 %v4782_v38  ;;  %3595 = vmatprep.subr.bf16.mxu1 %v5108_v47  ;;  %v227_v38 = vld [vmem:[#allocation2 + $0x238] sm:$0xff]  ;;  %v5124_v47 = vld [vmem:[#allocation13 + $0xa0] ss:$8 sps:$4 sm:$0xff]  }
 0x1a7   :  { %3596 = vmatpush1.bf16.msra.mxu1 %v5106_v0  ;;  %v247_v0 = vld [vmem:[#allocation2 + $0x2d8] sm:$0xff]  ;;  %v250_v8 = vld [vmem:[#allocation2 + $0x2f0] sm:$0xff] }
 0x1a8   :  { %3597 = vmatprep.subr.bf16.mxu1 %v5111_v5  ;;  %v5127_v5 = vld [vmem:[#allocation13 + $0xb0] ss:$8 sps:$4 sm:$0xff]   ;;  %v4824_v12 = vpack.c.bf16 %v250_v8, %v246_v7  ;;  %v5147_v7 = vld [vmem:[#allocation13 + $0x114] ss:$8 sps:$4 sm:$0xff]   ;;  %v5153_v14 = vld [vmem:[#allocation13 + $0x124] ss:$8 sps:$4 sm:$0xff]  }
 0x1a9   :  { %4785 = vmatpush1.bf16.msra.mxu0 %v4784_v43  ;;  %v4810_v43 = vpack.c.bf16 %v227_v38, %v223_v29  ;;  %v5138_v29 = vld [vmem:[#allocation13 + $0xe4] ss:$8 sps:$4 sm:$0xff]  }
 0x1aa   :  { %4787 = vmatprep.subr.bf16.mxu0 %v4786_v49  ;;  %v235_v49 = vld [vmem:[#allocation2 + $0x278] sm:$0xff] }
 0x1ab   :  { %3598 = vmatpush1.bf16.msra.mxu1 %v5109_v9  ;;  %v255_v9 = vld [vmem:[#allocation2 + $0x318] sm:$0xff] }
 0x1ac   :  { %3599 = vmatprep.subr.bf16.mxu1 %v5114_v13  ;;  %v5130_v13 = vld [vmem:[#allocation13 + $0xc0] ss:$8 sps:$4 sm:$0xff]  }
 0x1ad   :  { %4789 = vmatpush1.bf16.msra.mxu0 %v4788_v53  ;;  %v4814_v53 = vpack.c.bf16 %v235_v49, %v231_v48  ;;  %v5141_v48 = vld [vmem:[#allocation13 + $0xf4] ss:$8 sps:$4 sm:$0xff]  }
 0x1ae   :  { %4791 = vmatprep.subr.bf16.mxu0 %v4790_v58  ;;  %v243_v58 = vld [vmem:[#allocation2 + $0x2b8] sm:$0xff] }
 0x1af   :  { %3600 = vmatpush1.bf16.msra.mxu1 %v5112_v16  ;;  %v263_v16 = vld [vmem:[#allocation2 + $0x358] sm:$0xff] }
 0x1b0   :  { %3601 = vmatprep.subr.bf16.mxu1 %v5117_v21  ;;  %v5133_v21 = vld [vmem:[#allocation13 + $0xd0] ss:$8 sps:$4 sm:$0xff]  }
 0x1b1   :  { %4793 = vmatpush1.bf16.msra.mxu0 %v4792_v61  ;;  %v4818_v61 = vpack.c.bf16 %v243_v58, %v239_v57  ;;  %v291_v57 = vld [vmem:[#allocation2 + $0x438] sm:$0xff]  ;;  %v6110_v58 = vrot.slane %v6106_v55, %v6046_v40 }
 0x1b2   :  { %4795 = vmatprep.subr.bf16.mxu0 %v4794_v1  ;;  %v251_v1 = vld [vmem:[#allocation2 + $0x2f8] sm:$0xff] }
 0x1b3   :  { %3602 = vmatpush1.bf16.msra.mxu1 %v5115_v24  ;;  %v262_v24 = vld [vmem:[#allocation2 + $0x350] sm:$0xff] }
 0x1b4   :  { %3603 = vmatprep.subr.bf16.mxu1 %v5120_v33  ;;  %v5136_v33 = vld [vmem:[#allocation13 + $0xe0] ss:$8 sps:$4 sm:$0xff]  }
 0x1b5   :  { %4797 = vmatpush1.bf16.msra.mxu0 %v4796_v6  ;;  %v4822_v6 = vpack.c.bf16 %v251_v1, %v247_v0  ;;  %v2035_v0 = vpack.c.bf16 %v6110_v58, %v6110_v58  ;;  %v4842_v1 = vpack.c.bf16 %v291_v57, %v287_v56  ;;  %v330_v56 = vld [vmem:[#allocation2 + $0x570] sm:$0xff]  ;;  %v5169_v57 = vld [vmem:[#allocation13 + $0x150] ss:$8 sps:$4 sm:$0xff]  }
 0x1b6   :  { %4799 = vmatprep.subr.bf16.mxu0 %v4798_v10  ;;  %v259_v10 = vld [vmem:[#allocation2 + $0x338] sm:$0xff] }
 0x1b7   :  { %3604 = vmatpush1.bf16.msra.mxu1 %v5118_v35  ;;  %v270_v35 = vld [vmem:[#allocation2 + $0x390] sm:$0xff] }
 0x1b8   :  { %3605 = vmatprep.subr.bf16.mxu1 %v5123_v51  ;;  %v5139_v51 = vld [vmem:[#allocation13 + $0xf0] ss:$8 sps:$4 sm:$0xff]  }
 0x1b9   :  { %4801 = vmatpush1.bf16.msra.mxu0 %v4800_v37  ;;  %v4826_v37 = vpack.c.bf16 %v259_v10, %v255_v9  ;;  %v294_v10 = vld [vmem:[#allocation2 + $0x450] sm:$0xff] }
 0x1ba   :  { %4803 = vmatprep.subr.bf16.mxu0 %v4802_v17  ;;  %v267_v17 = vld [vmem:[#allocation2 + $0x378] sm:$0xff] }
 0x1bb   :  { %3606 = vmatpush1.bf16.msra.mxu1 %v5121_v44  ;;  %v278_v44 = vld [vmem:[#allocation2 + $0x3d0] sm:$0xff] }
 0x1bc   :  { %3607 = vmatprep.subr.bf16.mxu1 %v5126_v59  ;;  %v6114_v59 = vrot.slane %v6106_v55, %v6033_v39 }
 0x1bd   :  { %4805 = vmatpush1.bf16.msra.mxu0 %v4804_v23  ;;  %v4830_v23 = vpack.c.bf16 %v267_v17, %v263_v16  ;;  %v302_v17 = vld [vmem:[#allocation2 + $0x490] sm:$0xff] }
 0x1be   :  { %4807 = vmatprep.subr.bf16.mxu0 %v4806_v25  ;;  %v266_v25 = vld [vmem:[#allocation2 + $0x370] sm:$0xff]  ;;  %v2036_v62 = vpack.c.bf16 %v6114_v59, %v6114_v59 }
 0x1bf   :  { %3608 = vmatpush1.bf16.msra.mxu1 %v5124_v47  ;;  %v4832_v38 = vpack.c.bf16 %v266_v25, %v262_v24  ;;  %v5159_v24 = vld [vmem:[#allocation13 + $0x134] ss:$8 sps:$4 sm:$0xff]  }
 0x1c0   :  { %3609 = vmatprep.subr.bf16.mxu1 %v5129_v2  ;;  %v286_v2 = vld [vmem:[#allocation2 + $0x410] sm:$0xff]  ;;  %3619 = vmatprep.mubr.bf16.mxu1 %v2036_v62 }
 0x1c1   :  { %4809 = vmatpush1.bf16.msra.mxu0 %v4808_v34  ;;  %v4834_v34 = vpack.c.bf16 %v275_v28, %v271_v27  ;;  %v314_v28 = vld [vmem:[#allocation2 + $0x4f0] sm:$0xff] }
 0x1c2   :  { %4811 = vmatprep.subr.bf16.mxu0 %v4810_v43  ;;  %v274_v43 = vld [vmem:[#allocation2 + $0x3b0] sm:$0xff] }
 0x1c3   :  { %3610 = vmatpush1.bf16.msra.mxu1 %v5127_v5  ;;  %v4836_v49 = vpack.c.bf16 %v274_v43, %v270_v35  ;;  %v295_v5 = vld [vmem:[#allocation2 + $0x458] sm:$0xff]  ;;  %v318_v43 = vld [vmem:[#allocation2 + $0x510] sm:$0xff] }
 0x1c4   :  { %3611 = vmatprep.subr.bf16.mxu1 %v5132_v11  ;;  %v298_v11 = vld [vmem:[#allocation2 + $0x470] sm:$0xff] }
 0x1c5   :  { %4813 = vmatpush1.bf16.msra.mxu0 %v4812_v52  ;;  %v4838_v52 = vpack.c.bf16 %v283_v46, %v279_v45  ;;  %v4848_v15 = vpack.c.bf16 %v298_v11, %v294_v10  ;;  %v322_v45 = vld [vmem:[#allocation2 + $0x530] sm:$0xff] }
 0x1c6   :  { %4815 = vmatprep.subr.bf16.mxu0 %v4814_v53  ;;  %v282_v53 = vld [vmem:[#allocation2 + $0x3f0] sm:$0xff] }
 0x1c7   :  { %3612 = vmatpush1.bf16.msra.mxu1 %v5130_v13  ;;  %v4840_v47 = vpack.c.bf16 %v282_v53, %v278_v44  ;;  %v303_v13 = vld [vmem:[#allocation2 + $0x498] sm:$0xff]  ;;  %v5163_v46 = vld [vmem:[#allocation13 + $0x140] ss:$8 sps:$4 sm:$0xff]  }
 0x1c8   :  { %3613 = vmatprep.subr.bf16.mxu1 %v5135_v19  ;;  %v306_v19 = vld [vmem:[#allocation2 + $0x4b0] sm:$0xff] }
 0x1c9   :  { %4817 = vmatpush1.bf16.msra.mxu0 %v4816_v60  ;;  %v5144_v60 = vld [vmem:[#allocation13 + $0x104] ss:$8 sps:$4 sm:$0xff]   ;;  %v4852_v25 = vpack.c.bf16 %v306_v19, %v302_v17 }
 0x1ca   :  { %4819 = vmatprep.subr.bf16.mxu0 %v4818_v61  ;;  %v1933_v61 = vcombine.low %v6110_v58, %v6114_v59  ;;  %v326_v53 = vld [vmem:[#allocation2 + $0x550] sm:$0xff]  ;;  %v6168_v58 = vrot.slane %v6106_v55, %v699_v30  ;;  %v487_v59 = vld [vmem:[#allocation2 + $0xa58] sm:$0xff] }
 0x1cb   :  { %3614 = vmatpush1.bf16.msra.mxu1 %v5133_v21  ;;  %v311_v21 = vld [vmem:[#allocation2 + $0x4d8] sm:$0xff]  ;;  %v342_v10 = vld [vmem:[#allocation2 + $0x5d0] sm:$0xff] }
 0x1cc   :  { %3615 = vmatprep.subr.bf16.mxu1 %v5138_v29  ;;  %v5157_v29 = vld [vmem:[#allocation13 + $0x130] ss:$8 sps:$4 sm:$0xff]   ;;  %v5177_v62 = vld [vmem:[#allocation13 + $0x164] ss:$8 sps:$4 sm:$0xff]  }
 0x1cd   :  { %4821 = vmatpush1.bf16.msra.mxu0 %v4820_v4  ;;  %v290_v4 = vld [vmem:[#allocation2 + $0x430] sm:$0xff] }
 0x1ce   :  { %4823 = vmatprep.subr.bf16.mxu0 %v4822_v6  ;;  %v299_v6 = vld [vmem:[#allocation2 + $0x478] sm:$0xff]  ;;  %v4844_v8 = vpack.c.bf16 %v290_v4, %v286_v2  ;;  %v338_v2 = vld [vmem:[#allocation2 + $0x5b0] sm:$0xff] }
 0x1cf   :  { %3616 = vmatpush1.bf16.msra.mxu1 %v5136_v33  ;;  %v4846_v9 = vpack.c.bf16 %v299_v6, %v295_v5  ;;  %v5165_v33 = vld [vmem:[#allocation13 + $0x144] ss:$8 sps:$4 sm:$0xff]   ;;  %v5175_v4 = vld [vmem:[#allocation13 + $0x160] ss:$8 sps:$4 sm:$0xff]  }
 0x1d0   :  { %3617 = vmatprep.subr.bf16.mxu1 %v5141_v48  ;;  %v327_v48 = vld [vmem:[#allocation2 + $0x558] sm:$0xff]  ;;  %v346_v11 = vld [vmem:[#allocation2 + $0x5f0] sm:$0xff] }
 0x1d1   :  { %4825 = vmatpush1.bf16.msra.mxu0 %v4824_v12  ;;  %v5145_v12 = vld [vmem:[#allocation13 + $0x110] ss:$8 sps:$4 sm:$0xff]   ;;  %v350_v17 = vld [vmem:[#allocation2 + $0x610] sm:$0xff] }
 0x1d2   :  { %4827 = vmatprep.subr.bf16.mxu0 %v4826_v37  ;;  %v307_v37 = vld [vmem:[#allocation2 + $0x4b8] sm:$0xff]  ;;  %v354_v19 = vld [vmem:[#allocation2 + $0x630] sm:$0xff] }
 0x1d3   :  { %3618 = vmatpush1.bf16.msra.mxu1 %v5139_v51  ;;  %v4850_v16 = vpack.c.bf16 %v307_v37, %v303_v13  ;;  %v5171_v51 = vld [vmem:[#allocation13 + $0x154] ss:$8 sps:$4 sm:$0xff]   ;;  %v343_v5 = vld [vmem:[#allocation2 + $0x5d8] sm:$0xff] }
 0x1d4   :  { %3628 = vmatprep.subr.bf16.mxu1 %v5144_v60  ;;  %v335_v60 = vld [vmem:[#allocation2 + $0x598] sm:$0xff] }
 0x1d5   :  { %4829 = vmatpush1.bf16.msra.mxu0 %v4828_v20  ;;  %v5151_v20 = vld [vmem:[#allocation13 + $0x120] ss:$8 sps:$4 sm:$0xff]   ;;  %v347_v6 = vld [vmem:[#allocation2 + $0x5f8] sm:$0xff] }
 0x1d6   :  { %4831 = vmatprep.subr.bf16.mxu0 %v4830_v23  ;;  %3620 = vmatmul.mubr.bf16.vlgmr.msra.gmra.mrb[4].mxu1 %v2035_v0  ;;  %v315_v23 = vld [vmem:[#allocation2 + $0x4f8] sm:$0xff] }
 0x1d7   :  { %3629 = vmatpush1.bf16.msra.mxu1 %v5142_v63  ;;  %v4854_v27 = vpack.c.bf16 %v315_v23, %v311_v21  ;;  %v4864_v63 = vpack.c.bf16 %v330_v56, %v326_v53  ;;  %v351_v13 = vld [vmem:[#allocation2 + $0x618] sm:$0xff]  ;;  %v374_v53 = vld [vmem:[#allocation2 + $0x6d0] sm:$0xff] }
 0x1d8   :  { %3630 = vmatprep.subr.bf16.mxu1 %v5147_v7  ;;  %v5183_v7 = vld [vmem:[#allocation13 + $0x174] ss:$8 sps:$4 sm:$0xff]   ;;  %v355_v37 = vld [vmem:[#allocation2 + $0x638] sm:$0xff]  ;;  %v378_v56 = vld [vmem:[#allocation2 + $0x6f0] sm:$0xff] }
 0x1d9   :  { %4833 = vmatpush1.bf16.msra.mxu0 %v4832_v38  ;;  %v319_v38 = vld [vmem:[#allocation2 + $0x518] sm:$0xff] }
 0x1da   :  { %4835 = vmatprep.subr.bf16.mxu0 %v4834_v34  ;;  %v359_v21 = vld [vmem:[#allocation2 + $0x658] sm:$0xff] }
 0x1db   :  { %3631 = vmatpush1.bf16.msra.mxu1 %v5145_v12  ;;  %v5181_v12 = vld [vmem:[#allocation13 + $0x170] ss:$8 sps:$4 sm:$0xff]  }
 0x1dc   :  { %3632 = vmatprep.subr.bf16.mxu1 %v5153_v14  ;;  %v5189_v14 = vld [vmem:[#allocation13 + $0x184] ss:$8 sps:$4 sm:$0xff]  }
 0x1dd   :  { %4837 = vmatpush1.bf16.msra.mxu0 %v4836_v49  ;;  %v331_v49 = vld [vmem:[#allocation2 + $0x578] sm:$0xff] }
 0x1de   :  { %4839 = vmatprep.subr.bf16.mxu0 %v4838_v52  ;;  %v4860_v52 = vpack.c.bf16 %v322_v45, %v318_v43  ;;  %v4862_v44 = vpack.c.bf16 %v331_v49, %v327_v48  ;;  %v363_v23 = vld [vmem:[#allocation2 + $0x678] sm:$0xff]  ;;  %v366_v43 = vld [vmem:[#allocation2 + $0x690] sm:$0xff] }
 0x1df   :  { %3633 = vmatpush1.bf16.msra.mxu1 %v5151_v20  ;;  %v5187_v20 = vld [vmem:[#allocation13 + $0x180] ss:$8 sps:$4 sm:$0xff]   ;;  %v375_v48 = vld [vmem:[#allocation2 + $0x6d8] sm:$0xff] }
 0x1e0   :  { %3634 = vmatprep.subr.bf16.mxu1 %v5159_v24  ;;  %v5195_v24 = vld [vmem:[#allocation13 + $0x194] ss:$8 sps:$4 sm:$0xff]   ;;  %v370_v45 = vld [vmem:[#allocation2 + $0x6b0] sm:$0xff]  ;;  %v379_v49 = vld [vmem:[#allocation2 + $0x6f8] sm:$0xff] }
 0x1e1   :  { %4841 = vmatpush1.bf16.msra.mxu0 %v4840_v47  ;;  %v339_v47 = vld [vmem:[#allocation2 + $0x5b8] sm:$0xff] }
 0x1e2   :  { %4843 = vmatprep.subr.bf16.mxu0 %v4842_v1  ;;  %v4866_v0 = vpack.c.bf16 %v339_v47, %v335_v60  ;;  %v334_v1 = vld [vmem:[#allocation2 + $0x590] sm:$0xff]  ;;  %v383_v60 = vld [vmem:[#allocation2 + $0x718] sm:$0xff] }
 0x1e3   :  { %3635 = vmatpush1.bf16.msra.mxu1 %v5157_v29  ;;  %v5193_v29 = vld [vmem:[#allocation13 + $0x190] ss:$8 sps:$4 sm:$0xff]  }
 0x1e4   :  { %1058 = vmatmul.mubr.f32.vlgmr.msra.gmra.mrb[2].mxu0 %v6053_v50  ;;  %v310_v50 = vld [vmem:[#allocation2 + $0x4d0] sm:$0xff]  ;;  %3636 = vmatprep.subr.bf16.mxu1 %v5165_v33  ;;  %v387_v47 = vld [vmem:[#allocation2 + $0x738] sm:$0xff] }
 0x1e5   :  { %4845 = vmatpush1.bf16.msra.mxu0 %v4844_v8  ;;  %1128 = vmatprep.mubr.f32.mxu0 %v6057_v54  ;;  %v323_v54 = vld [vmem:[#allocation2 + $0x538] sm:$0xff]  ;;  %v4856_v34 = vpack.c.bf16 %v314_v28, %v310_v50  ;;  %v4868_v8 = vpack.c.bf16 %v338_v2, %v334_v1  ;;  %v358_v50 = vld [vmem:[#allocation2 + $0x650] sm:$0xff] }
 0x1e6   :  { %4847 = vmatprep.subr.bf16.mxu0 %v4846_v9  ;;  %v4858_v35 = vpack.c.bf16 %v323_v54, %v319_v38  ;;  %v4870_v9 = vpack.c.bf16 %v347_v6, %v343_v5  ;;  %v362_v28 = vld [vmem:[#allocation2 + $0x670] sm:$0xff]  ;;  %v367_v38 = vld [vmem:[#allocation2 + $0x698] sm:$0xff] }
 0x1e7   :  { %3637 = vmatpush1.bf16.msra.mxu1 %v5163_v46  ;;  %v371_v54 = vld [vmem:[#allocation2 + $0x6b8] sm:$0xff]  ;;  %v5199_v46 = vld [vmem:[#allocation13 + $0x1a0] ss:$8 sps:$4 sm:$0xff]  }
 0x1e8   :  { %3638 = vmatprep.subr.bf16.mxu1 %v5171_v51  ;;  %v5201_v33 = vld [vmem:[#allocation13 + $0x1a4] ss:$8 sps:$4 sm:$0xff]   ;;  %v5207_v51 = vld [vmem:[#allocation13 + $0x1b4] ss:$8 sps:$4 sm:$0xff]  }
 0x1e9   :  { %4849 = vmatpush1.bf16.msra.mxu0 %v4848_v15  ;;  %v4872_v15 = vpack.c.bf16 %v346_v11, %v342_v10  ;;  %v382_v1 = vld [vmem:[#allocation2 + $0x710] sm:$0xff]  ;;  %v391_v5 = vld [vmem:[#allocation2 + $0x758] sm:$0xff] }
 0x1ea   :  { %4851 = vmatprep.subr.bf16.mxu0 %v4850_v16  ;;  %v4874_v16 = vpack.c.bf16 %v355_v37, %v351_v13  ;;  %v386_v2 = vld [vmem:[#allocation2 + $0x730] sm:$0xff]  ;;  %v395_v6 = vld [vmem:[#allocation2 + $0x778] sm:$0xff] }
 0x1eb   :  { %3639 = vmatpush1.bf16.msra.mxu1 %v5169_v57  ;;  %v5205_v57 = vld [vmem:[#allocation13 + $0x1b0] ss:$8 sps:$4 sm:$0xff]   ;;  %v390_v10 = vld [vmem:[#allocation2 + $0x750] sm:$0xff] }
 0x1ec   :  { %3640 = vmatprep.subr.bf16.mxu1 %v5177_v62  ;;  %v5213_v62 = vld [vmem:[#allocation13 + $0x1c4] ss:$8 sps:$4 sm:$0xff]  }
 0x1ed   :  { %4853 = vmatpush1.bf16.msra.mxu0 %v4852_v25  ;;  %v4876_v25 = vpack.c.bf16 %v354_v19, %v350_v17  ;;  %v394_v11 = vld [vmem:[#allocation2 + $0x770] sm:$0xff]  ;;  %v399_v13 = vld [vmem:[#allocation2 + $0x798] sm:$0xff] }
 0x1ee   :  { %4855 = vmatprep.subr.bf16.mxu0 %v4854_v27  ;;  %v4878_v27 = vpack.c.bf16 %v363_v23, %v359_v21  ;;  %v403_v37 = vld [vmem:[#allocation2 + $0x7b8] sm:$0xff]  ;;  %v398_v17 = vld [vmem:[#allocation2 + $0x790] sm:$0xff] }
 0x1ef   :  { %3641 = vmatpush1.bf16.msra.mxu1 %v5175_v4  ;;  %v5211_v4 = vld [vmem:[#allocation13 + $0x1c0] ss:$8 sps:$4 sm:$0xff]   ;;  %v407_v21 = vld [vmem:[#allocation2 + $0x7d8] sm:$0xff] }
 0x1f0   :  { %3642 = vmatprep.subr.bf16.mxu1 %v5183_v7  ;;  %v5219_v7 = vld [vmem:[#allocation13 + $0x1d4] ss:$8 sps:$4 sm:$0xff]   ;;  %v402_v19 = vld [vmem:[#allocation2 + $0x7b0] sm:$0xff]  ;;  %v411_v23 = vld [vmem:[#allocation2 + $0x7f8] sm:$0xff] }
 0x1f1   :  { %4857 = vmatpush1.bf16.msra.mxu0 %v4856_v34  ;;  %v4880_v34 = vpack.c.bf16 %v362_v28, %v358_v50  ;;  %v406_v50 = vld [vmem:[#allocation2 + $0x7d0] sm:$0xff] }
 0x1f2   :  { %4859 = vmatprep.subr.bf16.mxu0 %v4858_v35  ;;  %v4882_v35 = vpack.c.bf16 %v371_v54, %v367_v38  ;;  %v410_v28 = vld [vmem:[#allocation2 + $0x7f0] sm:$0xff]  ;;  %v6126_v38 = vrot.slane %v6106_v55, %v6049_v42  ;;  %v415_v54 = vld [vmem:[#allocation2 + $0x818] sm:$0xff] }
 0x1f3   :  { %3643 = vmatpush1.bf16.msra.mxu1 %v5181_v12  ;;  %v5217_v12 = vld [vmem:[#allocation13 + $0x1d0] ss:$8 sps:$4 sm:$0xff]  }
 0x1f4   :  { %3644 = vmatprep.subr.bf16.mxu1 %v5189_v14  ;;  %v5225_v14 = vld [vmem:[#allocation13 + $0x1e4] ss:$8 sps:$4 sm:$0xff]  }
 0x1f5   :  { %4861 = vmatpush1.bf16.msra.mxu0 %v4860_v52  ;;  %v4884_v52 = vpack.c.bf16 %v370_v45, %v366_v43  ;;  %v5237_v43 = vld [vmem:[#allocation13 + $0x204] ss:$8 sps:$4 sm:$0xff]   ;;  %v4904_v45 = vpack.c.bf16 %v410_v28, %v406_v50  ;;  %v5255_v28 = vld [vmem:[#allocation13 + $0x254] ss:$8 sps:$4 sm:$0xff]  }
 0x1f6   :  { %4863 = vmatprep.subr.bf16.mxu0 %v4862_v44  ;;  %v4886_v44 = vpack.c.bf16 %v379_v49, %v375_v48  ;;  %v414_v49 = vld [vmem:[#allocation2 + $0x810] sm:$0xff]  ;;  %v459_v50 = vld [vmem:[#allocation2 + $0x978] sm:$0xff] }
 0x1f7   :  { %3645 = vmatpush1.bf16.msra.mxu1 %v5187_v20  ;;  %v5223_v20 = vld [vmem:[#allocation13 + $0x1e0] ss:$8 sps:$4 sm:$0xff]  }
 0x1f8   :  { %3646 = vmatprep.subr.bf16.mxu1 %v5195_v24  ;;  %v5231_v24 = vld [vmem:[#allocation13 + $0x1f4] ss:$8 sps:$4 sm:$0xff]  }
 0x1f9   :  { %4865 = vmatpush1.bf16.msra.mxu0 %v4864_v63  ;;  %v4888_v63 = vpack.c.bf16 %v378_v56, %v374_v53  ;;  %v427_v53 = vld [vmem:[#allocation2 + $0x878] sm:$0xff]  ;;  %v5243_v56 = vld [vmem:[#allocation13 + $0x214] ss:$8 sps:$4 sm:$0xff]  }
 0x1fa   :  { %4867 = vmatprep.subr.bf16.mxu0 %v4866_v0  ;;  %v4890_v0 = vpack.c.bf16 %v387_v47, %v383_v60  ;;  %v422_v47 = vld [vmem:[#allocation2 + $0x850] sm:$0xff] }
 0x1fb   :  { %3647 = vmatpush1.bf16.msra.mxu1 %v5193_v29  ;;  %v5229_v29 = vld [vmem:[#allocation13 + $0x1f0] ss:$8 sps:$4 sm:$0xff]  }
 0x1fc   :  { %3648 = vmatprep.subr.bf16.mxu1 %v5201_v33  ;;  %v419_v33 = vld [vmem:[#allocation2 + $0x838] sm:$0xff] }
 0x1fd   :  { %4869 = vmatpush1.bf16.msra.mxu0 %v4868_v8  ;;  %v4892_v8 = vpack.c.bf16 %v386_v2, %v382_v1  ;;  %v4906_v48 = vpack.c.bf16 %v419_v33, %v415_v54  ;;  %v435_v1 = vld [vmem:[#allocation2 + $0x8b8] sm:$0xff]  ;;  %v454_v33 = vld [vmem:[#allocation2 + $0x950] sm:$0xff] }
 0x1fe   :  { %4871 = vmatprep.subr.bf16.mxu0 %v4870_v9  ;;  %v4894_v9 = vpack.c.bf16 %v395_v6, %v391_v5  ;;  %v5246_v2 = vld [vmem:[#allocation13 + $0x224] ss:$8 sps:$4 sm:$0xff]  }
 0x1ff   :  { %3649 = vmatpush1.bf16.msra.mxu1 %v5199_v46 }
 0x200   :  { %3650 = vmatprep.subr.bf16.mxu1 %v5207_v51  ;;  %v418_v51 = vld [vmem:[#allocation2 + $0x830] sm:$0xff] }
 0x201   :  { %4873 = vmatpush1.bf16.msra.mxu0 %v4872_v15  ;;  %v4896_v15 = vpack.c.bf16 %v394_v11, %v390_v10  ;;  %v439_v11 = vld [vmem:[#allocation2 + $0x8d8] sm:$0xff] }
 0x202   :  { %4875 = vmatprep.subr.bf16.mxu0 %v4874_v16  ;;  %v4898_v16 = vpack.c.bf16 %v403_v37, %v399_v13 }
 0x203   :  { %3651 = vmatpush1.bf16.msra.mxu1 %v5205_v57  ;;  %v4908_v57 = vpack.c.bf16 %v418_v51, %v414_v49  ;;  %v467_v49 = vld [vmem:[#allocation2 + $0x9b8] sm:$0xff] }
 0x204   :  { %3652 = vmatprep.subr.bf16.mxu1 %v5213_v62  ;;  %v426_v62 = vld [vmem:[#allocation2 + $0x870] sm:$0xff] }
 0x205   :  { %4877 = vmatpush1.bf16.msra.mxu0 %v4876_v25  ;;  %v4900_v25 = vpack.c.bf16 %v402_v19, %v398_v17  ;;  %v4912_v5 = vpack.c.bf16 %v426_v62, %v422_v47  ;;  %v451_v17 = vld [vmem:[#allocation2 + $0x938] sm:$0xff] }
 0x206   :  { %4879 = vmatprep.subr.bf16.mxu0 %v4878_v27  ;;  %v4902_v27 = vpack.c.bf16 %v411_v23, %v407_v21  ;;  %v5252_v19 = vld [vmem:[#allocation13 + $0x244] ss:$8 sps:$4 sm:$0xff]  }
 0x207   :  { %3653 = vmatpush1.bf16.msra.mxu1 %v5211_v4  ;;  %v6139_v4 = vrot.slane %v6106_v55, %v6065_v26  ;;  %v446_v23 = vld [vmem:[#allocation2 + $0x910] sm:$0xff]  ;;  %v471_v47 = vld [vmem:[#allocation2 + $0x9d8] sm:$0xff] }
 0x208   :  { %3654 = vmatprep.subr.bf16.mxu1 %v5219_v7  ;;  %v430_v7 = vld [vmem:[#allocation2 + $0x890] sm:$0xff]  ;;  %v475_v62 = vld [vmem:[#allocation2 + $0x9f8] sm:$0xff] }
 0x209   :  { %4881 = vmatpush1.bf16.msra.mxu0 %v4880_v34  ;;  %v6130_v34 = vrot.slane %v6106_v55, %v6062_v22  ;;  %v2040_v10 = vpack.c.bf16 %v6139_v4, %v6139_v4  ;;  %v5258_v51 = vld [vmem:[#allocation13 + $0x264] ss:$8 sps:$4 sm:$0xff]  }
 0x20a   :  { %4883 = vmatprep.subr.bf16.mxu0 %v4882_v35  ;;  %v2038_v35 = vpack.c.bf16 %v6126_v38, %v6126_v38 }
 0x20b   :  { %3655 = vmatpush1.bf16.msra.mxu1 %v5217_v12  ;;  %v2037_v46 = vpack.c.bf16 %v6130_v34, %v6130_v34  ;;  %v5249_v12 = vld [vmem:[#allocation13 + $0x234] ss:$8 sps:$4 sm:$0xff]  }
 0x20c   :  { %3656 = vmatprep.subr.bf16.mxu1 %v5225_v14  ;;  %3660 = vmatprep.mubr.bf16.mxu1 %v2038_v35  ;;  %v438_v14 = vld [vmem:[#allocation2 + $0x8d0] sm:$0xff] }
 0x20d   :  { %4885 = vmatpush1.bf16.msra.mxu0 %v4884_v52  ;;  %v5235_v52 = vld [vmem:[#allocation13 + $0x200] ss:$8 sps:$4 sm:$0xff]  }
 0x20e   :  { %4887 = vmatprep.subr.bf16.mxu0 %v4886_v44  ;;  %v423_v44 = vld [vmem:[#allocation2 + $0x858] sm:$0xff]  ;;  %v458_v35 = vld [vmem:[#allocation2 + $0x970] sm:$0xff] }
 0x20f   :  { %3657 = vmatpush1.bf16.msra.mxu1 %v5223_v20  ;;  %v4910_v60 = vpack.c.bf16 %v427_v53, %v423_v44  ;;  %v462_v53 = vld [vmem:[#allocation2 + $0x990] sm:$0xff] }
 0x210   :  { %3658 = vmatprep.subr.bf16.mxu1 %v5231_v24  ;;  %v450_v24 = vld [vmem:[#allocation2 + $0x930] sm:$0xff] }
 0x211   :  { %4889 = vmatpush1.bf16.msra.mxu0 %v4888_v63  ;;  %v5241_v63 = vld [vmem:[#allocation13 + $0x210] ss:$8 sps:$4 sm:$0xff]  }
 0x212   :  { %4891 = vmatprep.subr.bf16.mxu0 %v4890_v0  ;;  %v431_v0 = vld [vmem:[#allocation2 + $0x898] sm:$0xff] }
 0x213   :  { %3659 = vmatpush1.bf16.msra.mxu1 %v5229_v29  ;;  %v4914_v6 = vpack.c.bf16 %v435_v1, %v431_v0  ;;  %v4924_v29 = vpack.c.bf16 %v450_v24, %v446_v23  ;;  %v1934_v0 = vcombine.low %v6130_v34, %v6126_v38  ;;  %v486_v23 = vld [vmem:[#allocation2 + $0xa50] sm:$0xff] }
 0x214   :  { %3669 = vmatprep.subr.bf16.mxu1 %v5237_v43  ;;  %v5836_v43 = vmov 1966171168   ;;  %v490_v24 = vld [vmem:[#allocation2 + $0xa70] sm:$0xff] }
 0x215   :  { %4893 = vmatpush1.bf16.msra.mxu0 %v4892_v8  ;;  %v434_v8 = vld [vmem:[#allocation2 + $0x8b0] sm:$0xff] }
 0x216   :  { %4895 = vmatprep.subr.bf16.mxu0 %v4894_v9  ;;  %3661 = vmatmul.mubr.bf16.vlgmr.msra.gmra.mrb[4].mxu1 %v2037_v46  ;;  %v5244_v9 = vld [vmem:[#allocation13 + $0x220] ss:$8 sps:$4 sm:$0xff]   ;;  %v4916_v13 = vpack.c.bf16 %v434_v8, %v430_v7  ;;  %v5253_v46 = vld [vmem:[#allocation13 + $0x250] ss:$8 sps:$4 sm:$0xff]  }
 0x217   :  { %3670 = vmatpush1.bf16.msra.mxu1 %v5235_v52  ;;  %3701 = vmatprep.mubr.bf16.mxu1 %v2040_v10  ;;  %v4928_v52 = vpack.c.bf16 %v458_v35, %v454_v33  ;;  %v5259_v8 = vld [vmem:[#allocation13 + $0x270] ss:$8 sps:$4 sm:$0xff]   ;;  %v494_v33 = vld [vmem:[#allocation2 + $0xa90] sm:$0xff] }
 0x218   :  { %3671 = vmatprep.subr.bf16.mxu1 %v5243_v56  ;;  %v466_v56 = vld [vmem:[#allocation2 + $0x9b0] sm:$0xff]  ;;  %v479_v10 = vld [vmem:[#allocation2 + $0xa18] sm:$0xff] }
 0x219   :  { %4897 = vmatpush1.bf16.msra.mxu0 %v4896_v15  ;;  %v5247_v15 = vld [vmem:[#allocation13 + $0x230] ss:$8 sps:$4 sm:$0xff]   ;;  %v4932_v1 = vpack.c.bf16 %v466_v56, %v462_v53  ;;  %v498_v35 = vld [vmem:[#allocation2 + $0xab0] sm:$0xff] }
 0x21a   :  { %4899 = vmatprep.subr.bf16.mxu0 %v4898_v16  ;;  %v447_v16 = vld [vmem:[#allocation2 + $0x918] sm:$0xff]  ;;  %v502_v53 = vld [vmem:[#allocation2 + $0xad0] sm:$0xff] }
 0x21b   :  { %3672 = vmatpush1.bf16.msra.mxu1 %v5241_v63  ;;  %v4922_v21 = vpack.c.bf16 %v451_v17, %v447_v16  ;;  %v5261_v63 = vld [vmem:[#allocation13 + $0x274] ss:$8 sps:$4 sm:$0xff]   ;;  %v6163_v16 = vrot.slane %v6106_v55, %v695_v3  ;;  %v506_v56 = vld [vmem:[#allocation2 + $0xaf0] sm:$0xff] }
 0x21c   :  { %3673 = vmatprep.subr.bf16.mxu1 %v5246_v2  ;;  %v4934_v2 = vpack.c.bf16 %v475_v62, %v471_v47  ;;  %v515_v47 = vld [vmem:[#allocation2 + $0xb38] sm:$0xff] }
 0x21d   :  { %4901 = vmatpush1.bf16.msra.mxu0 %v4900_v25  ;;  %v5250_v25 = vld [vmem:[#allocation13 + $0x240] ss:$8 sps:$4 sm:$0xff]   ;;  %v5276_v62 = vld [vmem:[#allocation13 + $0x2c4] ss:$8 sps:$4 sm:$0xff]  }
 0x21e   :  { %4903 = vmatprep.subr.bf16.mxu0 %v4902_v27  ;;  %v455_v27 = vld [vmem:[#allocation2 + $0x958] sm:$0xff] }
 0x21f   :  { %3674 = vmatpush1.bf16.msra.mxu1 %v5244_v9  ;;  %v4926_v54 = vpack.c.bf16 %v459_v50, %v455_v27  ;;  %v6151_v9 = vrot.slane %v6106_v55, %v6085_v18  ;;  %v495_v55 = vld [vmem:[#allocation2 + $0xa98] sm:$0xff] }
 0x220   :  { %3675 = vmatprep.subr.bf16.mxu1 %v5249_v12  ;;  %v5270_v27 = vld [vmem:[#allocation13 + $0x2a4] ss:$8 sps:$4 sm:$0xff]  }
 0x221   :  { %4905 = vmatpush1.bf16.msra.mxu0 %v4904_v45  ;;  %v1938_v45 = vunpack.c.l.s4 %v5836_v43  ;;  %v1935_v12 = vcombine.low %v6151_v9, %v6139_v4  ;;  %v5267_v4 = vld [vmem:[#allocation13 + $0x294] ss:$8 sps:$4 sm:$0xff]   ;;  %v5268_v43 = vld [vmem:[#allocation13 + $0x2a0] ss:$8 sps:$4 sm:$0xff]  }
 0x222   :  { %4907 = vmatprep.subr.bf16.mxu0 %v4906_v48  ;;  %v463_v48 = vld [vmem:[#allocation2 + $0x998] sm:$0xff] }
 0x223   :  { %3676 = vmatpush1.bf16.msra.mxu1 %v5247_v15  ;;  %v4930_v44 = vpack.c.bf16 %v467_v49, %v463_v48  ;;  %v5262_v15 = vld [vmem:[#allocation13 + $0x280] ss:$8 sps:$4 sm:$0xff]   ;;  %v507_v48 = vld [vmem:[#allocation2 + $0xaf8] sm:$0xff]  ;;  %v5273_v49 = vld [vmem:[#allocation13 + $0x2b4] ss:$8 sps:$4 sm:$0xff]  }
 0x224   :  { %1129 = vmatmul.mubr.f32.vlgmr.msra.gmra.mrb[2].mxu0 %v6070_v31  ;;  %v443_v31 = vld [vmem:[#allocation2 + $0x8f8] sm:$0xff]  ;;  %3677 = vmatprep.subr.bf16.mxu1 %v5252_v19 }
 0x225   :  { %4909 = vmatpush1.bf16.msra.mxu0 %v4908_v57  ;;  %1199 = vmatprep.mubr.f32.mxu0 %v6074_v36  ;;  %v4918_v37 = vpack.c.bf16 %v443_v31, %v439_v11  ;;  %v442_v36 = vld [vmem:[#allocation2 + $0x8f0] sm:$0xff]  ;;  %v1939_v57 = vunpack.c.0.s8 %v1938_v45  ;;  %v483_v11 = vld [vmem:[#allocation2 + $0xa38] sm:$0xff] }
 0x226   :  { %4911 = vmatprep.subr.bf16.mxu0 %v4910_v60  ;;  %v4920_v20 = vpack.c.bf16 %v442_v36, %v438_v14  ;;  %v5256_v60 = vld [vmem:[#allocation13 + $0x260] ss:$8 sps:$4 sm:$0xff]   ;;  %v5264_v31 = vld [vmem:[#allocation13 + $0x284] ss:$8 sps:$4 sm:$0xff]  }
 0x227   :  { %3678 = vmatpush1.bf16.msra.mxu1 %v5250_v25  ;;  %v6147_v7 = vsub.s32 %v1939_v57, %v6030_v32  ;;  %v478_v14 = vld [vmem:[#allocation2 + $0xa10] sm:$0xff]  ;;  %v5265_v32 = vld [vmem:[#allocation13 + $0x290] ss:$8 sps:$4 sm:$0xff]  }
 0x228   :  { %3679 = vmatprep.subr.bf16.mxu1 %v5255_v28  ;;  %v482_v36 = vld [vmem:[#allocation2 + $0xa30] sm:$0xff]  ;;  %v499_v25 = vld [vmem:[#allocation2 + $0xab8] sm:$0xff] }
 0x229   :  { %4913 = vmatpush1.bf16.msra.mxu0 %v4912_v5  ;;  %v470_v5 = vld [vmem:[#allocation2 + $0x9d0] sm:$0xff]  ;;  %v1943_v38 = vrot.slane %v1933_v61, %v6147_v7  ;;  %v1950_v34 = vrot.slane %v1934_v0, %v6147_v7  ;;  %v491_v61 = vld [vmem:[#allocation2 + $0xa78] sm:$0xff]  ;;  %v1957_v19 = vrot.slane %v1935_v12, %v6147_v7 }
 0x22a   :  { %4915 = vmatprep.subr.bf16.mxu0 %v4914_v6  ;;  %v474_v6 = vld [vmem:[#allocation2 + $0x9f0] sm:$0xff]  ;;  %v4942_v3 = vpack.c.bf16 %v491_v61, %v487_v59  ;;  %v5271_v57 = vld [vmem:[#allocation13 + $0x2b0] ss:$8 sps:$4 sm:$0xff]  }
 0x22b   :  { %3680 = vmatpush1.bf16.msra.mxu1 %v5253_v46  ;;  %v1965_v17 = vcombine.low %v1943_v38, %v1950_v34  ;;  %v503_v46 = vld [vmem:[#allocation2 + $0xad8] sm:$0xff]  ;;  %v518_v38 = vld [vmem:[#allocation2 + $0xb50] sm:$0xff] }
 0x22c   :  { %3681 = vmatprep.subr.bf16.mxu1 %v5258_v51  ;;  %v522_v34 = vld [vmem:[#allocation2 + $0xb70] sm:$0xff]  ;;  %v5277_v12 = vld [vmem:[#allocation13 + $0x2d0] ss:$8 sps:$4 sm:$0xff]  }
 0x22d   :  { %4917 = vmatpush1.bf16.msra.mxu0 %v4916_v13  ;;  %v4936_v13 = vpack.c.bf16 %v474_v6, %v470_v5  ;;  %v1973_v50 = vrot.slane %v1965_v17, %v6147_v7  ;;  %v5274_v5 = vld [vmem:[#allocation13 + $0x2c0] ss:$8 sps:$4 sm:$0xff]   ;;  %v519_v6 = vld [vmem:[#allocation2 + $0xb58] sm:$0xff] }
 0x22e   :  { %4919 = vmatprep.subr.bf16.mxu0 %v4918_v37  ;;  %v4938_v37 = vpack.c.bf16 %v483_v11, %v479_v10  ;;  %v5279_v10 = vld [vmem:[#allocation13 + $0x2d4] ss:$8 sps:$4 sm:$0xff]   ;;  %v526_v59 = vld [vmem:[#allocation2 + $0xb90] sm:$0xff]  ;;  %v535_v17 = vld [vmem:[#allocation2 + $0xbd8] sm:$0xff] }
 0x22f   :  { %3682 = vmatpush1.bf16.msra.mxu1 %v5256_v60  ;;  %v511_v60 = vld [vmem:[#allocation2 + $0xb18] sm:$0xff]  ;;  %v530_v61 = vld [vmem:[#allocation2 + $0xbb0] sm:$0xff] }
 0x230   :  { %3683 = vmatprep.subr.bf16.mxu1 %v5261_v63  ;;  %v4952_v63 = vpack.c.bf16 %v506_v56, %v502_v53  ;;  %v4954_v0 = vpack.c.bf16 %v515_v47, %v511_v60  ;;  %v5298_v53 = vld [vmem:[#allocation13 + $0x340] ss:$8 sps:$4 sm:$0xff]   ;;  %v5303_v56 = vld [vmem:[#allocation13 + $0x354] ss:$8 sps:$4 sm:$0xff]   ;;  %v6186_v47 = vld [vmem:[#allocation7] sm:$0xf] }
 0x231   :  { %4921 = vmatpush1.bf16.msra.mxu0 %v4920_v20  ;;  %v1936_v20 = vcombine.low %v6163_v16, %v6168_v58  ;;  %v6184_v60 = vld [vmem:[#allocation5] sm:$0xf] }
 0x232   :  { %4923 = vmatprep.subr.bf16.mxu0 %v4922_v21  ;;  %v4940_v21 = vpack.c.bf16 %v482_v36, %v478_v14  ;;  %v5282_v14 = vld [vmem:[#allocation13 + $0x2e4] ss:$8 sps:$4 sm:$0xff]   ;;  %v4960_v36 = vpack.c.bf16 %v522_v34, %v518_v38  ;;  %v5309_v38 = vld [vmem:[#allocation13 + $0x374] ss:$8 sps:$4 sm:$0xff]  }
 0x233   :  { %3684 = vmatpush1.bf16.msra.mxu1 %v5259_v8  ;;  %v1964_v30 = vrot.slane %v1936_v20, %v6147_v7  ;;  %v523_v8 = vld [vmem:[#allocation2 + $0xb78] sm:$0xff]  ;;  %v5285_v20 = vld [vmem:[#allocation13 + $0x2f4] ss:$8 sps:$4 sm:$0xff]  }
 0x234   :  { %3685 = vmatprep.subr.bf16.mxu1 %v5264_v31  ;;  %v4958_v31 = vpack.c.bf16 %v523_v8, %v519_v6  ;;  %v1320_v6 = vrot.slane %v6184_v60, %v6033_v39  ;;  %v5178_v8 = vld [vmem:[#allocation8 + $0x50] ss:$8 sps:$4 sm:$0xff]  }
 0x235   :  { %4925 = vmatpush1.bf16.msra.mxu0 %v4924_v29  ;;  %v1966_v28 = vcombine.low %v1957_v19, %v1964_v30  ;;  %v4944_v29 = vpack.c.bf16 %v490_v24, %v486_v23  ;;  %v539_v19 = vld [vmem:[#allocation2 + $0xbf8] sm:$0xff]  ;;  %v534_v23 = vld [vmem:[#allocation2 + $0xbd0] sm:$0xff] }
 0x236   :  { %4927 = vmatprep.subr.bf16.mxu0 %v4926_v54  ;;  %v4946_v54 = vpack.c.bf16 %v499_v25, %v495_v55  ;;  %v538_v24 = vld [vmem:[#allocation2 + $0xbf0] sm:$0xff]  ;;  %v2039_v25 = vpack.c.bf16 %v6151_v9, %v6151_v9  ;;  %v5154_v9 = vld [vmem:[#allocation8 + $0x10] ss:$8 sps:$4 sm:$0xff]  }
 0x237   :  { %3686 = vmatpush1.bf16.msra.mxu1 %v5262_v15  ;;  %v1980_v45 = vrot.slane %v1966_v28, %v6147_v7  ;;  %v5288_v30 = vld [vmem:[#allocation13 + $0x304] ss:$8 sps:$4 sm:$0xff]   ;;  %v4968_v55 = vpack.c.bf16 %v538_v24, %v534_v23  ;;  %v5291_v28 = vld [vmem:[#allocation13 + $0x314] ss:$8 sps:$4 sm:$0xff]   ;;  %v5204_v23 = vld [vmem:[#allocation8 + $0x94] ss:$8 sps:$4 sm:$0xff]  }
 0x238   :  { %3687 = vmatprep.subr.bf16.mxu1 %v5267_v4  ;;  %v5280_v4 = vld [vmem:[#allocation13 + $0x2e0] ss:$8 sps:$4 sm:$0xff]   ;;  %v5316_v24 = vld [vmem:[#allocation13 + $0x390] ss:$8 sps:$4 sm:$0xff]  }
 0x239   :  { %4929 = vmatpush1.bf16.msra.mxu0 %v4928_v52  ;;  %v1981_v51 = vcombine.low %v1973_v50, %v1980_v45  ;;  %v4948_v52 = vpack.c.bf16 %v498_v35, %v494_v33  ;;  %v5286_v50 = vld [vmem:[#allocation13 + $0x300] ss:$8 sps:$4 sm:$0xff]   ;;  %v5156_v33 = vld [vmem:[#allocation8 + $0x14] ss:$8 sps:$4 sm:$0xff]  }
 0x23a   :  { %4931 = vmatprep.subr.bf16.mxu0 %v4930_v44  ;;  %v4950_v44 = vpack.c.bf16 %v507_v48, %v503_v46  ;;  %v5289_v35 = vld [vmem:[#allocation13 + $0x310] ss:$8 sps:$4 sm:$0xff]   ;;  %v5162_v45 = vld [vmem:[#allocation8 + $0x24] ss:$8 sps:$4 sm:$0xff]   ;;  %v5160_v48 = vld [vmem:[#allocation8 + $0x20] ss:$8 sps:$4 sm:$0xff]  }
 0x23b   :  { %3688 = vmatpush1.bf16.msra.mxu1 %v5265_v32  ;;  %2033 = vst [vmem:[%s6368_s13] sm:$0xff] %v1981_v51  ;;  %v5283_v32 = vld [vmem:[#allocation13 + $0x2f0] ss:$8 sps:$4 sm:$0xff]   ;;  %v5292_v46 = vld [vmem:[#allocation13 + $0x320] ss:$8 sps:$4 sm:$0xff]  }
 0x23c   :  { %3689 = vmatprep.subr.bf16.mxu1 %v5270_v27  ;;  %v5150_v27 = vld [vmem:[#allocation8 + $0x4] ss:$8 sps:$4 sm:$0xff]   ;;  %v5295_v51 = vld [vmem:[#allocation13 + $0x330] ss:$8 sps:$4 sm:$0xff]  }
 0x23d   :  { %4933 = vmatpush1.bf16.msra.mxu0 %v4932_v1  ;;  %v510_v1 = vld [vmem:[#allocation2 + $0xb10] sm:$0xff] }
 0x23e   :  { %4935 = vmatprep.subr.bf16.mxu0 %v4934_v2  ;;  %v514_v2 = vld [vmem:[#allocation2 + $0xb30] sm:$0xff] }
 0x23f   :  { %3690 = vmatpush1.bf16.msra.mxu1 %v5268_v43  ;;  %v4956_v11 = vpack.c.bf16 %v514_v2, %v510_v1  ;;  %v5294_v43 = vld [vmem:[#allocation13 + $0x324] ss:$8 sps:$4 sm:$0xff]   ;;  %v5301_v1 = vld [vmem:[#allocation13 + $0x350] ss:$8 sps:$4 sm:$0xff]  }
 0x240   :  { %3691 = vmatprep.subr.bf16.mxu1 %v5273_v49  ;;  %v5168_v49 = vld [vmem:[#allocation8 + $0x34] ss:$8 sps:$4 sm:$0xff]   ;;  %v5306_v2 = vld [vmem:[#allocation13 + $0x364] ss:$8 sps:$4 sm:$0xff]  }
 0x241   :  { %4937 = vmatpush1.bf16.msra.mxu0 %v4936_v13  ;;  %v527_v13 = vld [vmem:[#allocation2 + $0xb98] sm:$0xff] }
 0x242   :  { %4939 = vmatprep.subr.bf16.mxu0 %v4938_v37  ;;  %v531_v37 = vld [vmem:[#allocation2 + $0xbb8] sm:$0xff] }
 0x243   :  { %3692 = vmatpush1.bf16.msra.mxu1 %v5271_v57  ;;  %v4962_v15 = vpack.c.bf16 %v531_v37, %v527_v13  ;;  %v5172_v57 = vld [vmem:[#allocation8 + $0x40] ss:$8 sps:$4 sm:$0xff]   ;;  %v5837_v13 = vmov 0.0  }
 0x244   :  { %3693 = vmatprep.subr.bf16.mxu1 %v5276_v62 }
 0x245   :  { %4941 = vmatpush1.bf16.msra.mxu0 %v4940_v21  ;;  %v4964_v21 = vpack.c.bf16 %v530_v61, %v526_v59  ;;  %v5312_v61 = vld [vmem:[#allocation13 + $0x384] ss:$8 sps:$4 sm:$0xff]  }
 0x246   :  { %4943 = vmatprep.subr.bf16.mxu0 %v4942_v3  ;;  %v4966_v3 = vpack.c.bf16 %v539_v19, %v535_v17  ;;  %v5190_v17 = vld [vmem:[#allocation8 + $0x70] ss:$8 sps:$4 sm:$0xff]   ;;  %v5198_v19 = vld [vmem:[#allocation8 + $0x84] ss:$8 sps:$4 sm:$0xff]  }
 0x247   :  { %3694 = vmatpush1.bf16.msra.mxu1 %v5274_v5  ;;  %v1287_v5 = vrot.slane %v6186_v47, %v6033_v39 }
 0x248   :  { %3695 = vmatprep.subr.bf16.mxu1 %v5279_v10  ;;  %v5186_v10 = vld [vmem:[#allocation8 + $0x64] ss:$8 sps:$4 sm:$0xff]  }
 0x249   :  { %4945 = vmatpush1.bf16.msra.mxu0 %v4944_v29  ;;  %v2042_v29 = vpack.c.bf16 %v6168_v58, %v6168_v58  ;;  %v5297_v58 = vld [vmem:[#allocation13 + $0x334] ss:$8 sps:$4 sm:$0xff]  }
 0x24a   :  { %4947 = vmatprep.subr.bf16.mxu0 %v4946_v54  ;;  %v5148_v54 = vld [vmem:[#allocation8] ss:$8 sps:$4 sm:$0xff]  }
 0x24b   :  { %3696 = vmatpush1.bf16.msra.mxu1 %v5277_v12  ;;  %v5184_v12 = vld [vmem:[#allocation8 + $0x60] ss:$8 sps:$4 sm:$0xff]  }
 0x24c   :  { %3697 = vmatprep.subr.bf16.mxu1 %v5282_v14 }
 0x24d   :  { %4949 = vmatpush1.bf16.msra.mxu0 %v4948_v52  ;;  %v5300_v52 = vld [vmem:[#allocation13 + $0x344] ss:$8 sps:$4 sm:$0xff]  }
 0x24e   :  { %4951 = vmatprep.subr.bf16.mxu0 %v4950_v44  ;;  %v5166_v44 = vld [vmem:[#allocation8 + $0x30] ss:$8 sps:$4 sm:$0xff]  }
 0x24f   :  { %3698 = vmatpush1.bf16.msra.mxu1 %v5280_v4 }
 0x250   :  { %3699 = vmatprep.subr.bf16.mxu1 %v5285_v20  ;;  %v5310_v20 = vld [vmem:[#allocation13 + $0x380] ss:$8 sps:$4 sm:$0xff]  }
 0x251   :  { %4953 = vmatpush1.bf16.msra.mxu0 %v4952_v63  ;;  %v5180_v63 = vld [vmem:[#allocation8 + $0x54] ss:$8 sps:$4 sm:$0xff]  }
 0x252   :  { %4955 = vmatprep.subr.bf16.mxu0 %v4954_v0 }
 0x253   :  { %3700 = vmatpush1.bf16.msra.mxu1 %v5283_v32  ;;  %v5324_v32 = vld [vmem:[#allocation13 + $0x3a4] ss:$8 sps:$4 sm:$0xff]  }
 0x254   :  { %3710 = vmatprep.subr.bf16.mxu1 %v5288_v30  ;;  %v5202_v30 = vld [vmem:[#allocation8 + $0x90] ss:$8 sps:$4 sm:$0xff]  }
 0x255   :  { %4957 = vmatpush1.bf16.msra.mxu0 %v4956_v11  ;;  %v5304_v11 = vld [vmem:[#allocation13 + $0x360] ss:$8 sps:$4 sm:$0xff]  }
 0x256   :  { %4959 = vmatprep.subr.bf16.mxu0 %v4958_v31  ;;  %3702 = vmatmul.mubr.bf16.vlgmr.msra.gmra.mrb[4].mxu1 %v2039_v25  ;;  %v5322_v25 = vld [vmem:[#allocation13 + $0x3a0] ss:$8 sps:$4 sm:$0xff]  }
 0x257   :  { %3711 = vmatpush1.bf16.msra.mxu1 %v5286_v50  ;;  %3742 = vmatprep.mubr.bf16.mxu1 %v2042_v29  ;;  %v5208_v50 = vld [vmem:[#allocation8 + $0xa0] ss:$8 sps:$4 sm:$0xff]   ;;  %v5328_v29 = vld [vmem:[#allocation13 + $0x3b0] ss:$8 sps:$4 sm:$0xff]  }
 0x258   :  { %3712 = vmatprep.subr.bf16.mxu1 %v5291_v28  ;;  %v5216_v28 = vld [vmem:[#allocation8 + $0xb4] ss:$8 sps:$4 sm:$0xff]  }
 0x259   :  { %4961 = vmatpush1.bf16.msra.mxu0 %v4960_v36  ;;  %v5192_v36 = vld [vmem:[#allocation8 + $0x74] ss:$8 sps:$4 sm:$0xff]  }
 0x25a   :  { %4963 = vmatprep.subr.bf16.mxu0 %v4962_v15  ;;  %v5307_v15 = vld [vmem:[#allocation13 + $0x370] ss:$8 sps:$4 sm:$0xff]  }
 0x25b   :  { %3713 = vmatpush1.bf16.msra.mxu1 %v5289_v35  ;;  %v5222_v35 = vld [vmem:[#allocation8 + $0xc4] ss:$8 sps:$4 sm:$0xff]  }
 0x25c   :  { %3714 = vmatprep.subr.bf16.mxu1 %v5294_v43  ;;  %v5334_v43 = vld [vmem:[#allocation13 + $0x3c0] ss:$8 sps:$4 sm:$0xff]  }
 0x25d   :  { %4965 = vmatpush1.bf16.msra.mxu0 %v4964_v21  ;;  %v5318_v21 = vld [vmem:[#allocation13 + $0x394] ss:$8 sps:$4 sm:$0xff]  }
 0x25e   :  { %4967 = vmatprep.subr.bf16.mxu0 %v4966_v3  ;;  %v5196_v3 = vld [vmem:[#allocation8 + $0x80] ss:$8 sps:$4 sm:$0xff]  }
 0x25f   :  { %3715 = vmatpush1.bf16.msra.mxu1 %v5292_v46  ;;  %v5228_v46 = vld [vmem:[#allocation8 + $0xd4] ss:$8 sps:$4 sm:$0xff]  }
 0x260   :  { %3716 = vmatprep.subr.bf16.mxu1 %v5297_v58  ;;  %v5340_v58 = vld [vmem:[#allocation13 + $0x3d0] ss:$8 sps:$4 sm:$0xff]  }
 0x261   :  { %4969 = vmatpush1.bf16.msra.mxu0 %v4968_v55  ;;  %v5210_v55 = vld [vmem:[#allocation8 + $0xa4] ss:$8 sps:$4 sm:$0xff]  }
 0x262   :  { %1737 = vmatprep.subr.bf16.mxu0 %v5150_v27  ;;  %v5330_v27 = vld [vmem:[#allocation13 + $0x3b4] ss:$8 sps:$4 sm:$0xff]  }
 0x263   :  { %3717 = vmatpush1.bf16.msra.mxu1 %v5295_v51  ;;  %v1316_v51 = vrot.slane %v6184_v60, %v6046_v40 }
 0x264   :  { %1200 = vmatmul.mubr.f32.vlgmr.msra.gmra.mrb[2].mxu0 %v6094_v41  ;;  %v5174_v41 = vld [vmem:[#allocation8 + $0x44] ss:$8 sps:$4 sm:$0xff]   ;;  %3718 = vmatprep.subr.bf16.mxu1 %v5300_v52  ;;  %v6188_v62 = vpop.f32.mrb[0].mxu1  ;;  %v5226_v52 = vld [vmem:[#allocation8 + $0xd0] ss:$8 sps:$4 sm:$0xff]  }
 0x265   :  { %1738 = vmatpush1.bf16.msra.mxu0 %v5148_v54  ;;  %v6190_v0 = vpop.f32.mrb[1].mxu1  ;;  %v5336_v54 = vld [vmem:[#allocation13 + $0x3c4] ss:$8 sps:$4 sm:$0xff]  }
 0x266   :  { %1739 = vmatprep.subr.bf16.mxu0 %v5156_v33  ;;  %v5214_v33 = vld [vmem:[#allocation8 + $0xb0] ss:$8 sps:$4 sm:$0xff]  }
 0x267   :  { %3719 = vmatpush1.bf16.msra.mxu1 %v5298_v53  ;;  %v5354_v53 = vld [vmem:[#allocation13 + $0x3f4] ss:$8 sps:$4 sm:$0xff]  }
 0x268   :  { %3720 = vmatprep.subr.bf16.mxu1 %v5303_v56  ;;  %v5232_v56 = vld [vmem:[#allocation8 + $0xe0] ss:$8 sps:$4 sm:$0xff]  }
 0x269   :  { %1740 = vmatpush1.bf16.msra.mxu0 %v5154_v9  ;;  %v5342_v9 = vld [vmem:[#allocation13 + $0x3d4] ss:$8 sps:$4 sm:$0xff]  }
 0x26a   :  { %1741 = vmatprep.subr.bf16.mxu0 %v5162_v45  ;;  %v5220_v45 = vld [vmem:[#allocation8 + $0xc0] ss:$8 sps:$4 sm:$0xff]  }
 0x26b   :  { %3721 = vmatpush1.bf16.msra.mxu1 %v5301_v1 }
 0x26c   :  { %3722 = vmatprep.subr.bf16.mxu1 %v5306_v2 }
 0x26d   :  { %1742 = vmatpush1.bf16.msra.mxu0 %v5160_v48  ;;  %v5348_v48 = vld [vmem:[#allocation13 + $0x3e4] ss:$8 sps:$4 sm:$0xff]  }
 0x26e   :  { %1743 = vmatprep.subr.bf16.mxu0 %v5168_v49  ;;  %v1283_v49 = vrot.slane %v6186_v47, %v6046_v40 }
 0x26f   :  { %3723 = vmatpush1.bf16.msra.mxu1 %v5304_v11  ;;  %v5315_v11 = vld [vmem:[#allocation8 + $0x104] ss:$8 sps:$4 sm:$0xff]  }
 0x270   :  { %3724 = vmatprep.subr.bf16.mxu1 %v5309_v38  ;;  %v5366_v38 = vld [vmem:[#allocation13 + $0x414] ss:$8 sps:$4 sm:$0xff]  }
 0x271   :  { %1744 = vmatpush1.bf16.msra.mxu0 %v5166_v44  ;;  %v5234_v44 = vld [vmem:[#allocation8 + $0xe4] ss:$8 sps:$4 sm:$0xff]  }
 0x272   :  { %1745 = vmatprep.subr.bf16.mxu0 %v5174_v41  ;;  %v5346_v41 = vld [vmem:[#allocation13 + $0x3e0] ss:$8 sps:$4 sm:$0xff]  }
 0x273   :  { %3725 = vmatpush1.bf16.msra.mxu1 %v5307_v15  ;;  %v5327_v15 = vld [vmem:[#allocation8 + $0x124] ss:$8 sps:$4 sm:$0xff]  }
 0x274   :  { %3726 = vmatprep.subr.bf16.mxu1 %v5312_v61  ;;  %v5378_v61 = vld [vmem:[#allocation13 + $0x434] ss:$8 sps:$4 sm:$0xff]  }
 0x275   :  { %1746 = vmatpush1.bf16.msra.mxu0 %v5172_v57  ;;  %v5240_v57 = vld [vmem:[#allocation8 + $0xf4] ss:$8 sps:$4 sm:$0xff]  }
 0x276   :  { %1747 = vmatprep.subr.bf16.mxu0 %v5180_v63  ;;  %v5352_v63 = vld [vmem:[#allocation13 + $0x3f0] ss:$8 sps:$4 sm:$0xff]  }
 0x277   :  { %v6196_v31 = vpop.f32.mrb[0].mxu0  ;;  %3727 = vmatpush1.bf16.msra.mxu1 %v5310_v20  ;;  %v5384_v20 = vld [vmem:[#allocation13 + $0x444] ss:$8 sps:$4 sm:$0xff]  }
 0x278   :  { %v990_v34 = vpop.f32.mrb[1].mxu0  ;;  %3728 = vmatprep.subr.bf16.mxu1 %v5318_v21  ;;  %vm1300_vm2 = vcmp.gt.f32.partialorder %v6196_v31, %v1283_v49  ;;  %vm1333_vm3 = vcmp.lt.f32.partialorder %v6196_v31, %v1316_v51  ;;  %v5358_v31 = vld [vmem:[#allocation13 + $0x400] ss:$8 sps:$4 sm:$0xff]   ;;  %v5331_v21 = vld [vmem:[#allocation8 + $0x130] ss:$8 sps:$4 sm:$0xff]  }
 0x279   :  { %vm1301_vm0 = vcmp.gt.f32.partialorder %v990_v34, %v1287_v5  ;;  %vm1334_vm1 = vcmp.lt.f32.partialorder %v990_v34, %v1320_v6  ;;  %1748 = vmatpush1.bf16.msra.mxu0 %v5178_v8  ;;  %v4148_v1 = vsel %vm1300_vm2, 1.0, %v5837_v13  ;;  %v4152_v2 = vsel %vm1333_vm3, 1.0, %v5837_v13  ;;  %v5360_v5 = vld [vmem:[#allocation13 + $0x404] ss:$8 sps:$4 sm:$0xff]   ;;  %v5369_v49 = vld [vmem:[#allocation8 + $0x194] ss:$8 sps:$4 sm:$0xff]  }
 0x27a   :  { %v4149_v37 = vsel %vm1301_vm0, 1.0, %v5837_v13  ;;  %v4153_v14 = vsel %vm1334_vm1, 1.0, %v5837_v13  ;;  %1749 = vmatprep.subr.bf16.mxu0 %v5186_v10  ;;  %v5238_v6 = vld [vmem:[#allocation8 + $0xf0] ss:$8 sps:$4 sm:$0xff]   ;;  %v2041_v8 = vpack.c.bf16 %v6163_v16, %v6163_v16  ;;  %v1345_v10 = vsub.f32 %v4148_v1, %v4152_v2  ;;  %v5313_v34 = vld [vmem:[#allocation8 + $0x100] ss:$8 sps:$4 sm:$0xff]  }
 0x27b   :  { %v1346_v59 = vsub.f32 %v4149_v37, %v4153_v14  ;;  %3729 = vmatpush1.bf16.msra.mxu1 %v5316_v24  ;;  %v5321_v37 = vld [vmem:[#allocation8 + $0x114] ss:$8 sps:$4 sm:$0xff]   ;;  %v5319_v16 = vld [vmem:[#allocation8 + $0x110] ss:$8 sps:$4 sm:$0xff]   ;;  %vm4123_vm0 = vcmask 73728  }
 0x27c   :  { %3730 = vmatprep.subr.bf16.mxu1 %v5324_v32  ;;  %v5364_v14 = vld [vmem:[#allocation13 + $0x410] ss:$8 sps:$4 sm:$0xff]   ;;  %v5390_v24 = vld [vmem:[#allocation13 + $0x454] ss:$8 sps:$4 sm:$0xff]  }
 0x27d   :  { %1750 = vmatpush1.bf16.msra.mxu0 %v5184_v12  ;;  %v1350_v4 = vpack.c.bf16 %v1346_v59, %v1346_v59  ;;  %v1349_v12 = vpack.c.bf16 %v1345_v10, %v1345_v10  ;;  %v5370_v59 = vld [vmem:[#allocation13 + $0x420] ss:$8 sps:$4 sm:$0xff]   ;;  %v5337_v32 = vld [vmem:[#allocation8 + $0x140] ss:$8 sps:$4 sm:$0xff]   ;;  %v5409_v51 = vld [vmem:[#allocation13 + $0x490] ss:$8 sps:$4 sm:$0xff]  }
 0x27e   :  { %1751 = vmatprep.subr.bf16.mxu0 %v5192_v36  ;;  %v5372_v36 = vld [vmem:[#allocation13 + $0x424] ss:$8 sps:$4 sm:$0xff]  }
 0x27f   :  { %1769 = vmatprep.mubr.bf16.mxu0 %v1350_v4  ;;  %3731 = vmatpush1.bf16.msra.mxu1 %v5322_v25  ;;  %v5325_v4 = vld [vmem:[#allocation8 + $0x120] ss:$8 sps:$4 sm:$0xff]  }
 0x280   :  { %3732 = vmatprep.subr.bf16.mxu1 %v5330_v27  ;;  %v5396_v25 = vld [vmem:[#allocation13 + $0x464] ss:$8 sps:$4 sm:$0xff]  }
 0x281   :  { %1752 = vmatpush1.bf16.msra.mxu0 %v5190_v17  ;;  %v5333_v17 = vld [vmem:[#allocation8 + $0x134] ss:$8 sps:$4 sm:$0xff]   ;;  %v5343_v27 = vld [vmem:[#allocation8 + $0x150] ss:$8 sps:$4 sm:$0xff]  }
 0x282   :  { %1753 = vmatprep.subr.bf16.mxu0 %v5198_v19  ;;  %v5376_v19 = vld [vmem:[#allocation13 + $0x430] ss:$8 sps:$4 sm:$0xff]  }
 0x283   :  { %3733 = vmatpush1.bf16.msra.mxu1 %v5328_v29  ;;  %v5402_v29 = vld [vmem:[#allocation13 + $0x474] ss:$8 sps:$4 sm:$0xff]  }
 0x284   :  { %3734 = vmatprep.subr.bf16.mxu1 %v5336_v54  ;;  %v5349_v54 = vld [vmem:[#allocation8 + $0x160] ss:$8 sps:$4 sm:$0xff]  }
 0x285   :  { %1754 = vmatpush1.bf16.msra.mxu0 %v5196_v3  ;;  %v5339_v3 = vld [vmem:[#allocation8 + $0x144] ss:$8 sps:$4 sm:$0xff]  }
 0x286   :  { %1755 = vmatprep.subr.bf16.mxu0 %v5204_v23  ;;  %v5382_v23 = vld [vmem:[#allocation13 + $0x440] ss:$8 sps:$4 sm:$0xff]  }
 0x287   :  { %3735 = vmatpush1.bf16.msra.mxu1 %v5334_v43  ;;  %v5408_v43 = vld [vmem:[#allocation13 + $0x484] ss:$8 sps:$4 sm:$0xff]  }
 0x288   :  { %3736 = vmatprep.subr.bf16.mxu1 %v5342_v9  ;;  %v5355_v9 = vld [vmem:[#allocation8 + $0x170] ss:$8 sps:$4 sm:$0xff]  }
 0x289   :  { %1756 = vmatpush1.bf16.msra.mxu0 %v5202_v30  ;;  %v5345_v30 = vld [vmem:[#allocation8 + $0x154] ss:$8 sps:$4 sm:$0xff]  }
 0x28a   :  { %1757 = vmatprep.subr.bf16.mxu0 %v5210_v55  ;;  %v5388_v55 = vld [vmem:[#allocation13 + $0x450] ss:$8 sps:$4 sm:$0xff]  }
 0x28b   :  { %3737 = vmatpush1.bf16.msra.mxu1 %v5340_v58  ;;  %v5411_v58 = vld [vmem:[#allocation13 + $0x494] ss:$8 sps:$4 sm:$0xff]  }
 0x28c   :  { %3738 = vmatprep.subr.bf16.mxu1 %v5348_v48  ;;  %v5361_v48 = vld [vmem:[#allocation8 + $0x180] ss:$8 sps:$4 sm:$0xff]  }
 0x28d   :  { %1758 = vmatpush1.bf16.msra.mxu0 %v5208_v50  ;;  %v5351_v50 = vld [vmem:[#allocation8 + $0x164] ss:$8 sps:$4 sm:$0xff]  }
 0x28e   :  { %1759 = vmatprep.subr.bf16.mxu0 %v5216_v28  ;;  %v5394_v28 = vld [vmem:[#allocation13 + $0x460] ss:$8 sps:$4 sm:$0xff]  }
 0x28f   :  { %3739 = vmatpush1.bf16.msra.mxu1 %v5346_v41  ;;  %v5375_v41 = vld [vmem:[#allocation8 + $0x1a4] ss:$8 sps:$4 sm:$0xff]  }
 0x290   :  { %3740 = vmatprep.subr.bf16.mxu1 %v5354_v53  ;;  %v5412_v53 = vld [vmem:[#allocation13 + $0x4a0] ss:$8 sps:$4 sm:$0xff]  }
 0x291   :  { %1760 = vmatpush1.bf16.msra.mxu0 %v5214_v33  ;;  %v5357_v33 = vld [vmem:[#allocation8 + $0x174] ss:$8 sps:$4 sm:$0xff]  }
 0x292   :  { %1761 = vmatprep.subr.bf16.mxu0 %v5222_v35  ;;  %v5400_v35 = vld [vmem:[#allocation13 + $0x470] ss:$8 sps:$4 sm:$0xff]  }
 0x293   :  { %3741 = vmatpush1.bf16.msra.mxu1 %v5352_v63 }
 0x294   :  { %3751 = vmatprep.subr.bf16.mxu1 %v5360_v5 }
 0x295   :  { %1762 = vmatpush1.bf16.msra.mxu0 %v5220_v45  ;;  %v5363_v45 = vld [vmem:[#allocation8 + $0x184] ss:$8 sps:$4 sm:$0xff]  }
 0x296   :  { %1763 = vmatprep.subr.bf16.mxu0 %v5228_v46  ;;  %3743 = vmatmul.mubr.bf16.vlgmr.msra.gmra.mrb[4].mxu1 %v2041_v8  ;;  %v5406_v46 = vld [vmem:[#allocation13 + $0x480] ss:$8 sps:$4 sm:$0xff]  }
 0x297   :  { %3752 = vmatpush1.bf16.msra.mxu1 %v5358_v31  ;;  %v5381_v31 = vld [vmem:[#allocation8 + $0x1b4] ss:$8 sps:$4 sm:$0xff]  }
 0x298   :  { %3753 = vmatprep.subr.bf16.mxu1 %v5366_v38  ;;  %v5415_v38 = vld [vmem:[#allocation13 + $0x4b0] ss:$8 sps:$4 sm:$0xff]  }
 0x299   :  { %1764 = vmatpush1.bf16.msra.mxu0 %v5226_v52  ;;  %v5414_v52 = vld [vmem:[#allocation13 + $0x4a4] ss:$8 sps:$4 sm:$0xff]  }
 0x29a   :  { %1765 = vmatprep.subr.bf16.mxu0 %v5234_v44  ;;  %v5367_v44 = vld [vmem:[#allocation8 + $0x190] ss:$8 sps:$4 sm:$0xff]  }
 0x29b   :  { %3754 = vmatpush1.bf16.msra.mxu1 %v5364_v14  ;;  %v5379_v14 = vld [vmem:[#allocation8 + $0x1b0] ss:$8 sps:$4 sm:$0xff]  }
 0x29c   :  { %3755 = vmatprep.subr.bf16.mxu1 %v5372_v36 }
 0x29d   :  { %1766 = vmatpush1.bf16.msra.mxu0 %v5232_v56  ;;  %v1858_v56 = vld [vmem:[%s6356_s1 + $0xa] sm:$0x3f] }
 0x29e   :  { %1767 = vmatprep.subr.bf16.mxu0 %v5240_v57  ;;  %v5417_v57 = vld [vmem:[#allocation13 + $0x4b4] ss:$8 sps:$4 sm:$0xff]   ;;  %v6214_v63 = vrot.slane %v1858_v56, %v6046_v40  ;;  %v1900_v1 = vrot.slane %v1858_v56, %v6033_v39  ;;  %v6218_v2 = vrot.slane %v1858_v56, %v6062_v22  ;;  %v6221_v5 = vrot.slane %v1858_v56, %v6049_v42 }
 0x29f   :  { %3756 = vmatpush1.bf16.msra.mxu1 %v5370_v59  ;;  %v5423_v59 = vld [vmem:[#allocation13 + $0x4d4] ss:$8 sps:$4 sm:$0xff]  }
 0x2a0   :  { %3757 = vmatprep.subr.bf16.mxu1 %v5378_v61  ;;  %v1982_v8 = vcombine.low %v6214_v63, %v1900_v1  ;;  %v2044_v10 = vpack.c.bf16 %v1900_v1, %v1900_v1  ;;  %v5385_v61 = vld [vmem:[#allocation8 + $0x1c0] ss:$8 sps:$4 sm:$0xff]  }
 0x2a1   :  { %1768 = vmatpush1.bf16.msra.mxu0 %v5238_v6  ;;  %v5373_v6 = vld [vmem:[#allocation8 + $0x1a0] ss:$8 sps:$4 sm:$0xff]  }
 0x2a2   :  { %1778 = vmatprep.subr.bf16.mxu0 %v5315_v11  ;;  %v1983_v11 = vcombine.low %v6218_v2, %v6221_v5  ;;  %3783 = vmatprep.mubr.bf16.mxu1 %v2044_v10  ;;  %v5462_v1 = vld [vmem:[#allocation13 + $0x5a4] ss:$8 sps:$4 sm:$0xff]  }
 0x2a3   :  { %3758 = vmatpush1.bf16.msra.mxu1 %v5376_v19  ;;  %v5426_v19 = vld [vmem:[#allocation13 + $0x4e4] ss:$8 sps:$4 sm:$0xff]  }
 0x2a4   :  { %1770 = vmatmul.mubr.bf16.vlgmr.msra.gmra.mrb[4].mxu0 %v1349_v12  ;;  %3759 = vmatprep.subr.bf16.mxu1 %v5384_v20  ;;  %v6227_v12 = vrot.slane %v1982_v8, %v6147_v7  ;;  %v5391_v20 = vld [vmem:[#allocation8 + $0x1d0] ss:$8 sps:$4 sm:$0xff]   ;;  %v5463_v8 = vld [vmem:[#allocation13 + $0x5b0] ss:$8 sps:$4 sm:$0xff]  }
 0x2a5   :  { %1779 = vmatpush1.bf16.msra.mxu0 %v5313_v34  ;;  %v5420_v34 = vld [vmem:[#allocation13 + $0x4c4] ss:$8 sps:$4 sm:$0xff]  }
 0x2a6   :  { %1780 = vmatprep.subr.bf16.mxu0 %v5321_v37  ;;  %v6230_v37 = vrot.slane %v1983_v11, %v6147_v7  ;;  %v5468_v10 = vld [vmem:[#allocation13 + $0x5c4] ss:$8 sps:$4 sm:$0xff]   ;;  %v5466_v11 = vld [vmem:[#allocation13 + $0x5c0] ss:$8 sps:$4 sm:$0xff]  }
 0x2a7   :  { %3760 = vmatpush1.bf16.msra.mxu1 %v5382_v23  ;;  %v5429_v23 = vld [vmem:[#allocation13 + $0x4f4] ss:$8 sps:$4 sm:$0xff]  }
 0x2a8   :  { %3761 = vmatprep.subr.bf16.mxu1 %v5390_v24  ;;  %v2014_v36 = vcombine.low %v6227_v12, %v6230_v37  ;;  %v5397_v24 = vld [vmem:[#allocation8 + $0x1e0] ss:$8 sps:$4 sm:$0xff]   ;;  %v5588_v12 = vld [vmem:[%s6366_s11 + $0x78] sm:$0xff]   ;;  %v3915_v37 = vld [vmem:[#allocation14] sm:$0x3] }
 0x2a9   :  { %1781 = vmatpush1.bf16.msra.mxu0 %v5319_v16  ;;  %v5387_v16 = vld [vmem:[#allocation8 + $0x1c4] ss:$8 sps:$4 sm:$0xff]  }
 0x2aa   :  { %1782 = vmatprep.subr.bf16.mxu0 %v5327_v15  ;;  %v5418_v15 = vld [vmem:[#allocation13 + $0x4c0] ss:$8 sps:$4 sm:$0xff]  }
 0x2ab   :  { %3762 = vmatpush1.bf16.msra.mxu1 %v5388_v55  ;;  %v5432_v55 = vld [vmem:[#allocation13 + $0x504] ss:$8 sps:$4 sm:$0xff]  }
 0x2ac   :  { %3763 = vmatprep.subr.bf16.mxu1 %v5396_v25  ;;  %v5403_v25 = vld [vmem:[#allocation8 + $0x1f0] ss:$8 sps:$4 sm:$0xff]  }
 0x2ad   :  { %1783 = vmatpush1.bf16.msra.mxu0 %v5325_v4  ;;  %v5393_v4 = vld [vmem:[#allocation8 + $0x1d4] ss:$8 sps:$4 sm:$0xff]  }
 0x2ae   :  { %1784 = vmatprep.subr.bf16.mxu0 %v5333_v17  ;;  %v5421_v17 = vld [vmem:[#allocation13 + $0x4d0] ss:$8 sps:$4 sm:$0xff]  }
 0x2af   :  { %3764 = vmatpush1.bf16.msra.mxu1 %v5394_v28  ;;  %v2046_v28 = vpack.c.bf16 %v6221_v5, %v6221_v5  ;;  %v5460_v5 = vld [vmem:[#allocation13 + $0x5a0] ss:$8 sps:$4 sm:$0xff]  }
 0x2b0   :  { %3765 = vmatprep.subr.bf16.mxu1 %v5402_v29  ;;  %v6239_v29 = vrot.slane %v1858_v56, %v6085_v18  ;;  %v5441_v18 = vld [vmem:[#allocation13 + $0x534] ss:$8 sps:$4 sm:$0xff]  }
 0x2b1   :  { %1785 = vmatpush1.bf16.msra.mxu0 %v5331_v21  ;;  %v5399_v21 = vld [vmem:[#allocation8 + $0x1e4] ss:$8 sps:$4 sm:$0xff]  }
 0x2b2   :  { %1786 = vmatprep.subr.bf16.mxu0 %v5339_v3  ;;  %v5424_v3 = vld [vmem:[#allocation13 + $0x4e0] ss:$8 sps:$4 sm:$0xff]  }
 0x2b3   :  { %3766 = vmatpush1.bf16.msra.mxu1 %v5400_v35 }
 0x2b4   :  { %3767 = vmatprep.subr.bf16.mxu1 %v5408_v43  ;;  %v5433_v43 = vld [vmem:[#allocation13 + $0x510] ss:$8 sps:$4 sm:$0xff]  }
 0x2b5   :  { %1787 = vmatpush1.bf16.msra.mxu0 %v5337_v32  ;;  %v5405_v32 = vld [vmem:[#allocation8 + $0x1f4] ss:$8 sps:$4 sm:$0xff]  }
 0x2b6   :  { %1788 = vmatprep.subr.bf16.mxu0 %v5345_v30  ;;  %v5427_v30 = vld [vmem:[#allocation13 + $0x4f0] ss:$8 sps:$4 sm:$0xff]  }
 0x2b7   :  { %3768 = vmatpush1.bf16.msra.mxu1 %v5406_v46  ;;  %v5439_v46 = vld [vmem:[#allocation13 + $0x530] ss:$8 sps:$4 sm:$0xff]  }
 0x2b8   :  { %3769 = vmatprep.subr.bf16.mxu1 %v5411_v58  ;;  %v5442_v58 = vld [vmem:[#allocation13 + $0x540] ss:$8 sps:$4 sm:$0xff]  }
 0x2b9   :  { %1789 = vmatpush1.bf16.msra.mxu0 %v5343_v27  ;;  %v2043_v27 = vpack.c.bf16 %v6214_v63, %v6214_v63  ;;  %v5457_v63 = vld [vmem:[#allocation13 + $0x590] ss:$8 sps:$4 sm:$0xff]  }
 0x2ba   :  { %1790 = vmatprep.subr.bf16.mxu0 %v5351_v50  ;;  %v5430_v50 = vld [vmem:[#allocation13 + $0x500] ss:$8 sps:$4 sm:$0xff]  }
 0x2bb   :  { %3770 = vmatpush1.bf16.msra.mxu1 %v5409_v51  ;;  %v5450_v51 = vld [vmem:[#allocation13 + $0x564] ss:$8 sps:$4 sm:$0xff]  }
 0x2bc   :  { %3771 = vmatprep.subr.bf16.mxu1 %v5414_v52  ;;  %v5448_v52 = vld [vmem:[#allocation13 + $0x560] ss:$8 sps:$4 sm:$0xff]  }
 0x2bd   :  { %1791 = vmatpush1.bf16.msra.mxu0 %v5349_v54  ;;  %v6242_v54 = vrot.slane %v1858_v56, %v6065_v26  ;;  %v5444_v26 = vld [vmem:[#allocation13 + $0x544] ss:$8 sps:$4 sm:$0xff]   ;;  %v5454_v56 = vld [vmem:[#allocation13 + $0x580] ss:$8 sps:$4 sm:$0xff]  }
 0x2be   :  { %1792 = vmatprep.subr.bf16.mxu0 %v5357_v33  ;;  %v5435_v33 = vld [vmem:[#allocation13 + $0x514] ss:$8 sps:$4 sm:$0xff]  }
 0x2bf   :  { %3772 = vmatpush1.bf16.msra.mxu1 %v5412_v53  ;;  %v1984_v35 = vcombine.low %v6239_v29, %v6242_v54  ;;  %v5456_v53 = vld [vmem:[#allocation13 + $0x584] ss:$8 sps:$4 sm:$0xff]  }
 0x2c0   :  { %3773 = vmatprep.subr.bf16.mxu1 %v5417_v57  ;;  %v5459_v57 = vld [vmem:[#allocation13 + $0x594] ss:$8 sps:$4 sm:$0xff]  }
 0x2c1   :  { %1793 = vmatpush1.bf16.msra.mxu0 %v5355_v9  ;;  %v5438_v9 = vld [vmem:[#allocation13 + $0x524] ss:$8 sps:$4 sm:$0xff]  }
 0x2c2   :  { %1794 = vmatprep.subr.bf16.mxu0 %v5363_v45  ;;  %v5436_v45 = vld [vmem:[#allocation13 + $0x520] ss:$8 sps:$4 sm:$0xff]  }
 0x2c3   :  { %3774 = vmatpush1.bf16.msra.mxu1 %v5415_v38  ;;  %v5469_v38 = vld [vmem:[#allocation13 + $0x5d0] ss:$8 sps:$4 sm:$0xff]  }
 0x2c4   :  { %3775 = vmatprep.subr.bf16.mxu1 %v5420_v34  ;;  %v5474_v34 = vld [vmem:[#allocation13 + $0x5e4] ss:$8 sps:$4 sm:$0xff]  }
 0x2c5   :  { %1795 = vmatpush1.bf16.msra.mxu0 %v5361_v48  ;;  %v5447_v48 = vld [vmem:[#allocation13 + $0x554] ss:$8 sps:$4 sm:$0xff]  }
 0x2c6   :  { %1796 = vmatprep.subr.bf16.mxu0 %v5369_v49  ;;  %v5445_v49 = vld [vmem:[#allocation13 + $0x550] ss:$8 sps:$4 sm:$0xff]  }
 0x2c7   :  { %3776 = vmatpush1.bf16.msra.mxu1 %v5418_v15  ;;  %v5475_v15 = vld [vmem:[#allocation13 + $0x5f0] ss:$8 sps:$4 sm:$0xff]  }
 0x2c8   :  { %3777 = vmatprep.subr.bf16.mxu1 %v5423_v59  ;;  %v5480_v59 = vld [vmem:[#allocation13 + $0x604] ss:$8 sps:$4 sm:$0xff]  }
 0x2c9   :  { %1797 = vmatpush1.bf16.msra.mxu0 %v5367_v44  ;;  %v5453_v44 = vld [vmem:[#allocation13 + $0x574] ss:$8 sps:$4 sm:$0xff]  }
 0x2ca   :  { %1798 = vmatprep.subr.bf16.mxu0 %v5375_v41  ;;  %v5451_v41 = vld [vmem:[#allocation13 + $0x570] ss:$8 sps:$4 sm:$0xff]  }
 0x2cb   :  { %3778 = vmatpush1.bf16.msra.mxu1 %v5421_v17  ;;  %v2048_v17 = vpack.c.bf16 %v6242_v54, %v6242_v54  ;;  %v5587_v54 = vld [vmem:[%s6366_s11 + $0x30] sm:$0xff]  }
 0x2cc   :  { %3779 = vmatprep.subr.bf16.mxu1 %v5426_v19  ;;  %v5483_v19 = vld [vmem:[#allocation13 + $0x614] ss:$8 sps:$4 sm:$0xff]  }
 0x2cd   :  { %1799 = vmatpush1.bf16.msra.mxu0 %v5373_v6  ;;  %v5465_v6 = vld [vmem:[#allocation13 + $0x5b4] ss:$8 sps:$4 sm:$0xff]  }
 0x2ce   :  { %1800 = vmatprep.subr.bf16.mxu0 %v5381_v31  ;;  %v5471_v31 = vld [vmem:[#allocation13 + $0x5d4] ss:$8 sps:$4 sm:$0xff]  }
 0x2cf   :  { %3780 = vmatpush1.bf16.msra.mxu1 %v5424_v3  ;;  %v5484_v3 = vld [vmem:[#allocation13 + $0x620] ss:$8 sps:$4 sm:$0xff]  }
 0x2d0   :  { %3781 = vmatprep.subr.bf16.mxu1 %v5429_v23  ;;  %v5489_v23 = vld [vmem:[#allocation13 + $0x634] ss:$8 sps:$4 sm:$0xff]  }
 0x2d1   :  { %1801 = vmatpush1.bf16.msra.mxu0 %v5379_v14  ;;  %v5472_v14 = vld [vmem:[#allocation13 + $0x5e0] ss:$8 sps:$4 sm:$0xff]  }
 0x2d2   :  { %1802 = vmatprep.subr.bf16.mxu0 %v5387_v16  ;;  %v5477_v16 = vld [vmem:[#allocation13 + $0x5f4] ss:$8 sps:$4 sm:$0xff]  }
 0x2d3   :  { %3782 = vmatpush1.bf16.msra.mxu1 %v5427_v30  ;;  %v5495_v30 = vld [vmem:[#allocation13 + $0x654] ss:$8 sps:$4 sm:$0xff]  }
 0x2d4   :  { %3792 = vmatprep.subr.bf16.mxu1 %v5432_v55  ;;  %v5493_v55 = vld [vmem:[#allocation13 + $0x650] ss:$8 sps:$4 sm:$0xff]  }
 0x2d5   :  { %1803 = vmatpush1.bf16.msra.mxu0 %v5385_v61  ;;  %v2045_v61 = vpack.c.bf16 %v6218_v2, %v6218_v2  ;;  %v5492_v2 = vld [vmem:[#allocation13 + $0x644] ss:$8 sps:$4 sm:$0xff]  }
 0x2d6   :  { %1804 = vmatprep.subr.bf16.mxu0 %v5393_v4  ;;  %3784 = vmatmul.mubr.bf16.vlgmr.msra.gmra.mrb[4].mxu1 %v2043_v27  ;;  %v5478_v4 = vld [vmem:[#allocation13 + $0x600] ss:$8 sps:$4 sm:$0xff]   ;;  %v1291_v27 = vrot.slane %v6186_v47, %v6062_v22 }
 0x2d7   :  { %3793 = vmatpush1.bf16.msra.mxu1 %v5430_v50  ;;  %3824 = vmatprep.mubr.bf16.mxu1 %v2046_v28  ;;  %v1324_v50 = vrot.slane %v6184_v60, %v6062_v22  ;;  %v5496_v28 = vld [vmem:[#allocation13 + $0x660] ss:$8 sps:$4 sm:$0xff]   ;;  %v5499_v22 = vld [vmem:[#allocation13 + $0x670] ss:$8 sps:$4 sm:$0xff]  }
 0x2d8   :  { %3794 = vmatprep.subr.bf16.mxu1 %v5435_v33 }
 0x2d9   :  { %1805 = vmatpush1.bf16.msra.mxu0 %v5391_v20  ;;  %v5481_v20 = vld [vmem:[#allocation13 + $0x610] ss:$8 sps:$4 sm:$0xff]  }
 0x2da   :  { %1806 = vmatprep.subr.bf16.mxu0 %v5399_v21  ;;  %v5486_v21 = vld [vmem:[#allocation13 + $0x624] ss:$8 sps:$4 sm:$0xff]  }
 0x2db   :  { %3795 = vmatpush1.bf16.msra.mxu1 %v5433_v43  ;;  %v1295_v43 = vrot.slane %v6186_v47, %v6049_v42  ;;  %v5504_v47 = vld [vmem:[#allocation13 + $0x684] ss:$8 sps:$4 sm:$0xff]  }
 0x2dc   :  { %3796 = vmatprep.subr.bf16.mxu1 %v5438_v9  ;;  %v1328_v9 = vrot.slane %v6184_v60, %v6049_v42 }
 0x2dd   :  { %1807 = vmatpush1.bf16.msra.mxu0 %v5397_v24  ;;  %v5487_v24 = vld [vmem:[#allocation13 + $0x630] ss:$8 sps:$4 sm:$0xff]  }
 0x2de   :  { %1808 = vmatprep.subr.bf16.mxu0 %v5405_v32  ;;  %v5490_v32 = vld [vmem:[#allocation13 + $0x640] ss:$8 sps:$4 sm:$0xff]  }
 0x2df   :  { %3797 = vmatpush1.bf16.msra.mxu1 %v5436_v45  ;;  %v5501_v45 = vld [vmem:[#allocation13 + $0x674] ss:$8 sps:$4 sm:$0xff]  }
 0x2e0   :  { %3798 = vmatprep.subr.bf16.mxu1 %v5441_v18 }
 0x2e1   :  { %1809 = vmatpush1.bf16.msra.mxu0 %v5403_v25  ;;  %v5498_v25 = vld [vmem:[#allocation13 + $0x664] ss:$8 sps:$4 sm:$0xff]  }
 0x2e3   :  { %3799 = vmatpush1.bf16.msra.mxu1 %v5439_v46 }
 0x2e4   :  { %3800 = vmatprep.subr.bf16.mxu1 %v5444_v26 }
 0x2e7   :  { %3801 = vmatpush1.bf16.msra.mxu1 %v5442_v58 }
 0x2e8   :  { %3802 = vmatprep.subr.bf16.mxu1 %v5447_v48 }
 0x2eb   :  { %3803 = vmatpush1.bf16.msra.mxu1 %v5445_v49 }
 0x2ec   :  { %3804 = vmatprep.subr.bf16.mxu1 %v5450_v51 }
 0x2ef   :  { %3805 = vmatpush1.bf16.msra.mxu1 %v5448_v52  ;;  %v5507_v52 = vld [vmem:[#allocation13 + $0x694] ss:$8 sps:$4 sm:$0xff]  }
 0x2f0   :  { %3806 = vmatprep.subr.bf16.mxu1 %v5453_v44 }
 0x2f3   :  { %3807 = vmatpush1.bf16.msra.mxu1 %v5451_v41  ;;  %v5505_v41 = vld [vmem:[#allocation13 + $0x690] ss:$8 sps:$4 sm:$0xff]  }
 0x2f4   :  { %3808 = vmatprep.subr.bf16.mxu1 %v5456_v53  ;;  %v5510_v53 = vld [vmem:[#allocation13 + $0x6a4] ss:$8 sps:$4 sm:$0xff]  }
 0x2f7   :  { %3809 = vmatpush1.bf16.msra.mxu1 %v5454_v56  ;;  %v5508_v56 = vld [vmem:[#allocation13 + $0x6a0] ss:$8 sps:$4 sm:$0xff]  }
 0x2f8   :  { %3810 = vmatprep.subr.bf16.mxu1 %v5459_v57  ;;  %v5513_v57 = vld [vmem:[#allocation13 + $0x6b4] ss:$8 sps:$4 sm:$0xff]  }
 0x2fb   :  { %3811 = vmatpush1.bf16.msra.mxu1 %v5457_v63  ;;  %v5511_v63 = vld [vmem:[#allocation13 + $0x6b0] ss:$8 sps:$4 sm:$0xff]  }
 0x2fc   :  { %3812 = vmatprep.subr.bf16.mxu1 %v5462_v1  ;;  %v5516_v1 = vld [vmem:[#allocation13 + $0x6c4] ss:$8 sps:$4 sm:$0xff]  }
 0x2ff   :  { %3813 = vmatpush1.bf16.msra.mxu1 %v5460_v5  ;;  %v5514_v5 = vld [vmem:[#allocation13 + $0x6c0] ss:$8 sps:$4 sm:$0xff]  }
 0x300   :  { %3814 = vmatprep.subr.bf16.mxu1 %v5465_v6  ;;  %v5519_v6 = vld [vmem:[#allocation13 + $0x6d4] ss:$8 sps:$4 sm:$0xff]  }
 0x303   :  { %3815 = vmatpush1.bf16.msra.mxu1 %v5463_v8  ;;  %v5517_v8 = vld [vmem:[#allocation13 + $0x6d0] ss:$8 sps:$4 sm:$0xff]  }
 0x304   :  { %3816 = vmatprep.subr.bf16.mxu1 %v5468_v10  ;;  %v5522_v10 = vld [vmem:[#allocation13 + $0x6e4] ss:$8 sps:$4 sm:$0xff]  }
 0x307   :  { %3817 = vmatpush1.bf16.msra.mxu1 %v5466_v11  ;;  %v5520_v11 = vld [vmem:[#allocation13 + $0x6e0] ss:$8 sps:$4 sm:$0xff]  }
 0x308   :  { %3818 = vmatprep.subr.bf16.mxu1 %v5471_v31  ;;  %v5525_v31 = vld [vmem:[#allocation13 + $0x6f4] ss:$8 sps:$4 sm:$0xff]  }
 0x30b   :  { %3819 = vmatpush1.bf16.msra.mxu1 %v5469_v38  ;;  %v5523_v38 = vld [vmem:[#allocation13 + $0x6f0] ss:$8 sps:$4 sm:$0xff]  }
 0x30c   :  { %3820 = vmatprep.subr.bf16.mxu1 %v5474_v34  ;;  %v5528_v34 = vld [vmem:[#allocation13 + $0x704] ss:$8 sps:$4 sm:$0xff]  }
 0x30f   :  { %3821 = vmatpush1.bf16.msra.mxu1 %v5472_v14  ;;  %v2047_v14 = vpack.c.bf16 %v6239_v29, %v6239_v29  ;;  %v5586_v29 = vld [vmem:[%s6366_s11 + $0x70] sm:$0xff]  }
 0x310   :  { %3822 = vmatprep.subr.bf16.mxu1 %v5477_v16  ;;  %v5526_v16 = vld [vmem:[#allocation13 + $0x700] ss:$8 sps:$4 sm:$0xff]  }
 0x313   :  { %3823 = vmatpush1.bf16.msra.mxu1 %v5475_v15  ;;  %v5531_v15 = vld [vmem:[#allocation13 + $0x714] ss:$8 sps:$4 sm:$0xff]  }
 0x314   :  { %3833 = vmatprep.subr.bf16.mxu1 %v5480_v59  ;;  %v5529_v59 = vld [vmem:[#allocation13 + $0x710] ss:$8 sps:$4 sm:$0xff]  }
 0x316   :  { %3825 = vmatmul.mubr.bf16.vlgmr.msra.gmra.mrb[4].mxu1 %v2045_v61  ;;  %v5534_v61 = vld [vmem:[#allocation13 + $0x724] ss:$8 sps:$4 sm:$0xff]  }
 0x317   :  { %3834 = vmatpush1.bf16.msra.mxu1 %v5478_v4  ;;  %3865 = vmatprep.mubr.bf16.mxu1 %v2048_v17  ;;  %v5532_v4 = vld [vmem:[#allocation13 + $0x720] ss:$8 sps:$4 sm:$0xff]   ;;  %v5537_v17 = vld [vmem:[#allocation13 + $0x734] ss:$8 sps:$4 sm:$0xff]  }
 0x318   :  { %3835 = vmatprep.subr.bf16.mxu1 %v5483_v19  ;;  %v5535_v19 = vld [vmem:[#allocation13 + $0x730] ss:$8 sps:$4 sm:$0xff]  }
 0x31b   :  { %3836 = vmatpush1.bf16.msra.mxu1 %v5481_v20  ;;  %v5540_v20 = vld [vmem:[#allocation13 + $0x744] ss:$8 sps:$4 sm:$0xff]  }
 0x31c   :  { %3837 = vmatprep.subr.bf16.mxu1 %v5486_v21  ;;  %v5538_v21 = vld [vmem:[#allocation13 + $0x740] ss:$8 sps:$4 sm:$0xff]  }
 0x31f   :  { %3838 = vmatpush1.bf16.msra.mxu1 %v5484_v3  ;;  %v5543_v3 = vld [vmem:[#allocation13 + $0x754] ss:$8 sps:$4 sm:$0xff]  }
 0x320   :  { %3839 = vmatprep.subr.bf16.mxu1 %v5489_v23  ;;  %v5541_v23 = vld [vmem:[#allocation13 + $0x750] ss:$8 sps:$4 sm:$0xff]  }
 0x323   :  { %3840 = vmatpush1.bf16.msra.mxu1 %v5487_v24  ;;  %v5546_v24 = vld [vmem:[#allocation13 + $0x764] ss:$8 sps:$4 sm:$0xff]  }
 0x324   :  { %3841 = vmatprep.subr.bf16.mxu1 %v5492_v2  ;;  %v5544_v2 = vld [vmem:[#allocation13 + $0x760] ss:$8 sps:$4 sm:$0xff]  }
 0x327   :  { %3842 = vmatpush1.bf16.msra.mxu1 %v5490_v32  ;;  %v5549_v32 = vld [vmem:[#allocation13 + $0x774] ss:$8 sps:$4 sm:$0xff]  }
 0x328   :  { %3843 = vmatprep.subr.bf16.mxu1 %v5495_v30  ;;  %v5547_v30 = vld [vmem:[#allocation13 + $0x770] ss:$8 sps:$4 sm:$0xff]  }
 0x32b   :  { %3844 = vmatpush1.bf16.msra.mxu1 %v5493_v55  ;;  %v5552_v55 = vld [vmem:[#allocation13 + $0x784] ss:$8 sps:$4 sm:$0xff]  }
 0x32c   :  { %3845 = vmatprep.subr.bf16.mxu1 %v5498_v25  ;;  %v5550_v25 = vld [vmem:[#allocation13 + $0x780] ss:$8 sps:$4 sm:$0xff]  }
 0x32f   :  { %3846 = vmatpush1.bf16.msra.mxu1 %v5496_v28  ;;  %v5558_v28 = vld [vmem:[#allocation13 + $0x7a4] ss:$8 sps:$4 sm:$0xff]  }
 0x330   :  { %3847 = vmatprep.subr.bf16.mxu1 %v5501_v45  ;;  %v5564_v45 = vld [vmem:[#allocation13 + $0x7c4] ss:$8 sps:$4 sm:$0xff]  }
 0x333   :  { %3848 = vmatpush1.bf16.msra.mxu1 %v5499_v22  ;;  %v5570_v22 = vld [vmem:[#allocation13 + $0x7e4] ss:$8 sps:$4 sm:$0xff]  }
 0x334   :  { %3849 = vmatprep.subr.bf16.mxu1 %v5504_v47  ;;  %v5571_v47 = vld [vmem:[#allocation13 + $0x7f0] ss:$8 sps:$4 sm:$0xff]  }
 0x337   :  { %v1201_v33 = vpop.f32.mrb[2].mxu0 }
 0x338   :  { %v5034_v18 = vadd.f32 %v6188_v62, %v1201_v33  ;;  %v1203_v46 = vpop.f32.mrb[3].mxu0  ;;  %v5556_v33 = vld [vmem:[#allocation13 + $0x7a0] ss:$8 sps:$4 sm:$0xff]  }
 0x339   :  { %v5035_v26 = vadd.f32 %v6190_v0, %v1203_v46  ;;  %v5502_v0 = vld [vmem:[#allocation13 + $0x680] ss:$8 sps:$4 sm:$0xff]   ;;  %v5567_v46 = vld [vmem:[#allocation13 + $0x7d4] ss:$8 sps:$4 sm:$0xff]  }
 0x33a   :  { %vm1302_vm4 = vcmp.gt.f32.partialorder %v5034_v18, %v1291_v27  ;;  %vm1335_vm5 = vcmp.lt.f32.partialorder %v5034_v18, %v1324_v50  ;;  %3850 = vmatpush1.bf16.msra.mxu1 %v5502_v0  ;;  %v5555_v27 = vld [vmem:[#allocation13 + $0x794] ss:$8 sps:$4 sm:$0xff]   ;;  %v5553_v50 = vld [vmem:[#allocation13 + $0x790] ss:$8 sps:$4 sm:$0xff]   ;;  %v5562_v18 = vld [vmem:[#allocation13 + $0x7c0] ss:$8 sps:$4 sm:$0xff]  }
 0x33b   :  { %v4150_v58 = vsel %vm1302_vm4, 1.0, %v5837_v13  ;;  %v4154_v48 = vsel %vm1335_vm5, 1.0, %v5837_v13  ;;  %vm1303_vm6 = vcmp.gt.f32.partialorder %v5035_v26, %v1295_v43  ;;  %vm1336_vm7 = vcmp.lt.f32.partialorder %v5035_v26, %v1328_v9  ;;  %3851 = vmatprep.subr.bf16.mxu1 %v5507_v52  ;;  %v5561_v43 = vld [vmem:[#allocation13 + $0x7b4] ss:$8 sps:$4 sm:$0xff]   ;;  %v5559_v9 = vld [vmem:[#allocation13 + $0x7b0] ss:$8 sps:$4 sm:$0xff]  }
 0x33c   :  { %v1347_v42 = vsub.f32 %v4150_v58, %v4154_v48  ;;  %v4151_v60 = vsel %vm1303_vm6, 1.0, %v5837_v13  ;;  %v4155_v62 = vsel %vm1336_vm7, 1.0, %v5837_v13  ;;  %v5565_v26 = vld [vmem:[#allocation13 + $0x7d0] ss:$8 sps:$4 sm:$0xff]   ;;  %v5568_v58 = vld [vmem:[#allocation13 + $0x7e0] ss:$8 sps:$4 sm:$0xff]  }
 0x33d   :  { %v1348_v49 = vsub.f32 %v4151_v60, %v4155_v62  ;;  %v5573_v48 = vld [vmem:[#allocation13 + $0x7f4] ss:$8 sps:$4 sm:$0xff]   ;;  %v5578_v0 = vld [vmem:[%s6366_s11 + $0x50] sm:$0xff]   ;;  %v5580_v52 = vld [vmem:[%s6366_s11 + $0x58] sm:$0xff]  }
 0x33e   :  { %v1351_v44 = vpack.c.bf16 %v1347_v42, %v1347_v42  ;;  %3852 = vmatpush1.bf16.msra.mxu1 %v5505_v41  ;;  %v5574_v42 = vld [vmem:[%s6366_s11 + $0x40] sm:$0xff]   ;;  %v5576_v62 = vld [vmem:[%s6366_s11 + $0x48] sm:$0xff]  }
 0x33f   :  { %v1352_v51 = vpack.c.bf16 %v1348_v49, %v1348_v49  ;;  %3853 = vmatprep.subr.bf16.mxu1 %v5510_v53  ;;  %v5575_v60 = vld [vmem:[%s6366_s11] sm:$0xff]   ;;  %4500 = vmatprep.subr.bf16.mxu0 %v5574_v42  ;;  %v5577_v49 = vld [vmem:[%s6366_s11 + $0x8] sm:$0xff]  }
 0x340   :  { %v5582_v41 = vld [vmem:[%s6366_s11 + $0x60] sm:$0xff]  }
 0x341   :  { %1810 = vmatprep.mubr.bf16.mxu0 %v1352_v51  ;;  %v5579_v51 = vld [vmem:[%s6366_s11 + $0x10] sm:$0xff]   ;;  %v5583_v53 = vld [vmem:[%s6366_s11 + $0x20] sm:$0xff]  }
 0x342   :  { %1811 = vmatmul.mubr.bf16.vlgmr.msra.gmra.mrb[4].mxu0 %v1351_v44  ;;  %3854 = vmatpush1.bf16.msra.mxu1 %v5508_v56  ;;  %v5581_v44 = vld [vmem:[%s6366_s11 + $0x18] sm:$0xff]   ;;  %v5584_v56 = vld [vmem:[%s6366_s11 + $0x68] sm:$0xff]  }
 0x343   :  { %3855 = vmatprep.subr.bf16.mxu1 %v5513_v57  ;;  %4501 = vmatpush3.bf16.msra.mxu0 %v5575_v60  ;;  %v5585_v57 = vld [vmem:[%s6366_s11 + $0x28] sm:$0xff]  }
 0x344   :  { %4502 = vmatprep.subr.bf16.mxu0 %v5576_v62 }
 0x346   :  { %3856 = vmatpush1.bf16.msra.mxu1 %v5511_v63  ;;  %v1819_v63 = vld [vmem:[#allocation10] sm:$0x3] }
 0x347   :  { %3857 = vmatprep.subr.bf16.mxu1 %v5516_v1  ;;  %4503 = vmatpush3.bf16.msra.mxu0 %v5577_v49  ;;  %v1820_v1 = vld [vmem:[#allocation11] sm:$0x3] }
 0x348   :  { %4504 = vmatprep.subr.bf16.mxu0 %v5578_v0 }
 0x34a   :  { %3858 = vmatpush1.bf16.msra.mxu1 %v5514_v5  ;;  %v1825_v5 = vrot.slane %v1820_v1, %v6046_v40 }
 0x34b   :  { %3859 = vmatprep.subr.bf16.mxu1 %v5519_v6  ;;  %4505 = vmatpush3.bf16.msra.mxu0 %v5579_v51  ;;  %v1842_v6 = vrot.slane %v1819_v63, %v6046_v40 }
 0x34c   :  { %4506 = vmatprep.subr.bf16.mxu0 %v5580_v52 }
 0x34e   :  { %3860 = vmatpush1.bf16.msra.mxu1 %v5517_v8  ;;  %v1829_v8 = vrot.slane %v1820_v1, %v6033_v39 }
 0x34f   :  { %3861 = vmatprep.subr.bf16.mxu1 %v5522_v10  ;;  %4507 = vmatpush3.bf16.msra.mxu0 %v5581_v44  ;;  %v1846_v10 = vrot.slane %v1819_v63, %v6033_v39 }
 0x350   :  { %4508 = vmatprep.subr.bf16.mxu0 %v5582_v41 }
 0x352   :  { %3862 = vmatpush1.bf16.msra.mxu1 %v5520_v11 }
 0x353   :  { %3863 = vmatprep.subr.bf16.mxu1 %v5525_v31  ;;  %4509 = vmatpush3.bf16.msra.mxu0 %v5583_v53 }
 0x354   :  { %4510 = vmatprep.subr.bf16.mxu0 %v5584_v56 }
 0x356   :  { %3864 = vmatpush1.bf16.msra.mxu1 %v5523_v38 }
 0x357   :  { %3874 = vmatprep.subr.bf16.mxu1 %v5528_v34  ;;  %4511 = vmatpush3.bf16.msra.mxu0 %v5585_v57 }
 0x358   :  { %4512 = vmatprep.subr.bf16.mxu0 %v5586_v29 }
 0x359   :  { %3866 = vmatmul.mubr.bf16.vlgmr.msra.gmra.mrb[4].mxu1 %v2047_v14 }
 0x35a   :  { %3875 = vmatpush1.bf16.msra.mxu1 %v5526_v16 }
 0x35b   :  { %3876 = vmatprep.subr.bf16.mxu1 %v5531_v15  ;;  %4513 = vmatpush3.bf16.msra.mxu0 %v5587_v54 }
 0x35c   :  { %4514 = vmatprep.subr.bf16.mxu0 %v5588_v12 }
 0x35e   :  { %3877 = vmatpush1.bf16.msra.mxu1 %v5529_v59 }
 0x35f   :  { %3878 = vmatprep.subr.bf16.mxu1 %v5534_v61 }
 0x362   :  { %3879 = vmatpush1.bf16.msra.mxu1 %v5532_v4 }
 0x363   :  { %3880 = vmatprep.subr.bf16.mxu1 %v5537_v17  ;;  %v2006_v17 = vrot.slane %v1984_v35, %v6147_v7 }
 0x366   :  { %3881 = vmatpush1.bf16.msra.mxu1 %v5535_v19 }
 0x367   :  { %3882 = vmatprep.subr.bf16.mxu1 %v5540_v20 }
 0x36a   :  { %3883 = vmatpush1.bf16.msra.mxu1 %v5538_v21 }
 0x36b   :  { %3884 = vmatprep.subr.bf16.mxu1 %v5543_v3 }
 0x36e   :  { %3885 = vmatpush1.bf16.msra.mxu1 %v5541_v23  ;;  %v2022_v23 = vrot.slane %v2014_v36, %v6147_v7  ;;  %v3916_v36 = vld [vmem:[#allocation16] sm:$0x3] }
 0x36f   :  { %3886 = vmatprep.subr.bf16.mxu1 %v5546_v24  ;;  %v3921_v35 = vrot.slane %v3916_v36, %v6046_v40 }
 0x372   :  { %3887 = vmatpush1.bf16.msra.mxu1 %v5544_v2 }
 0x373   :  { %3888 = vmatprep.subr.bf16.mxu1 %v5549_v32 }
 0x376   :  { %3889 = vmatpush1.bf16.msra.mxu1 %v5547_v30  ;;  %v3938_v30 = vrot.slane %v3915_v37, %v6046_v40 }
 0x377   :  { %3890 = vmatprep.subr.bf16.mxu1 %v5552_v55  ;;  %v3925_v55 = vrot.slane %v3916_v36, %v6033_v39 }
 0x37a   :  { %3891 = vmatpush1.bf16.msra.mxu1 %v5550_v25  ;;  %v3942_v25 = vrot.slane %v3915_v37, %v6033_v39 }
 0x37b   :  { %3892 = vmatprep.subr.bf16.mxu1 %v5555_v27 }
 0x37e   :  { %3893 = vmatpush1.bf16.msra.mxu1 %v5553_v50 }
 0x37f   :  { %3894 = vmatprep.subr.bf16.mxu1 %v5558_v28 }
 0x382   :  { %3895 = vmatpush1.bf16.msra.mxu1 %v5556_v33 }
 0x383   :  { %3896 = vmatprep.subr.bf16.mxu1 %v5561_v43 }
 0x386   :  { %3897 = vmatpush1.bf16.msra.mxu1 %v5559_v9 }
 0x387   :  { %3898 = vmatprep.subr.bf16.mxu1 %v5564_v45 }
 0x38a   :  { %3899 = vmatpush1.bf16.msra.mxu1 %v5562_v18 }
 0x38b   :  { %3900 = vmatprep.subr.bf16.mxu1 %v5567_v46 }
 0x38e   :  { %3901 = vmatpush1.bf16.msra.mxu1 %v5565_v26 }
 0x38f   :  { %3902 = vmatprep.subr.bf16.mxu1 %v5570_v22 }
 0x392   :  { %3903 = vmatpush1.bf16.msra.mxu1 %v5568_v58 }
 0x393   :  { %3904 = vmatprep.subr.bf16.mxu1 %v5573_v48 }
 0x396   :  { %3905 = vmatpush1.bf16.msra.mxu1 %v5571_v47 }
 0x415   :  { %v1812_v11 = vpop.f32.mrb[4].mxu0 }
 0x416   :  { %vm1832_vm8 = vcmp.gt.f32.partialorder %v1812_v11, %v1825_v5  ;;  %vm1849_vm9 = vcmp.lt.f32.partialorder %v1812_v11, %v1842_v6  ;;  %v1814_v31 = vpop.f32.mrb[5].mxu0 }
 0x417   :  { %v4220_v38 = vsel %vm1832_vm8, 1.0, %v5837_v13  ;;  %v4222_v34 = vsel %vm1849_vm9, 1.0, %v5837_v13  ;;  %vm1833_vm10 = vcmp.gt.f32.partialorder %v1814_v31, %v1829_v8  ;;  %vm1850_vm11 = vcmp.lt.f32.partialorder %v1814_v31, %v1846_v10  ;;  %v1816_v14 = vpop.f32.mrb[6].mxu0 }
 0x418   :  { %v1855_v16 = vsub.f32 %v4220_v38, %v4222_v34  ;;  %v4221_v15 = vsel %vm1833_vm10, 1.0, %v5837_v13  ;;  %v4223_v59 = vsel %vm1850_vm11, 1.0, %v5837_v13  ;;  %v1817_v61 = vpop.f32.mrb[7].mxu0 }
 0x419   :  { %v1856_v4 = vsub.f32 %v4221_v15, %v4223_v59 }
 0x41a   :  { %v2049_v21 = vpack.c.bf16 %v1855_v16, %v1855_v16 }
 0x41b   :  { %v1985_v19 = vcombine.low %v1855_v16, %v1856_v4  ;;  %v2050_v20 = vpack.c.bf16 %v1856_v4, %v1856_v4 }
 0x41d   :  { %v2013_v3 = vrot.slane %v1985_v19, %v6147_v7  ;;  %3906 = vmatprep.mubr.bf16.mxu1 %v2050_v20 }
 0x41e   :  { %3907 = vmatmul.mubr.bf16.vlgmr.msra.gmra.mrb[4].mxu1 %v2049_v21 }
 0x41f   :  { %v2015_v24 = vcombine.low %v2006_v17, %v2013_v3 }
 0x421   :  { %v2029_v2 = vrot.slane %v2015_v24, %v6147_v7  ;;  %v5589_v7 = vld [vmem:[%s6366_s11 + $0x38] sm:$0xff]   ;;  %s5838_s11 = smov [#allocation17]  }
 0x422   :  { %4515 = vmatpush3.bf16.msra.mxu0 %v5589_v7 }
 0x423   :  { %v2030_v32 = vcombine.low %v2022_v23, %v2029_v2 }
 0x425   :  { %2034 = vst [vmem:[%s6368_s13 + $0x8] sm:$0xff] %v2030_v32  ;;  %s4131_s13 = sshll.u32 %s5838_s11, 4  ;;  %s4132_s13 = int_to_ptr.vmem [resolvable:$true] %s4131_s13 }
 0x426   :  { %s5789_s7 = scalar_lea.vmem %s4132_s13, 16  ;;  %s5793_s16 = scalar_lea.vmem %s4132_s13, 32 }
 0x427   :  { %p5790_p2 = scmp.ne.s32.totalorder %s4132_s13, %s5789_s7  ;;  %p5794_p3 = scmp.lt.s32.totalorder %s4132_s13, %s4132_s13 }
 0x428   :  { %p5795_p4 = scmp.lt.s32.totalorder %s5793_s16, %s5789_s7 }
 0x42a   :  { %p5796_p5 = por %p5795_p4, %p5794_p3 }
 0x42c   :  { %p5797_p6 = pnand %p5796_p5, %p5790_p2 }
 0x4f1   :  { %v3908_v27 = vpop.f32.mrb[4].mxu1 }
 0x4f2   :  { %vm3928_vm12 = vcmp.gt.f32.partialorder %v3908_v27, %v3921_v35  ;;  %vm3945_vm13 = vcmp.lt.f32.partialorder %v3908_v27, %v3938_v30  ;;  %v3910_v50 = vpop.f32.mrb[5].mxu1 }
 0x4f3   :  { %v4480_v28 = vsel %vm3928_vm12, 1.0, %v5837_v13  ;;  %v4482_v33 = vsel %vm3945_vm13, 1.0, %v5837_v13  ;;  %vm3929_vm14 = vcmp.gt.f32.partialorder %v3910_v50, %v3925_v55  ;;  %vm3946_vm15 = vcmp.lt.f32.partialorder %v3910_v50, %v3942_v25  ;;  %v3912_v43 = vpop.f32.mrb[6].mxu1 }
 0x4f4   :  { %v3951_v9 = vsub.f32 %v4480_v28, %v4482_v33  ;;  %v4481_v45 = vsel %vm3929_vm14, 1.0, %v5837_v13  ;;  %v4483_v40 = vsel %vm3946_vm15, 1.0, %v5837_v13  ;;  %v3913_v18 = vpop.f32.mrb[7].mxu1 }
 0x4f5   :  { %v3952_v46 = vsub.f32 %v4481_v45, %v4483_v40 }
 0x4f6   :  { %v3953_v39 = vpack.c.bf16 %v3951_v9, %v3951_v9 }
 0x4f7   :  { %v3954_v26 = vpack.c.bf16 %v3952_v46, %v3952_v46 }
 0x4f9   :  { %4115 = vmatprep.mubr.bf16.mxu0 %v3954_v26 }
 0x4fa   :  { %4116 = vmatmul.mubr.bf16.vlgmr.msra.gmra.mrb[8].mxu0 %v3953_v39 }
 0x5cd   :  { %v4516_v22 = vpop.f32.mrb[8].mxu0 }
 0x5ce   :  { %v4517_v58 = vpop.f32.mrb[9].mxu0 }
 0x5cf   :  { %v4518_v48 = vadd.f32 %v4517_v58, %v4516_v22  ;;  %v4519_v47 = vpop.f32.mrb[10].mxu0 }
 0x5d0   :  { %v4520_v42 = vpop.f32.mrb[11].mxu0 }
 0x5d1   :  { %4124 = vst.msk [vmem:[#allocation17] sm:$0x1] %vm4123_vm0, %v4518_v48 }
 0x5d2   :  { %5800 = shalt.err (!%p5797_p6)
}
 0x5d3   :  { %s5801_s17 = scalar_lea.hbm %s6367_s12, 16 }
 0x5d4   :  { %p5802_p7 = scmp.ne.s32.totalorder %s6367_s12, %s5801_s17  ;;  %p5805_p8 = scmp.lt.u32.totalorder %s5801_s17, %s6367_s12 }
 0x5d6   :  { %p5807_p9 = pnand %p5805_p8, %p5802_p7 }
 0x5d8   :  { %5810 = shalt.err (!%p5807_p9)
}
 0x5d9   :  { %4134 = dma.vmem_to_hbm [thread:$0]  %s4132_s13, 16, %s6367_s12, [#allocation4]  }
 0x5da   :  { %5821 = dma.done.wait [#allocation4], 16  }
 0x5db   :  { %5822 = vsyncadd [#allocation4], 4294967280 }
 0x5dc   :  { %4142 = vsyncpa [#allocation3], 1 }
 0x5dd   :  { %4143 = vsyncpa [#allocation6], 1 }
 0x5de   :  { %4144 = vsyncpa [#allocation9], 1 }
 0x5df   :  { %4145 = vsyncpa [#allocation12], 1 }
 0x5e0   :  { %4146 = vsyncpa [#allocation15], 1 }
 0x5e1   :  { %4147 = vsyncpa [#allocation4], 1 }

</bundles_post_ra>
